<compile_context>
chip_gen: v6e
topology: v6e:2x2x1
jax: 0.10.0
libtpu: 0.0.40
codegen_flags: <defaults>
</compile_context>

<pallas_src>
import functools

import jax
import jax.numpy as jnp
from jax import lax
from jax.experimental import pallas as pl
from jax.experimental.pallas import tpu as pltpu

EPS = 1e-5
CP = 128   # lane-native channel padding (Cin, Cmid, Cout all padded to CP)


# ------------------------------ Pallas kernel ------------------------------

def down_fused_kernel(x_ref, w1_ref, g1_ref, b1_ref, w2_ref, g2_ref, b2_ref,
                      o_ref, xpad_ref):
    # x_ref    : (N, H, W, CP)            channel-padded input, f32
    # w*_ref   : (9*CP, CP)               im2col conv weights, bf16,
    #                                     rows ordered ((dy*3+dx)*CP + cin)
    # g*/b*_ref: (1, CP)                  BatchNorm gamma/beta, f32
    # o_ref    : (N*(H//2)*(W//2), CP)    f32, lane-dense 2-D output slab
    # xpad_ref : (N, H//2+2, W//2+2, CP)  f32 VMEM scratch; the zero border
    #                                     provides "same" padding for BOTH convs.
    n, hh, ww, cp = x_ref.shape
    h, w = hh // 2, ww // 2
    rows = n * h * w

    # --- MaxPool2d(kernel=2, stride=2) --------------------------------------
    xv = x_ref[...]
    xv = jnp.max(xv.reshape(n, h, 2, ww, cp), axis=2)         # pool H
    pooled = jnp.max(xv.reshape(n, h, w, 2, cp), axis=3)      # pool W -> (N,h,w,CP)

    # --- zero-padded activation scratch (border stays 0 for both convs) -----
    xpad_ref[...] = jnp.zeros_like(xpad_ref)
    xpad_ref[:, 1:h + 1, 1:w + 1, :] = pooled

    def conv3x3_bn_relu(w_ref, g_ref, b_ref):
        # im2col: one (rows, 9*CP) x (9*CP, CP) MXU matmul, bf16 in / f32 acc.
        xp = xpad_ref[...]                                    # (N, h+2, w+2, CP)
        cols = [xp[:, dy:dy + h, dx:dx + w, :].reshape(rows, cp)
                for dy in range(3) for dx in range(3)]
        patches = jnp.concatenate(cols, axis=-1).astype(jnp.bfloat16)
        acc = jnp.dot(patches, w_ref[...],
                      preferred_element_type=jnp.float32)     # (rows, CP) f32

        # BatchNorm (training-mode biased stats), single pass: E[x], E[x^2].
        inv_cnt = 1.0 / rows
        mean = jnp.sum(acc, axis=0, keepdims=True) * inv_cnt
        var = jnp.maximum(
            jnp.sum(acc * acc, axis=0, keepdims=True) * inv_cnt - mean * mean,
            0.0)
        y = (acc - mean) * lax.rsqrt(var + EPS)
        y = y * g_ref[...] + b_ref[...]
        return jnp.maximum(y, 0.0)                            # ReLU (f32 epilogue)

    # conv1 -> BN -> ReLU, result back into the padded scratch interior
    y1 = conv3x3_bn_relu(w1_ref, g1_ref, b1_ref)
    xpad_ref[:, 1:h + 1, 1:w + 1, :] = y1.reshape(n, h, w, cp)

    # conv2 -> BN -> ReLU -> lane-dense store
    o_ref[...] = conv3x3_bn_relu(w2_ref, g2_ref, b2_ref)


# ------------------------------ Pallas glue --------------------------------

def _full_spec(shape):
    zeros = (0,) * len(shape)
    return pl.BlockSpec(shape, lambda i, _z=zeros: _z)


def down_pallas(x_nhwc_p, params):
    n, hh, ww, cp = x_nhwc_p.shape
    h, w = hh // 2, ww // 2
    rows = n * h * w
    return pl.pallas_call(
        down_fused_kernel,
        out_shape=jax.ShapeDtypeStruct((rows, cp), jnp.float32),
        grid=(1,),
        in_specs=[_full_spec(x_nhwc_p.shape),
                  _full_spec(params["w1"].shape), _full_spec(params["g1"].shape),
                  _full_spec(params["b1"].shape),
                  _full_spec(params["w2"].shape), _full_spec(params["g2"].shape),
                  _full_spec(params["b2"].shape)],
        out_specs=_full_spec((rows, cp)),
        scratch_shapes=[pltpu.VMEM((n, h + 2, w + 2, cp), jnp.float32)],
        compiler_params=pltpu.CompilerParams(
            dimension_semantics=("arbitrary",)),
    )(x_nhwc_p, params["w1"], params["g1"], params["b1"],
      params["w2"], params["g2"], params["b2"])


@functools.partial(jax.jit, static_argnames=("out_channels",))
def down_forward(x_nchw, params, out_channels):
    n, cin, hh, ww = x_nchw.shape
    x = jnp.transpose(x_nchw, (0, 2, 3, 1))                   # NCHW -> NHWC
    x = jnp.pad(x, ((0, 0), (0, 0), (0, 0), (0, CP - cin)))   # lane-pad C -> 128
    out2d = down_pallas(x, params)                            # (N*h*w, CP)
    h, w = hh // 2, ww // 2
    out = out2d.reshape(n, h, w, CP)[..., :out_channels]
    return jnp.transpose(out, (0, 3, 1, 2))                   # NHWC -> NCHW


def prepare_params(w1_oihw, g1, b1, w2_oihw, g2, b2, cp=CP):
    """PyTorch-shaped params -> lane-padded, im2col-packed kernel params."""
    def prep_w(w_oihw):
        cout, cin = w_oihw.shape[0], w_oihw.shape[1]
        assert cin <= cp and cout <= cp
        w = jnp.transpose(w_oihw, (2, 3, 1, 0))               # (3,3,Cin,Cout)
        w = jnp.pad(w, ((0, 0), (0, 0), (0, cp - cin), (0, cp - cout)))
        return w.reshape(9 * cp, cp).astype(jnp.bfloat16)     # row = (dy*3+dx)*cp+ci

    def prep_v(v):
        return jnp.pad(v.astype(jnp.float32), (0, cp - v.shape[0])).reshape(1, cp)

    return {"w1": prep_w(w1_oihw), "g1": prep_v(g1), "b1": prep_v(b1),
            "w2": prep_w(w2_oihw), "g2": prep_v(g2), "b2": prep_v(b2)}


# ------------------------- pure-JAX references (check) ----------------------

def _conv3x3_ref(x, w_oihw, emulate_bf16):
    if emulate_bf16:  # emulate the kernel's bf16 MXU operands (f32 accumulation)
        x = x.astype(jnp.bfloat16).astype(jnp.float32)
        w_oihw = w_oihw.astype(jnp.bfloat16).astype(jnp.float32)
    return lax.conv_general_dilated(
        x, w_oihw, window_strides=(1, 1), padding=((1, 1), (1, 1)),
        dimension_numbers=("NCHW", "OIHW", "NCHW"),
        precision=lax.Precision.HIGHEST)


def _bn_relu_ref(y, gamma, beta):
    mean = y.mean(axis=(0, 2, 3), keepdims=True)
    var = ((y - mean) ** 2).mean(axis=(0, 2, 3), keepdims=True)
    y = (y - mean) * lax.rsqrt(var + EPS)
    y = y * gamma.reshape(1, -1, 1, 1) + beta.reshape(1, -1, 1, 1)
    return jnp.maximum(y, 0.0)


def down_ref(x, w1, g1, b1, w2, g2, b2, emulate_bf16=False):
    x = lax.reduce_window(x, -jnp.inf, lax.max,
                          (1, 1, 2, 2), (1, 1, 2, 2), "VALID")
    x = _bn_relu_ref(_conv3x3_ref(x, w1, emulate_bf16), g1, b1)
    x = _bn_relu_ref(_conv3x3_ref(x, w2, emulate_bf16), g2, b2)
    return x


# --------------------------------- main -------------------------------------

if __name__ == "__main__":
    in_channels, out_channels = 4, 8
    mid_channels = out_channels
    N, H, W = 2, 16, 16

    key = jax.random.PRNGKey(0)
    k_x, k_w1, k_w2, k_g1, k_b1, k_g2, k_b2 = jax.random.split(key, 7)

    x = jax.random.normal(k_x, (N, in_channels, H, W), dtype=jnp.float32)
    w1 = 0.1 * jax.random.normal(k_w1, (mid_channels, in_channels, 3, 3), jnp.float32)
    w2 = 0.1 * jax.random.normal(k_w2, (out_channels, mid_channels, 3, 3), jnp.float32)
    g1 = 1.0 + 0.1 * jax.random.normal(k_g1, (mid_channels,), jnp.float32)
    b1 = 0.1 * jax.random.normal(k_b1, (mid_channels,), jnp.float32)
    g2 = 1.0 + 0.1 * jax.random.normal(k_g2, (out_channels,), jnp.float32)
    b2 = 0.1 * jax.random.normal(k_b2, (out_channels,), jnp.float32)

    params = prepare_params(w1, g1, b1, w2, g2, b2)

    out = jax.block_until_ready(down_forward(x, params, out_channels))
    assert out.shape == (N, out_channels, H // 2, W // 2), out.shape

    # Tight check against a reference that emulates the kernel's bf16 operands.
    ref_bf16 = jax.block_until_ready(
        down_ref(x, w1, g1, b1, w2, g2, b2, emulate_bf16=True))
    max_err = float(jnp.max(jnp.abs(out - ref_bf16)))
    assert max_err < 1e-2, max_err

    # Loose sanity check against the pure-f32 module semantics.
    ref_f32 = jax.block_until_ready(
        down_ref(x, w1, g1, b1, w2, g2, b2, emulate_bf16=False))
    rel = float(jnp.linalg.norm(out - ref_f32) /
                (jnp.linalg.norm(ref_f32) + 1e-12))
    assert rel < 1e-1, rel

    print("KERNEL_OK")
</pallas_src>

<mosaic_0001>
module attributes {stable_mosaic.version = 11 : i64} {
  func.func @down_fused_kernel(%arg0: i32, %arg1: memref<2x16x16x128xf32, #tpu.memory_space<vmem>>, %arg2: memref<1152x128xbf16, #tpu.memory_space<vmem>>, %arg3: memref<1x128xf32, #tpu.memory_space<vmem>>, %arg4: memref<1x128xf32, #tpu.memory_space<vmem>>, %arg5: memref<1152x128xbf16, #tpu.memory_space<vmem>>, %arg6: memref<1x128xf32, #tpu.memory_space<vmem>>, %arg7: memref<1x128xf32, #tpu.memory_space<vmem>>, %arg8: memref<128x128xf32, #tpu.memory_space<vmem>>, %arg9: memref<2x10x10x128xf32, #tpu.memory_space<vmem>>) attributes {dimension_semantics = [#tpu.dimension_semantics<arbitrary>], iteration_bounds = array<i64: 1>, scalar_prefetch = 0 : i64, scratch_operands = 1 : i64, tpu.core_type = #tpu.core_type<tc>, window_params = [{pipeline_mode = #tpu.pipeline_mode<synchronous>, transform_indices = @transform_0, window_bounds = array<i64: 2, 16, 16, 128>}, {pipeline_mode = #tpu.pipeline_mode<synchronous>, transform_indices = @transform_1, window_bounds = array<i64: 1152, 128>}, {pipeline_mode = #tpu.pipeline_mode<synchronous>, transform_indices = @transform_2, window_bounds = array<i64: 1, 128>}, {pipeline_mode = #tpu.pipeline_mode<synchronous>, transform_indices = @transform_3, window_bounds = array<i64: 1, 128>}, {pipeline_mode = #tpu.pipeline_mode<synchronous>, transform_indices = @transform_4, window_bounds = array<i64: 1152, 128>}, {pipeline_mode = #tpu.pipeline_mode<synchronous>, transform_indices = @transform_5, window_bounds = array<i64: 1, 128>}, {pipeline_mode = #tpu.pipeline_mode<synchronous>, transform_indices = @transform_6, window_bounds = array<i64: 1, 128>}, {pipeline_mode = #tpu.pipeline_mode<synchronous>, transform_indices = @transform_7, window_bounds = array<i64: 128, 128>}]} {
    %c0 = arith.constant 0 : index
    %c0_0 = arith.constant 0 : index
    %c0_1 = arith.constant 0 : index
    %c0_2 = arith.constant 0 : index
    %0 = vector.load %arg1[%c0, %c0_0, %c0_1, %c0_2] : memref<2x16x16x128xf32, #tpu.memory_space<vmem>>, vector<2x16x16x128xf32>
    %1 = vector.shape_cast %0 : vector<2x16x16x128xf32> to vector<2x8x2x16x128xf32>
    %cst = arith.constant dense<0xFF800000> : vector<2x8x16x128xf32>
    %2 = vector.multi_reduction <maximumf>, %1, %cst [2] : vector<2x8x2x16x128xf32> to vector<2x8x16x128xf32>
    %3 = vector.shape_cast %2 : vector<2x8x16x128xf32> to vector<2x8x8x2x128xf32>
    %cst_3 = arith.constant dense<0xFF800000> : vector<2x8x8x128xf32>
    %4 = vector.multi_reduction <maximumf>, %3, %cst_3 [3] : vector<2x8x8x2x128xf32> to vector<2x8x8x128xf32>
    %cst_4 = arith.constant 0.000000e+00 : f32
    %5 = vector.broadcast %cst_4 : f32 to vector<2x10x10x128xf32>
    %c0_5 = arith.constant 0 : index
    %c0_6 = arith.constant 0 : index
    %c0_7 = arith.constant 0 : index
    %c0_8 = arith.constant 0 : index
    %6 = vector.load %arg9[%c0_5, %c0_6, %c0_7, %c0_8] : memref<2x10x10x128xf32, #tpu.memory_space<vmem>>, vector<2x10x10x128xf32>
    tpu.vector_store %arg9[%c0_5, %c0_6, %c0_7, %c0_8], %5 {strides = array<i32>} : memref<2x10x10x128xf32, #tpu.memory_space<vmem>>, vector<2x10x10x128xf32>,
    %c0_9 = arith.constant 0 : index
    %c1 = arith.constant 1 : index
    %c1_10 = arith.constant 1 : index
    %c0_11 = arith.constant 0 : index
    %7 = vector.load %arg9[%c0_9, %c1, %c1_10, %c0_11] : memref<2x10x10x128xf32, #tpu.memory_space<vmem>>, vector<2x8x8x128xf32>
    tpu.vector_store %arg9[%c0_9, %c1, %c1_10, %c0_11], %4 {strides = array<i32>} : memref<2x10x10x128xf32, #tpu.memory_space<vmem>>, vector<2x8x8x128xf32>,
    %c0_12 = arith.constant 0 : index
    %c0_13 = arith.constant 0 : index
    %c0_14 = arith.constant 0 : index
    %c0_15 = arith.constant 0 : index
    %8 = vector.load %arg9[%c0_12, %c0_13, %c0_14, %c0_15] : memref<2x10x10x128xf32, #tpu.memory_space<vmem>>, vector<2x10x10x128xf32>
    %9 = vector.extract_strided_slice %8 {offsets = [0, 0, 0, 0], sizes = [2, 8, 8, 128], strides = [1, 1, 1, 1]} : vector<2x10x10x128xf32> to vector<2x8x8x128xf32>
    %10 = vector.shape_cast %9 : vector<2x8x8x128xf32> to vector<128x128xf32>
    %11 = vector.extract_strided_slice %8 {offsets = [0, 0, 1, 0], sizes = [2, 8, 8, 128], strides = [1, 1, 1, 1]} : vector<2x10x10x128xf32> to vector<2x8x8x128xf32>
    %12 = vector.shape_cast %11 : vector<2x8x8x128xf32> to vector<128x128xf32>
    %13 = vector.extract_strided_slice %8 {offsets = [0, 0, 2, 0], sizes = [2, 8, 8, 128], strides = [1, 1, 1, 1]} : vector<2x10x10x128xf32> to vector<2x8x8x128xf32>
    %14 = vector.shape_cast %13 : vector<2x8x8x128xf32> to vector<128x128xf32>
    %15 = vector.extract_strided_slice %8 {offsets = [0, 1, 0, 0], sizes = [2, 8, 8, 128], strides = [1, 1, 1, 1]} : vector<2x10x10x128xf32> to vector<2x8x8x128xf32>
    %16 = vector.shape_cast %15 : vector<2x8x8x128xf32> to vector<128x128xf32>
    %17 = vector.extract_strided_slice %8 {offsets = [0, 1, 1, 0], sizes = [2, 8, 8, 128], strides = [1, 1, 1, 1]} : vector<2x10x10x128xf32> to vector<2x8x8x128xf32>
    %18 = vector.shape_cast %17 : vector<2x8x8x128xf32> to vector<128x128xf32>
    %19 = vector.extract_strided_slice %8 {offsets = [0, 1, 2, 0], sizes = [2, 8, 8, 128], strides = [1, 1, 1, 1]} : vector<2x10x10x128xf32> to vector<2x8x8x128xf32>
    %20 = vector.shape_cast %19 : vector<2x8x8x128xf32> to vector<128x128xf32>
    %21 = vector.extract_strided_slice %8 {offsets = [0, 2, 0, 0], sizes = [2, 8, 8, 128], strides = [1, 1, 1, 1]} : vector<2x10x10x128xf32> to vector<2x8x8x128xf32>
    %22 = vector.shape_cast %21 : vector<2x8x8x128xf32> to vector<128x128xf32>
    %23 = vector.extract_strided_slice %8 {offsets = [0, 2, 1, 0], sizes = [2, 8, 8, 128], strides = [1, 1, 1, 1]} : vector<2x10x10x128xf32> to vector<2x8x8x128xf32>
    %24 = vector.shape_cast %23 : vector<2x8x8x128xf32> to vector<128x128xf32>
    %25 = vector.extract_strided_slice %8 {offsets = [0, 2, 2, 0], sizes = [2, 8, 8, 128], strides = [1, 1, 1, 1]} : vector<2x10x10x128xf32> to vector<2x8x8x128xf32>
    %26 = vector.shape_cast %25 : vector<2x8x8x128xf32> to vector<128x128xf32>
    %27 = tpu.concatenate %10, %12, %14, %16, %18, %20, %22, %24, %26 in 1 : vector<128x128xf32>, vector<128x128xf32>, vector<128x128xf32>, vector<128x128xf32>, vector<128x128xf32>, vector<128x128xf32>, vector<128x128xf32>, vector<128x128xf32>, vector<128x128xf32> -> vector<128x1152xf32>
    %28 = arith.truncf %27 : vector<128x1152xf32> to vector<128x1152xbf16>
    %c0_16 = arith.constant 0 : index
    %c0_17 = arith.constant 0 : index
    %29 = vector.load %arg2[%c0_16, %c0_17] : memref<1152x128xbf16, #tpu.memory_space<vmem>>, vector<1152x128xbf16>
    %cst_18 = arith.constant dense<0.000000e+00> : vector<128x128xf32>
    %30 = tpu.matmul %28, %29, %cst_18 {dimension_numbers = #tpu.dot_dimension_numbers<[1], [0], [0], [1], [0, 0, 1, 1], [], []>} : vector<128x1152xbf16>, vector<1152x128xbf16>, vector<128x128xf32> -> vector<128x128xf32>
    %cst_19 = arith.constant dense<0.000000e+00> : vector<128xf32>
    %31 = vector.multi_reduction <add>, %30, %cst_19 [0] : vector<128x128xf32> to vector<128xf32>
    %32 = vector.shape_cast %31 : vector<128xf32> to vector<1x128xf32>
    %cst_20 = arith.constant 7.812500e-03 : f32
    %33 = vector.broadcast %cst_20 : f32 to vector<1x128xf32>
    %34 = arith.mulf %32, %33 : vector<1x128xf32>
    %35 = arith.mulf %30, %30 : vector<128x128xf32>
    %cst_21 = arith.constant dense<0.000000e+00> : vector<128xf32>
    %36 = vector.multi_reduction <add>, %35, %cst_21 [0] : vector<128x128xf32> to vector<128xf32>
    %37 = vector.shape_cast %36 : vector<128xf32> to vector<1x128xf32>
    %cst_22 = arith.constant 7.812500e-03 : f32
    %38 = vector.broadcast %cst_22 : f32 to vector<1x128xf32>
    %39 = arith.mulf %37, %38 : vector<1x128xf32>
    %40 = arith.mulf %34, %34 : vector<1x128xf32>
    %41 = arith.subf %39, %40 : vector<1x128xf32>
    %cst_23 = arith.constant 0.000000e+00 : f32
    %42 = vector.broadcast %cst_23 : f32 to vector<1x128xf32>
    %43 = arith.maximumf %41, %42 : vector<1x128xf32>
    %44 = vector.broadcast %34 : vector<1x128xf32> to vector<128x128xf32>
    %45 = arith.subf %30, %44 : vector<128x128xf32>
    %cst_24 = arith.constant 9.99999974E-6 : f32
    %46 = vector.broadcast %cst_24 : f32 to vector<1x128xf32>
    %47 = arith.addf %43, %46 : vector<1x128xf32>
    %48 = math.rsqrt %47 : vector<1x128xf32>
    %49 = vector.broadcast %48 : vector<1x128xf32> to vector<128x128xf32>
    %50 = arith.mulf %45, %49 : vector<128x128xf32>
    %c0_25 = arith.constant 0 : index
    %c0_26 = arith.constant 0 : index
    %51 = vector.load %arg3[%c0_25, %c0_26] : memref<1x128xf32, #tpu.memory_space<vmem>>, vector<1x128xf32>
    %52 = vector.broadcast %51 : vector<1x128xf32> to vector<128x128xf32>
    %53 = arith.mulf %50, %52 : vector<128x128xf32>
    %c0_27 = arith.constant 0 : index
    %c0_28 = arith.constant 0 : index
    %54 = vector.load %arg4[%c0_27, %c0_28] : memref<1x128xf32, #tpu.memory_space<vmem>>, vector<1x128xf32>
    %55 = vector.broadcast %54 : vector<1x128xf32> to vector<128x128xf32>
    %56 = arith.addf %53, %55 : vector<128x128xf32>
    %cst_29 = arith.constant 0.000000e+00 : f32
    %57 = vector.broadcast %cst_29 : f32 to vector<128x128xf32>
    %58 = arith.maximumf %56, %57 : vector<128x128xf32>
    %59 = vector.shape_cast %58 : vector<128x128xf32> to vector<2x8x8x128xf32>
    %c0_30 = arith.constant 0 : index
    %c1_31 = arith.constant 1 : index
    %c1_32 = arith.constant 1 : index
    %c0_33 = arith.constant 0 : index
    %60 = vector.load %arg9[%c0_30, %c1_31, %c1_32, %c0_33] : memref<2x10x10x128xf32, #tpu.memory_space<vmem>>, vector<2x8x8x128xf32>
    tpu.vector_store %arg9[%c0_30, %c1_31, %c1_32, %c0_33], %59 {strides = array<i32>} : memref<2x10x10x128xf32, #tpu.memory_space<vmem>>, vector<2x8x8x128xf32>,
    %c0_34 = arith.constant 0 : index
    %c0_35 = arith.constant 0 : index
    %c0_36 = arith.constant 0 : index
    %c0_37 = arith.constant 0 : index
    %61 = vector.load %arg9[%c0_34, %c0_35, %c0_36, %c0_37] : memref<2x10x10x128xf32, #tpu.memory_space<vmem>>, vector<2x10x10x128xf32>
    %62 = vector.extract_strided_slice %61 {offsets = [0, 0, 0, 0], sizes = [2, 8, 8, 128], strides = [1, 1, 1, 1]} : vector<2x10x10x128xf32> to vector<2x8x8x128xf32>
    %63 = vector.shape_cast %62 : vector<2x8x8x128xf32> to vector<128x128xf32>
    %64 = vector.extract_strided_slice %61 {offsets = [0, 0, 1, 0], sizes = [2, 8, 8, 128], strides = [1, 1, 1, 1]} : vector<2x10x10x128xf32> to vector<2x8x8x128xf32>
    %65 = vector.shape_cast %64 : vector<2x8x8x128xf32> to vector<128x128xf32>
    %66 = vector.extract_strided_slice %61 {offsets = [0, 0, 2, 0], sizes = [2, 8, 8, 128], strides = [1, 1, 1, 1]} : vector<2x10x10x128xf32> to vector<2x8x8x128xf32>
    %67 = vector.shape_cast %66 : vector<2x8x8x128xf32> to vector<128x128xf32>
    %68 = vector.extract_strided_slice %61 {offsets = [0, 1, 0, 0], sizes = [2, 8, 8, 128], strides = [1, 1, 1, 1]} : vector<2x10x10x128xf32> to vector<2x8x8x128xf32>
    %69 = vector.shape_cast %68 : vector<2x8x8x128xf32> to vector<128x128xf32>
    %70 = vector.extract_strided_slice %61 {offsets = [0, 1, 1, 0], sizes = [2, 8, 8, 128], strides = [1, 1, 1, 1]} : vector<2x10x10x128xf32> to vector<2x8x8x128xf32>
    %71 = vector.shape_cast %70 : vector<2x8x8x128xf32> to vector<128x128xf32>
    %72 = vector.extract_strided_slice %61 {offsets = [0, 1, 2, 0], sizes = [2, 8, 8, 128], strides = [1, 1, 1, 1]} : vector<2x10x10x128xf32> to vector<2x8x8x128xf32>
    %73 = vector.shape_cast %72 : vector<2x8x8x128xf32> to vector<128x128xf32>
    %74 = vector.extract_strided_slice %61 {offsets = [0, 2, 0, 0], sizes = [2, 8, 8, 128], strides = [1, 1, 1, 1]} : vector<2x10x10x128xf32> to vector<2x8x8x128xf32>
    %75 = vector.shape_cast %74 : vector<2x8x8x128xf32> to vector<128x128xf32>
    %76 = vector.extract_strided_slice %61 {offsets = [0, 2, 1, 0], sizes = [2, 8, 8, 128], strides = [1, 1, 1, 1]} : vector<2x10x10x128xf32> to vector<2x8x8x128xf32>
    %77 = vector.shape_cast %76 : vector<2x8x8x128xf32> to vector<128x128xf32>
    %78 = vector.extract_strided_slice %61 {offsets = [0, 2, 2, 0], sizes = [2, 8, 8, 128], strides = [1, 1, 1, 1]} : vector<2x10x10x128xf32> to vector<2x8x8x128xf32>
    %79 = vector.shape_cast %78 : vector<2x8x8x128xf32> to vector<128x128xf32>
    %80 = tpu.concatenate %63, %65, %67, %69, %71, %73, %75, %77, %79 in 1 : vector<128x128xf32>, vector<128x128xf32>, vector<128x128xf32>, vector<128x128xf32>, vector<128x128xf32>, vector<128x128xf32>, vector<128x128xf32>, vector<128x128xf32>, vector<128x128xf32> -> vector<128x1152xf32>
    %81 = arith.truncf %80 : vector<128x1152xf32> to vector<128x1152xbf16>
    %c0_38 = arith.constant 0 : index
    %c0_39 = arith.constant 0 : index
    %82 = vector.load %arg5[%c0_38, %c0_39] : memref<1152x128xbf16, #tpu.memory_space<vmem>>, vector<1152x128xbf16>
    %cst_40 = arith.constant dense<0.000000e+00> : vector<128x128xf32>
    %83 = tpu.matmul %81, %82, %cst_40 {dimension_numbers = #tpu.dot_dimension_numbers<[1], [0], [0], [1], [0, 0, 1, 1], [], []>} : vector<128x1152xbf16>, vector<1152x128xbf16>, vector<128x128xf32> -> vector<128x128xf32>
    %cst_41 = arith.constant dense<0.000000e+00> : vector<128xf32>
    %84 = vector.multi_reduction <add>, %83, %cst_41 [0] : vector<128x128xf32> to vector<128xf32>
    %85 = vector.shape_cast %84 : vector<128xf32> to vector<1x128xf32>
    %cst_42 = arith.constant 7.812500e-03 : f32
    %86 = vector.broadcast %cst_42 : f32 to vector<1x128xf32>
    %87 = arith.mulf %85, %86 : vector<1x128xf32>
    %88 = arith.mulf %83, %83 : vector<128x128xf32>
    %cst_43 = arith.constant dense<0.000000e+00> : vector<128xf32>
    %89 = vector.multi_reduction <add>, %88, %cst_43 [0] : vector<128x128xf32> to vector<128xf32>
    %90 = vector.shape_cast %89 : vector<128xf32> to vector<1x128xf32>
    %cst_44 = arith.constant 7.812500e-03 : f32
    %91 = vector.broadcast %cst_44 : f32 to vector<1x128xf32>
    %92 = arith.mulf %90, %91 : vector<1x128xf32>
    %93 = arith.mulf %87, %87 : vector<1x128xf32>
    %94 = arith.subf %92, %93 : vector<1x128xf32>
    %cst_45 = arith.constant 0.000000e+00 : f32
    %95 = vector.broadcast %cst_45 : f32 to vector<1x128xf32>
    %96 = arith.maximumf %94, %95 : vector<1x128xf32>
    %97 = vector.broadcast %87 : vector<1x128xf32> to vector<128x128xf32>
    %98 = arith.subf %83, %97 : vector<128x128xf32>
    %cst_46 = arith.constant 9.99999974E-6 : f32
    %99 = vector.broadcast %cst_46 : f32 to vector<1x128xf32>
    %100 = arith.addf %96, %99 : vector<1x128xf32>
    %101 = math.rsqrt %100 : vector<1x128xf32>
    %102 = vector.broadcast %101 : vector<1x128xf32> to vector<128x128xf32>
    %103 = arith.mulf %98, %102 : vector<128x128xf32>
    %c0_47 = arith.constant 0 : index
    %c0_48 = arith.constant 0 : index
    %104 = vector.load %arg6[%c0_47, %c0_48] : memref<1x128xf32, #tpu.memory_space<vmem>>, vector<1x128xf32>
    %105 = vector.broadcast %104 : vector<1x128xf32> to vector<128x128xf32>
    %106 = arith.mulf %103, %105 : vector<128x128xf32>
    %c0_49 = arith.constant 0 : index
    %c0_50 = arith.constant 0 : index
    %107 = vector.load %arg7[%c0_49, %c0_50] : memref<1x128xf32, #tpu.memory_space<vmem>>, vector<1x128xf32>
    %108 = vector.broadcast %107 : vector<1x128xf32> to vector<128x128xf32>
    %109 = arith.addf %106, %108 : vector<128x128xf32>
    %cst_51 = arith.constant 0.000000e+00 : f32
    %110 = vector.broadcast %cst_51 : f32 to vector<128x128xf32>
    %111 = arith.maximumf %109, %110 : vector<128x128xf32>
    %c0_52 = arith.constant 0 : index
    %c0_53 = arith.constant 0 : index
    %112 = vector.load %arg8[%c0_52, %c0_53] : memref<128x128xf32, #tpu.memory_space<vmem>>, vector<128x128xf32>
    tpu.vector_store %arg8[%c0_52, %c0_53], %111 {strides = array<i32>} : memref<128x128xf32, #tpu.memory_space<vmem>>, vector<128x128xf32>,
    return
  }
  func.func @transform_0(%arg0: i32) -> (i32, i32, i32, i32) {
    %c0_i32 = arith.constant 0 : i32
    %c0_i32_0 = arith.constant 0 : i32
    %c0_i32_1 = arith.constant 0 : i32
    %c0_i32_2 = arith.constant 0 : i32
    %c0_i32_3 = arith.constant 0 : i32
    return %c0_i32, %c0_i32_0, %c0_i32_1, %c0_i32_2 : i32, i32, i32, i32
  }
  func.func @transform_1(%arg0: i32) -> (i32, i32) {
    %c0_i32 = arith.constant 0 : i32
    %c0_i32_0 = arith.constant 0 : i32
    %c0_i32_1 = arith.constant 0 : i32
    return %c0_i32, %c0_i32_0 : i32, i32
  }
  func.func @transform_2(%arg0: i32) -> (i32, i32) {
    %c0_i32 = arith.constant 0 : i32
    %c0_i32_0 = arith.constant 0 : i32
    %c0_i32_1 = arith.constant 0 : i32
    return %c0_i32, %c0_i32_0 : i32, i32
  }
  func.func @transform_3(%arg0: i32) -> (i32, i32) {
    %c0_i32 = arith.constant 0 : i32
    %c0_i32_0 = arith.constant 0 : i32
    %c0_i32_1 = arith.constant 0 : i32
    return %c0_i32, %c0_i32_0 : i32, i32
  }
  func.func @transform_4(%arg0: i32) -> (i32, i32) {
    %c0_i32 = arith.constant 0 : i32
    %c0_i32_0 = arith.constant 0 : i32
    %c0_i32_1 = arith.constant 0 : i32
    return %c0_i32, %c0_i32_0 : i32, i32
  }
  func.func @transform_5(%arg0: i32) -> (i32, i32) {
    %c0_i32 = arith.constant 0 : i32
    %c0_i32_0 = arith.constant 0 : i32
    %c0_i32_1 = arith.constant 0 : i32
    return %c0_i32, %c0_i32_0 : i32, i32
  }
  func.func @transform_6(%arg0: i32) -> (i32, i32) {
    %c0_i32 = arith.constant 0 : i32
    %c0_i32_0 = arith.constant 0 : i32
    %c0_i32_1 = arith.constant 0 : i32
    return %c0_i32, %c0_i32_0 : i32, i32
  }
  func.func @transform_7(%arg0: i32) -> (i32, i32) {
    %c0_i32 = arith.constant 0 : i32
    %c0_i32_0 = arith.constant 0 : i32
    %c0_i32_1 = arith.constant 0 : i32
    return %c0_i32, %c0_i32_0 : i32, i32
  }
}

</mosaic_0001>

<bundles_post_ra>
// kernel: down_forward.1
= control target key start
LH: loop header
LB: loop body
LE: loop exit
PB: predicated region body
PF: predicated region fallthrough
CT: control target
= control target key end

     0   :  { %v6021_v1 = vmov 0.0   ;;  %v6022_v25 = vmov 1983009808   ;;  %v159_v27 = vlaneseq  ;;  %vm827_vm0 = vcmask 1041408   ;;  %s8682_s1 = inlined_call_operand.vmem [shape: bf16[1152,128], index: 1, kind: input, shape index: {}]   ;;  %s8683_s0 = inlined_call_operand.vmem [shape: f32[2,16,16,128], index: 0, kind: input, shape index: {}]   ;;  %s8684_s4 = inlined_call_operand.vmem [shape: bf16[1152,128], index: 4, kind: input, shape index: {}]   ;;  %s8685_s2 = inlined_call_operand.vmem [shape: f32[1,128], index: 2, kind: input, shape index: {}]   ;;  %s8686_s3 = inlined_call_operand.vmem [shape: f32[1,128], index: 3, kind: input, shape index: {}]   ;;  %s8687_s5 = inlined_call_operand.vmem [shape: f32[1,128], index: 5, kind: input, shape index: {}]   ;;  %s8688_s6 = inlined_call_operand.vmem [shape: f32[1,128], index: 6, kind: input, shape index: {}]   ;;  %s8689_s7 = inlined_call_operand.vmem [shape: f32[128,128], index: 7, kind: output, shape index: {}]  }
   0x1   :  { %v5868_v0 = vld [vmem:[%s8682_s1 + $0x78] sm:$0xff]   ;;  %1724 = vst [vmem:[#allocation2] sm:$0xff] %v6021_v1  ;;  %1725 = vst [vmem:[#allocation2 + $0x8] sm:$0x3] %v6021_v1  ;;  %v5872_v5 = vld [vmem:[%s8682_s1 + $0x70] sm:$0xff]   ;;  %v157_v26 = vunpack.c.l.s4 %v6022_v25  ;;  %v6225_v50 = vrot.slane %v6021_v1, 1 }
   0x2   :  { %1726 = vst [vmem:[#allocation2 + $0x10] sm:$0xff] %v6021_v1  ;;  %1727 = vst [vmem:[#allocation2 + $0x18] sm:$0x3] %v6021_v1  ;;  %v5869_v2 = vld [vmem:[%s8682_s1 + $0x38] sm:$0xff]   ;;  %5258 = vmatprep.subr.bf16.mxu0 %v5868_v0  ;;  %v5873_v6 = vld [vmem:[%s8682_s1 + $0x30] sm:$0xff]   ;;  %v160_v33 = vshrl.u32 %v159_v27, 7 }
   0x3   :  { %1728 = vst [vmem:[#allocation2 + $0x20] sm:$0xff] %v6021_v1  ;;  %1729 = vst [vmem:[#allocation2 + $0x28] sm:$0x3] %v6021_v1  ;;  %v5870_v3 = vld [vmem:[%s8682_s1 + $0xf8] sm:$0xff]   ;;  %5259 = vmatpush3.bf16.msra.mxu0 %v5869_v2  ;;  %v5874_v7 = vld [vmem:[%s8682_s1 + $0xf0] sm:$0xff]   ;;  %v158_v32 = vunpack.c.0.s8 %v157_v26  ;;  %v6228_v51 = vrot.slane %v6021_v1, 2 }
   0x4   :  { %1730 = vst [vmem:[#allocation2 + $0x30] sm:$0xff] %v6021_v1  ;;  %1731 = vst [vmem:[#allocation2 + $0x38] sm:$0x3] %v6021_v1  ;;  %v5871_v4 = vld [vmem:[%s8682_s1 + $0xb8] sm:$0xff]   ;;  %5322 = vmatprep.subr.bf16.mxu1 %v5870_v3  ;;  %5260 = vmatprep.subr.bf16.mxu0 %v5872_v5  ;;  %v5875_v8 = vld [vmem:[%s8682_s1 + $0xb0] sm:$0xff]   ;;  %vm1892_vm1 = vcmask 1041409  }
   0x5   :  { %1732 = vst [vmem:[#allocation2 + $0x40] sm:$0xff] %v6021_v1  ;;  %1733 = vst [vmem:[#allocation2 + $0x48] sm:$0x3] %v6021_v1  ;;  %5323 = vmatpush3.bf16.msra.mxu1 %v5871_v4  ;;  %v5876_v9 = vld [vmem:[%s8682_s1 + $0x68] sm:$0xff]   ;;  %v5880_v13 = vld [vmem:[%s8682_s1 + $0x60] sm:$0xff]   ;;  %v6196_v38 = vsub.s32 %v158_v32, %v160_v33  ;;  %vm1894_vm2 = vcmask 1042434  }
   0x6   :  { %1734 = vst [vmem:[#allocation2 + $0x50] sm:$0xff] %v6021_v1  ;;  %1735 = vst [vmem:[#allocation2 + $0x58] sm:$0x3] %v6021_v1  ;;  %5324 = vmatprep.subr.bf16.mxu1 %v5874_v7  ;;  %v5877_v10 = vld [vmem:[%s8682_s1 + $0x28] sm:$0xff]   ;;  %v5881_v14 = vld [vmem:[%s8682_s1 + $0x20] sm:$0xff]   ;;  %vm1896_vm3 = vcmask 1043459  }
   0x7   :  { %1736 = vst [vmem:[#allocation2 + $0x60] sm:$0xff] %v6021_v1  ;;  %1737 = vst [vmem:[#allocation2 + $0x68] sm:$0x3] %v6021_v1  ;;  %5261 = vmatpush3.bf16.msra.mxu0 %v5873_v6  ;;  %v5878_v11 = vld [vmem:[%s8682_s1 + $0xe8] sm:$0xff]   ;;  %v5882_v15 = vld [vmem:[%s8682_s1 + $0xe0] sm:$0xff]   ;;  %vm1898_vm4 = vcmask 1044484  }
   0x8   :  { %1738 = vst [vmem:[#allocation2 + $0x70] sm:$0xff] %v6021_v1  ;;  %1739 = vst [vmem:[#allocation2 + $0x78] sm:$0x3] %v6021_v1  ;;  %5262 = vmatprep.subr.bf16.mxu0 %v5876_v9  ;;  %v5879_v12 = vld [vmem:[%s8682_s1 + $0xa8] sm:$0xff]   ;;  %v5883_v16 = vld [vmem:[%s8682_s1 + $0xa0] sm:$0xff]   ;;  %vm2116_vm5 = vcmask 1046528  }
   0x9   :  { %1740 = vst [vmem:[#allocation2 + $0x80] sm:$0xff] %v6021_v1  ;;  %1741 = vst [vmem:[#allocation2 + $0x88] sm:$0x3] %v6021_v1  ;;  %5325 = vmatpush3.bf16.msra.mxu1 %v5875_v8  ;;  %v5884_v17 = vld [vmem:[%s8682_s1 + $0x58] sm:$0xff]   ;;  %v5888_v21 = vld [vmem:[%s8682_s1 + $0x50] sm:$0xff]   ;;  %vm1900_vm6 = vcmask 1045509  }
   0xa   :  { %1743 = vst [vmem:[#allocation2 + $0x98] sm:$0x3] %v6021_v1  ;;  %1745 = vst [vmem:[#allocation2 + $0xa8] sm:$0x3] %v6021_v1  ;;  %5326 = vmatprep.subr.bf16.mxu1 %v5878_v11  ;;  %v5885_v18 = vld [vmem:[%s8682_s1 + $0x18] sm:$0xff]   ;;  %v5889_v22 = vld [vmem:[%s8682_s1 + $0x10] sm:$0xff]  }
   0xb   :  { %1746 = vst [vmem:[#allocation2 + $0xb0] sm:$0xff] %v6021_v1  ;;  %1747 = vst [vmem:[#allocation2 + $0xb8] sm:$0x3] %v6021_v1  ;;  %5263 = vmatpush3.bf16.msra.mxu0 %v5877_v10  ;;  %v5886_v19 = vld [vmem:[%s8682_s1 + $0xd8] sm:$0xff]   ;;  %v5890_v23 = vld [vmem:[%s8682_s1 + $0xd0] sm:$0xff]   ;;  %vm1902_vm7 = vcmask 1046534  }
   0xc   :  { %1748 = vst [vmem:[#allocation2 + $0xc0] sm:$0xff] %v6021_v1  ;;  %1749 = vst [vmem:[#allocation2 + $0xc8] sm:$0x3] %v6021_v1  ;;  %5264 = vmatprep.subr.bf16.mxu0 %v5880_v13  ;;  %v5887_v20 = vld [vmem:[%s8682_s1 + $0x98] sm:$0xff]   ;;  %v5891_v24 = vld [vmem:[%s8682_s1 + $0x90] sm:$0xff]   ;;  %vm2181_vm8 = vcmask 1045504  }
   0xd   :  { %1750 = vst [vmem:[#allocation2 + $0xd0] sm:$0xff] %v6021_v1  ;;  %1751 = vst [vmem:[#allocation2 + $0xd8] sm:$0x3] %v6021_v1  ;;  %5327 = vmatpush3.bf16.msra.mxu1 %v5879_v12  ;;  %v5892_v28 = vld [vmem:[%s8682_s1 + $0x48] sm:$0xff]   ;;  %v5896_v34 = vld [vmem:[%s8682_s1 + $0x40] sm:$0xff]   ;;  %vm1904_vm9 = vcmask 1047559  }
   0xe   :  { %1752 = vst [vmem:[#allocation2 + $0xe0] sm:$0xff] %v6021_v1  ;;  %1753 = vst [vmem:[#allocation2 + $0xe8] sm:$0x3] %v6021_v1  ;;  %5328 = vmatprep.subr.bf16.mxu1 %v5882_v15  ;;  %v5893_v29 = vld [vmem:[%s8682_s1 + $0x8] sm:$0xff]   ;;  %v5897_v35 = vld [vmem:[%s8682_s1] sm:$0xff]  }
   0xf   :  { %1754 = vst [vmem:[#allocation2 + $0xf0] sm:$0xff] %v6021_v1  ;;  %1755 = vst [vmem:[#allocation2 + $0xf8] sm:$0x3] %v6021_v1  ;;  %5265 = vmatpush3.bf16.msra.mxu0 %v5881_v14  ;;  %v5894_v30 = vld [vmem:[%s8682_s1 + $0xc8] sm:$0xff]   ;;  %v5898_v36 = vld [vmem:[%s8682_s1 + $0xc0] sm:$0xff]  }
  0x10   :  { %1756 = vst [vmem:[#allocation2 + $0x100] sm:$0xff] %v6021_v1  ;;  %1757 = vst [vmem:[#allocation2 + $0x108] sm:$0x3] %v6021_v1  ;;  %5266 = vmatprep.subr.bf16.mxu0 %v5884_v17  ;;  %v5895_v31 = vld [vmem:[%s8682_s1 + $0x88] sm:$0xff]   ;;  %v5899_v37 = vld [vmem:[%s8682_s1 + $0x80] sm:$0xff]  }
  0x11   :  { %1758 = vst [vmem:[#allocation2 + $0x110] sm:$0xff] %v6021_v1  ;;  %1759 = vst [vmem:[#allocation2 + $0x118] sm:$0x3] %v6021_v1  ;;  %5329 = vmatpush3.bf16.msra.mxu1 %v5883_v16  ;;  %v27_v39 = vld [vmem:[%s8683_s0] sm:$0xff]  ;;  %v28_v40 = vld [vmem:[%s8683_s0 + $0x8] sm:$0xff] }
  0x12   :  { %1760 = vst [vmem:[#allocation2 + $0x120] sm:$0xff] %v6021_v1  ;;  %1761 = vst [vmem:[#allocation2 + $0x128] sm:$0x3] %v6021_v1  ;;  %5330 = vmatprep.subr.bf16.mxu1 %v5886_v19  ;;  %v29_v41 = vld [vmem:[%s8683_s0 + $0x10] sm:$0xff]  ;;  %v30_v42 = vld [vmem:[%s8683_s0 + $0x18] sm:$0xff] }
  0x13   :  { %1763 = vst [vmem:[#allocation2 + $0x138] sm:$0x3] %v6021_v1  ;;  %5267 = vmatpush3.bf16.msra.mxu0 %v5885_v18  ;;  %v31_v43 = vld [vmem:[%s8683_s0 + $0x20] sm:$0xff]  ;;  %v32_v44 = vld [vmem:[%s8683_s0 + $0x28] sm:$0xff]  ;;  %v91_v45 = vmax.f32 %v27_v39, %v29_v41  ;;  %v33_v46 = vld [vmem:[%s8683_s0 + $0x30] sm:$0xff]  ;;  %v92_v48 = vmax.f32 %v28_v40, %v30_v42 }
  0x14   :  { %5268 = vmatprep.subr.bf16.mxu0 %v5888_v21  ;;  %v34_v47 = vld [vmem:[%s8683_s0 + $0x38] sm:$0xff]  ;;  %v6222_v49 = vld [vmem:[#allocation2 + $0x8] sm:$0x3]  ;;  %v93_v52 = vmax.f32 %v31_v43, %v33_v46 }
  0x15   :  { %5331 = vmatpush3.bf16.msra.mxu1 %v5887_v20  ;;  %v94_v53 = vmax.f32 %v32_v44, %v34_v47  ;;  %v155_v54 = vcombine.high %v91_v45, %v91_v45  ;;  %v162_v55 = vrot.slane %v91_v45, %v6196_v38  ;;  %v5900_v56 = vld [vmem:[%s8682_s1 + $0x178] sm:$0xff]   ;;  %v172_v57 = vcombine.high %v92_v48, %v92_v48 }
  0x16   :  { %5332 = vmatprep.subr.bf16.mxu1 %v5890_v23  ;;  %v179_v58 = vrot.slane %v92_v48, %v6196_v38  ;;  %v2118_v59 = vrot.slane %v6222_v49, 1  ;;  %v2183_v60 = vrot.slane %v6222_v49, 2  ;;  %v189_v63 = vcombine.high %v93_v52, %v93_v52 }
  0x17   :  { %5269 = vmatpush3.bf16.msra.mxu0 %v5889_v22  ;;  %v169_v61 = vrot.slane %v155_v54, %v6196_v38  ;;  %v170_v62 = vcombine.high %v162_v55, %v162_v55  ;;  %v6239_v0 = vrot.slane %v93_v52, %v6196_v38  ;;  %v186_v2 = vrot.slane %v172_v57, %v6196_v38 }
  0x18   :  { %5270 = vmatprep.subr.bf16.mxu0 %v5892_v28  ;;  %v187_v3 = vcombine.high %v179_v58, %v179_v58  ;;  %v206_v4 = vcombine.high %v94_v53, %v94_v53  ;;  %v6243_v5 = vrot.slane %v94_v53, %v6196_v38  ;;  %v6246_v7 = vrot.slane %v189_v63, %v6196_v38 }
  0x19   :  { %5333 = vmatpush3.bf16.msra.mxu1 %v5891_v24  ;;  %v171_v6 = vcombine.high %v169_v61, %v169_v61  ;;  %v204_v8 = vcombine.high %v6239_v0, %v6239_v0  ;;  %v828_v9 = vsel %vm827_vm0, %v162_v55, -inf  ;;  %v188_v10 = vcombine.high %v186_v2, %v186_v2 }
  0x1a   :  { %5334 = vmatprep.subr.bf16.mxu1 %v5894_v30  ;;  %v6252_v11 = vrot.slane %v206_v4, %v6196_v38  ;;  %v221_v12 = vcombine.high %v6243_v5, %v6243_v5  ;;  %v829_v13 = vrot.slane %v828_v9, 4  ;;  %v205_v14 = vcombine.high %v6246_v7, %v6246_v7 }
  0x1b   :  { %5271 = vmatpush3.bf16.msra.mxu0 %v5893_v29  ;;  %v835_v15 = vsel %vm827_vm0, %v170_v62, -inf  ;;  %v842_v16 = vsel %vm827_vm0, %v169_v61, -inf  ;;  %v849_v17 = vsel %vm827_vm0, %v171_v6, -inf  ;;  %v856_v23 = vsel %vm827_vm0, %v179_v58, -inf }
  0x1c   :  { %5272 = vmatprep.subr.bf16.mxu0 %v5896_v34  ;;  %v222_v18 = vcombine.high %v6252_v11, %v6252_v11  ;;  %v830_v19 = vmax.f32 %v828_v9, %v829_v13  ;;  %v836_v20 = vrot.slane %v835_v15, 4  ;;  %v843_v21 = vrot.slane %v842_v16, 4 }
  0x1d   :  { %5335 = vmatpush3.bf16.msra.mxu1 %v5895_v31  ;;  %v850_v22 = vrot.slane %v849_v17, 4  ;;  %v863_v24 = vsel %vm827_vm0, %v187_v3, -inf  ;;  %v870_v25 = vsel %vm827_vm0, %v186_v2, -inf  ;;  %v857_v29 = vrot.slane %v856_v23, 4 }
  0x1e   :  { %5336 = vmatprep.subr.bf16.mxu1 %v5898_v36  ;;  %v831_v26 = vrot.slane %v830_v19, 2  ;;  %v837_v27 = vmax.f32 %v835_v15, %v836_v20  ;;  %v844_v28 = vmax.f32 %v842_v16, %v843_v21  ;;  %v864_v31 = vrot.slane %v863_v24, 4 }
  0x1f   :  { %5273 = vmatpush3.bf16.msra.mxu0 %v5897_v35  ;;  %v851_v30 = vmax.f32 %v849_v17, %v850_v22  ;;  %v871_v32 = vrot.slane %v870_v25, 4  ;;  %v877_v33 = vsel %vm827_vm0, %v188_v10, -inf  ;;  %v884_v6 = vsel %vm827_vm0, %v6239_v0, -inf }
  0x20   :  { %5386 = vmatprep.subr.bf16.mxu0 %v5900_v56  ;;  %v832_v34 = vmax.f32 %v830_v19, %v831_v26  ;;  %v838_v35 = vrot.slane %v837_v27, 2  ;;  %v845_v36 = vrot.slane %v844_v28, 2  ;;  %v865_v40 = vmax.f32 %v863_v24, %v864_v31 }
  0x21   :  { %5337 = vmatpush3.bf16.msra.mxu1 %v5899_v37  ;;  %v858_v37 = vmax.f32 %v856_v23, %v857_v29  ;;  %v852_v39 = vrot.slane %v851_v30, 2  ;;  %v872_v41 = vmax.f32 %v870_v25, %v871_v32  ;;  %v878_v42 = vrot.slane %v877_v33, 4 }
  0x22   :  { %v833_v43 = vrot.slane %v832_v34, 1  ;;  %v839_v44 = vmax.f32 %v837_v27, %v838_v35  ;;  %v846_v45 = vmax.f32 %v844_v28, %v845_v36  ;;  %v866_v48 = vrot.slane %v865_v40, 2 }
  0x23   :  { %v859_v46 = vrot.slane %v858_v37, 2  ;;  %v853_v47 = vmax.f32 %v851_v30, %v852_v39  ;;  %v873_v52 = vrot.slane %v872_v41, 2  ;;  %v879_v53 = vmax.f32 %v877_v33, %v878_v42 }
  0x24   :  { %v6267_v54 = vmax.f32 %v832_v34, %v833_v43  ;;  %v840_v55 = vrot.slane %v839_v44, 1  ;;  %v847_v56 = vrot.slane %v846_v45, 1  ;;  %v867_v61 = vmax.f32 %v865_v40, %v866_v48 }
  0x25   :  { %v860_v57 = vmax.f32 %v858_v37, %v859_v46  ;;  %v854_v58 = vrot.slane %v853_v47, 1  ;;  %v874_v62 = vmax.f32 %v872_v41, %v873_v52  ;;  %v880_v63 = vrot.slane %v879_v53, 2 }
  0x26   :  { %v6269_v2 = vmax.f32 %v839_v44, %v840_v55  ;;  %v6271_v3 = vmax.f32 %v846_v45, %v847_v56  ;;  %v868_v10 = vrot.slane %v867_v61, 1  ;;  %v885_v17 = vrot.slane %v884_v6, 4 }
  0x27   :  { %v861_v4 = vrot.slane %v860_v57, 1  ;;  %v6275_v9 = vmax.f32 %v853_v47, %v854_v58  ;;  %v875_v13 = vrot.slane %v874_v62, 1  ;;  %v881_v15 = vmax.f32 %v879_v53, %v880_v63 }
  0x28   :  { %v891_v19 = vsel %vm827_vm0, %v204_v8, -inf  ;;  %v898_v20 = vsel %vm827_vm0, %v6246_v7, -inf  ;;  %v6282_v21 = vmax.f32 %v867_v61, %v868_v10  ;;  %v886_v0 = vmax.f32 %v884_v6, %v885_v17  ;;  %v37_v17 = vld [vmem:[%s8683_s0 + $0x50] sm:$0xff] }
  0x29   :  { %v6277_v16 = vmax.f32 %v860_v57, %v861_v4  ;;  %v6284_v22 = vmax.f32 %v874_v62, %v875_v13  ;;  %v882_v23 = vrot.slane %v881_v15, 1  ;;  %v892_v24 = vrot.slane %v891_v19, 4 }
  0x2a   :  { %v899_v25 = vrot.slane %v898_v20, 4  ;;  %v905_v26 = vsel %vm827_vm0, %v205_v14, -inf  ;;  %v912_v8 = vsel %vm827_vm0, %v6243_v5, -inf  ;;  %v887_v31 = vrot.slane %v886_v0, 2 }
  0x2b   :  { %v6292_v27 = vmax.f32 %v881_v15, %v882_v23  ;;  %v893_v28 = vmax.f32 %v891_v19, %v892_v24  ;;  %v906_v29 = vrot.slane %v905_v26, 4  ;;  %v913_v30 = vrot.slane %v912_v8, 4  ;;  %v35_v15 = vld [vmem:[%s8683_s0 + $0x40] sm:$0xff] }
  0x2c   :  { %v900_v32 = vmax.f32 %v898_v20, %v899_v25  ;;  %v919_v33 = vsel %vm827_vm0, %v221_v12, -inf  ;;  %v926_v7 = vsel %vm827_vm0, %v6252_v11, -inf  ;;  %v888_v37 = vmax.f32 %v886_v0, %v887_v31  ;;  %v36_v0 = vld [vmem:[%s8683_s0 + $0x48] sm:$0xff] }
  0x2d   :  { %v894_v14 = vrot.slane %v893_v28, 2  ;;  %v907_v34 = vmax.f32 %v905_v26, %v906_v29  ;;  %v914_v35 = vmax.f32 %v912_v8, %v913_v30  ;;  %v920_v36 = vrot.slane %v919_v33, 4 }
  0x2e   :  { %v901_v39 = vrot.slane %v900_v32, 2  ;;  %v927_v40 = vrot.slane %v926_v7, 4  ;;  %v933_v5 = vsel %vm827_vm0, %v222_v18, -inf  ;;  %v889_v44 = vrot.slane %v888_v37, 1 }
  0x2f   :  { %v895_v12 = vmax.f32 %v893_v28, %v894_v14  ;;  %v908_v41 = vrot.slane %v907_v34, 2  ;;  %v915_v42 = vrot.slane %v914_v35, 2  ;;  %v921_v43 = vmax.f32 %v919_v33, %v920_v36  ;;  %v39_v28 = vld [vmem:[%s8683_s0 + $0x60] sm:$0xff] }
  0x30   :  { %v902_v45 = vmax.f32 %v900_v32, %v901_v39  ;;  %v928_v46 = vmax.f32 %v926_v7, %v927_v40  ;;  %v934_v47 = vrot.slane %v933_v5, 4  ;;  %v890_v56 = vmax.f32 %v888_v37, %v889_v44  ;;  %v40_v32 = vld [vmem:[%s8683_s0 + $0x68] sm:$0xff] }
  0x31   :  { %v896_v48 = vrot.slane %v895_v12, 1  ;;  %v909_v52 = vmax.f32 %v907_v34, %v908_v41  ;;  %v916_v53 = vmax.f32 %v914_v35, %v915_v42  ;;  %v922_v55 = vrot.slane %v921_v43, 2 }
  0x32   :  { %v903_v57 = vrot.slane %v902_v45, 1  ;;  %v929_v11 = vrot.slane %v928_v46, 2  ;;  %v935_v58 = vmax.f32 %v933_v5, %v934_v47  ;;  %v1893_v13 = vsel %vm1892_vm1, %v6269_v2, %v6267_v54  ;;  %v38_v54 = vld [vmem:[%s8683_s0 + $0x58] sm:$0xff] }
  0x33   :  { %v897_v18 = vmax.f32 %v895_v12, %v896_v48  ;;  %v910_v61 = vrot.slane %v909_v52, 1  ;;  %v917_v62 = vrot.slane %v916_v53, 1  ;;  %v923_v63 = vmax.f32 %v921_v43, %v922_v55 }
  0x34   :  { %v904_v4 = vmax.f32 %v902_v45, %v903_v57  ;;  %v930_v6 = vmax.f32 %v928_v46, %v929_v11  ;;  %v936_v10 = vrot.slane %v935_v58, 2  ;;  %v1895_v24 = vsel %vm1894_vm2, %v6271_v3, %v1893_v13  ;;  %v41_v3 = vld [vmem:[%s8683_s0 + $0x70] sm:$0xff] }
  0x35   :  { %v911_v19 = vmax.f32 %v909_v52, %v910_v61  ;;  %v918_v20 = vmax.f32 %v916_v53, %v917_v62  ;;  %v924_v23 = vrot.slane %v923_v63, 1  ;;  %v1897_v26 = vsel %vm1896_vm3, %v6275_v9, %v1895_v24 }
  0x36   :  { %v931_v2 = vrot.slane %v930_v6, 1  ;;  %v937_v25 = vmax.f32 %v935_v58, %v936_v10  ;;  %v1906_v8 = vsel %vm1892_vm1, %v897_v18, %v890_v56  ;;  %v1899_v30 = vsel %vm1898_vm4, %v6277_v16, %v1897_v26  ;;  %v42_v16 = vld [vmem:[%s8683_s0 + $0x78] sm:$0xff] }
  0x37   :  { %v925_v29 = vmax.f32 %v923_v63, %v924_v23  ;;  %v1907_v31 = vsel %vm1894_vm2, %v904_v4, %v1906_v8  ;;  %v6337_v9 = vsel %vm2116_vm5, %v6225_v50, %v2118_v59  ;;  %v1901_v14 = vsel %vm1900_vm6, %v6282_v21, %v1899_v30 }
  0x38   :  { %v932_v33 = vmax.f32 %v930_v6, %v931_v2  ;;  %v938_v7 = vrot.slane %v937_v25, 1  ;;  %v1908_v34 = vsel %vm1896_vm3, %v911_v19, %v1907_v31  ;;  %v1903_v35 = vsel %vm1902_vm7, %v6284_v22, %v1901_v14 }
  0x39   :  { %v1909_v50 = vsel %vm1898_vm4, %v918_v20, %v1908_v34  ;;  %v6355_v59 = vsel %vm2181_vm8, %v6228_v51, %v2183_v60  ;;  %v95_v36 = vmax.f32 %v35_v15, %v37_v17  ;;  %v1905_v21 = vsel %vm1904_vm9, %v6292_v27, %v1903_v35 }
  0x3a   :  { %v939_v37 = vmax.f32 %v937_v25, %v938_v7  ;;  %v1910_v39 = vsel %vm1900_vm6, %v925_v29, %v1909_v50  ;;  %v96_v40 = vmax.f32 %v36_v0, %v38_v54  ;;  %2028 = vst [vmem:[#allocation2 + $0x11] sm:$0xff] %v1905_v21  ;;  %v6362_v41 = vmax.f32 %v39_v28, %v41_v3  ;;  %v5901_v7 = vld [vmem:[%s8682_s1 + $0x138] sm:$0xff]  }
  0x3b   :  { %v1911_v5 = vsel %vm1902_vm7, %v932_v33, %v1910_v39  ;;  %v223_v22 = vcombine.high %v95_v36, %v95_v36  ;;  %v230_v12 = vrot.slane %v95_v36, %v6196_v38  ;;  %v6366_v42 = vmax.f32 %v40_v32, %v42_v16 }
  0x3c   :  { %v1912_v49 = vsel %vm1904_vm9, %v939_v37, %v1911_v5  ;;  %v240_v51 = vcombine.high %v96_v40, %v96_v40  ;;  %v247_v60 = vrot.slane %v96_v40, %v6196_v38  ;;  %v257_v45 = vcombine.high %v6362_v41, %v6362_v41  ;;  %v5903_v5 = vld [vmem:[%s8682_s1 + $0x130] sm:$0xff]  }
  0x3d   :  { %2029 = vst [vmem:[#allocation2 + $0x21] sm:$0xff] %v1912_v49  ;;  %v237_v27 = vrot.slane %v223_v22, %v6196_v38  ;;  %v238_v43 = vcombine.high %v230_v12, %v230_v12  ;;  %v940_v44 = vsel %vm827_vm0, %v230_v12, -inf }
  0x3e   :  { %v6373_v46 = vrot.slane %v240_v51, %v6196_v38  ;;  %v255_v47 = vcombine.high %v247_v60, %v247_v60  ;;  %v941_v48 = vrot.slane %v940_v44, 4  ;;  %v968_v52 = vsel %vm827_vm0, %v247_v60, -inf }
  0x3f   :  { %v239_v53 = vcombine.high %v237_v27, %v237_v27  ;;  %v947_v55 = vsel %vm827_vm0, %v238_v43, -inf  ;;  %v954_v56 = vsel %vm827_vm0, %v237_v27, -inf  ;;  %v969_v57 = vrot.slane %v968_v52, 4 }
  0x40   :  { %v256_v11 = vcombine.high %v6373_v46, %v6373_v46  ;;  %v942_v58 = vmax.f32 %v940_v44, %v941_v48  ;;  %v948_v18 = vrot.slane %v947_v55, 4  ;;  %v955_v61 = vrot.slane %v954_v56, 4  ;;  %v5904_v44 = vld [vmem:[%s8682_s1 + $0x168] sm:$0xff]  }
  0x41   :  { %v961_v62 = vsel %vm827_vm0, %v239_v53, -inf  ;;  %v970_v63 = vmax.f32 %v968_v52, %v969_v57  ;;  %v975_v4 = vsel %vm827_vm0, %v255_v47, -inf  ;;  %v982_v6 = vsel %vm827_vm0, %v6373_v46, -inf  ;;  %v2046_v10 = vld [vmem:[#allocation2 + $0x10] sm:$0xff]  ;;  %v2047_v13 = vld [vmem:[#allocation2 + $0x18] sm:$0x3] }
  0x42   :  { %v943_v15 = vrot.slane %v942_v58, 2  ;;  %v949_v17 = vmax.f32 %v947_v55, %v948_v18  ;;  %v956_v19 = vmax.f32 %v954_v56, %v955_v61  ;;  %v962_v20 = vrot.slane %v961_v62, 4 }
  0x43   :  { %v2120_v23 = vrot.slane %v2046_v10, 1  ;;  %v2121_v24 = vrot.slane %v2047_v13, 1  ;;  %v2286_v0 = vpack.c.bf16 %v2046_v10, %v6021_v1  ;;  %v2185_v54 = vrot.slane %v2046_v10, 2 }
  0x44   :  { %v6385_v2 = vld [vmem:[#allocation2 + $0x20] sm:$0xff]  ;;  %v6387_v25 = vld [vmem:[#allocation2 + $0x28] sm:$0x3]  ;;  %v2186_v26 = vrot.slane %v2047_v13, 2  ;;  %v944_v8 = vmax.f32 %v942_v58, %v943_v15  ;;  %v950_v28 = vrot.slane %v949_v17, 2  ;;  %v957_v3 = vrot.slane %v956_v19, 2 }
  0x45   :  { %v6390_v29 = vsel %vm2116_vm5, %v2120_v23, %v2121_v24  ;;  %v2123_v30 = vrot.slane %v6385_v2, 1  ;;  %v2124_v31 = vrot.slane %v6387_v25, 1  ;;  %v2289_v32 = vpack.c.bf16 %v6385_v2, %v2046_v10 }
  0x46   :  { %v2287_v1 = vpack.c.bf16 %v6390_v29, %v6337_v9  ;;  %v6398_v33 = vsel %vm2181_vm8, %v2185_v54, %v2186_v26  ;;  %v945_v14 = vrot.slane %v944_v8, 1  ;;  %v951_v34 = vmax.f32 %v949_v17, %v950_v28  ;;  %v5902_v9 = vld [vmem:[%s8682_s1 + $0x170] sm:$0xff]  }
  0x47   :  { %v6404_v16 = vsel %vm2116_vm5, %v2123_v30, %v2124_v31  ;;  %3045 = vmatprep.mubr.bf16.mxu1 %v2289_v32  ;;  %v2288_v35 = vpack.c.bf16 %v6398_v33, %v6355_v59  ;;  %v958_v50 = vmax.f32 %v956_v19, %v957_v3  ;;  %v963_v36 = vmax.f32 %v961_v62, %v962_v20 }
  0x48   :  { %2948 = vmatprep.mubr.bf16.mxu0 %v2287_v1  ;;  %v946_v21 = vmax.f32 %v944_v8, %v945_v14  ;;  %v952_v39 = vrot.slane %v951_v34, 1  ;;  %v971_v40 = vrot.slane %v970_v63, 2  ;;  %v976_v12 = vrot.slane %v975_v4, 4 }
  0x49   :  { %2949 = vmatmul.mubr.bf16.vlgmr.msra.gmra.mxu0 %v2286_v0  ;;  %3046 = vmatmul.mubr.bf16.vlgmr.msra.gmra.mxu1 %v2288_v35  ;;  %v959_v59 = vrot.slane %v958_v50, 1  ;;  %v964_v22 = vrot.slane %v963_v36, 2  ;;  %v983_v49 = vrot.slane %v982_v6, 4  ;;  %v989_v27 = vsel %vm827_vm0, %v256_v11, -inf }
  0x4a   :  { %5387 = vmatpush3.bf16.msra.mxu0 %v5901_v7  ;;  %v953_v51 = vmax.f32 %v951_v34, %v952_v39  ;;  %v972_v60 = vmax.f32 %v970_v63, %v971_v40  ;;  %v264_v43 = vrot.slane %v6362_v41, %v6196_v38  ;;  %v977_v48 = vmax.f32 %v975_v4, %v976_v12 }
  0x4b   :  { %v960_v46 = vmax.f32 %v958_v50, %v959_v59  ;;  %v965_v47 = vmax.f32 %v963_v36, %v964_v22  ;;  %v984_v52 = vmax.f32 %v982_v6, %v983_v49  ;;  %5388 = vmatprep.subr.bf16.mxu0 %v5902_v9  ;;  %v990_v55 = vrot.slane %v989_v27, 4  ;;  %v5905_v6 = vld [vmem:[%s8682_s1 + $0x128] sm:$0xff]  }
  0x4c   :  { %v973_v53 = vrot.slane %v972_v60, 1  ;;  %v1913_v56 = vsel %vm1892_vm1, %v953_v51, %v946_v21  ;;  %v271_v57 = vrot.slane %v257_v45, %v6196_v38  ;;  %v978_v58 = vrot.slane %v977_v48, 2  ;;  %v5906_v45 = vld [vmem:[%s8682_s1 + $0x160] sm:$0xff]  }
  0x4d   :  { %v966_v11 = vrot.slane %v965_v47, 1  ;;  %v985_v18 = vrot.slane %v984_v52, 2  ;;  %v1914_v61 = vsel %vm1894_vm2, %v960_v46, %v1913_v56  ;;  %v991_v63 = vmax.f32 %v989_v27, %v990_v55 }
  0x4e   :  { %v974_v62 = vmax.f32 %v972_v60, %v973_v53  ;;  %v272_v10 = vcombine.high %v264_v43, %v264_v43  ;;  %v273_v4 = vcombine.high %v271_v57, %v271_v57  ;;  %5389 = vmatpush3.bf16.msra.mxu0 %v5903_v5  ;;  %v979_v15 = vmax.f32 %v977_v48, %v978_v58 }
  0x4f   :  { %v967_v13 = vmax.f32 %v965_v47, %v966_v11  ;;  %v986_v17 = vmax.f32 %v984_v52, %v985_v18  ;;  %v274_v41 = vcombine.high %v6366_v42, %v6366_v42  ;;  %5390 = vmatprep.subr.bf16.mxu0 %v5904_v44  ;;  %v992_v19 = vrot.slane %v991_v63, 2 }
  0x50   :  { %v281_v20 = vrot.slane %v6366_v42, %v6196_v38  ;;  %v996_v23 = vsel %vm827_vm0, %v264_v43, -inf  ;;  %v1003_v24 = vsel %vm827_vm0, %v272_v10, -inf  ;;  %v980_v0 = vrot.slane %v979_v15, 1  ;;  %v5907_v42 = vld [vmem:[%s8682_s1 + $0x120] sm:$0xff]  }
  0x51   :  { %v987_v54 = vrot.slane %v986_v17, 1  ;;  %v1915_v26 = vsel %vm1896_vm3, %v967_v13, %v1914_v61  ;;  %v288_v8 = vrot.slane %v274_v41, %v6196_v38  ;;  %v993_v28 = vmax.f32 %v991_v63, %v992_v19 }
  0x52   :  { %v1916_v3 = vsel %vm1898_vm4, %v974_v62, %v1915_v26  ;;  %v289_v30 = vcombine.high %v281_v20, %v281_v20  ;;  %v997_v31 = vrot.slane %v996_v23, 4  ;;  %5391 = vmatpush3.bf16.msra.mxu0 %v5905_v6  ;;  %v981_v32 = vmax.f32 %v979_v15, %v980_v0 }
  0x53   :  { %v988_v1 = vmax.f32 %v986_v17, %v987_v54  ;;  %v290_v7 = vcombine.high %v288_v8, %v288_v8  ;;  %v1004_v14 = vrot.slane %v1003_v24, 4  ;;  %5392 = vmatprep.subr.bf16.mxu0 %v5906_v45  ;;  %v994_v34 = vrot.slane %v993_v28, 1 }
  0x54   :  { %v998_v35 = vmax.f32 %v996_v23, %v997_v31  ;;  %v1010_v50 = vsel %vm827_vm0, %v271_v57, -inf  ;;  %v1017_v36 = vsel %vm827_vm0, %v273_v4, -inf  ;;  %v1917_v9 = vsel %vm1900_vm6, %v981_v32, %v1916_v3 }
  0x55   :  { %v1005_v21 = vmax.f32 %v1003_v24, %v1004_v14  ;;  %v1011_v39 = vrot.slane %v1010_v50, 4  ;;  %v1018_v40 = vrot.slane %v1017_v36, 4  ;;  %v995_v5 = vmax.f32 %v993_v28, %v994_v34 }
  0x56   :  { %v1918_v59 = vsel %vm1902_vm7, %v988_v1, %v1917_v9  ;;  %v999_v22 = vrot.slane %v998_v35, 2  ;;  %v1024_v12 = vsel %vm827_vm0, %v281_v20, -inf  ;;  %5393 = vmatpush3.bf16.msra.mxu0 %v5907_v42  ;;  %v1031_v46 = vsel %vm827_vm0, %v289_v30, -inf }
  0x57   :  { %v1006_v49 = vrot.slane %v1005_v21, 2  ;;  %v1012_v51 = vmax.f32 %v1010_v50, %v1011_v39  ;;  %v1019_v60 = vmax.f32 %v1017_v36, %v1018_v40  ;;  %v1025_v27 = vrot.slane %v1024_v12, 4  ;;  %v44_v50 = vld [vmem:[%s8683_s0 + $0x88] sm:$0xff]  ;;  %v46_v40 = vld [vmem:[%s8683_s0 + $0x98] sm:$0xff] }
  0x58   :  { %v1919_v43 = vsel %vm1904_vm9, %v995_v5, %v1918_v59  ;;  %v1000_v44 = vmax.f32 %v998_v35, %v999_v22  ;;  %v1038_v47 = vsel %vm827_vm0, %v288_v8, -inf  ;;  %v1032_v57 = vrot.slane %v1031_v46, 4  ;;  %v43_v35 = vld [vmem:[%s8683_s0 + $0x80] sm:$0xff] }
  0x59   :  { %2030 = vst [vmem:[#allocation2 + $0x31] sm:$0xff] %v1919_v43  ;;  %v1007_v48 = vmax.f32 %v1005_v21, %v1006_v49  ;;  %v1013_v52 = vrot.slane %v1012_v51, 2  ;;  %v1020_v53 = vrot.slane %v1019_v60, 2  ;;  %v1026_v55 = vmax.f32 %v1024_v12, %v1025_v27  ;;  %v47_v5 = vld [vmem:[%s8683_s0 + $0xa0] sm:$0xff]  ;;  %v50_v27 = vld [vmem:[%s8683_s0 + $0xb8] sm:$0xff] }
  0x5a   :  { %v1001_v56 = vrot.slane %v1000_v44, 1  ;;  %v1039_v11 = vrot.slane %v1038_v47, 4  ;;  %v1045_v58 = vsel %vm827_vm0, %v290_v7, -inf  ;;  %v1033_v4 = vmax.f32 %v1031_v46, %v1032_v57 }
  0x5b   :  { %v1008_v18 = vrot.slane %v1007_v48, 1  ;;  %v1014_v61 = vmax.f32 %v1012_v51, %v1013_v52  ;;  %v1021_v62 = vmax.f32 %v1019_v60, %v1020_v53  ;;  %v1027_v63 = vrot.slane %v1026_v55, 2  ;;  %v48_v51 = vld [vmem:[%s8683_s0 + $0xa8] sm:$0xff]  ;;  %v49_v60 = vld [vmem:[%s8683_s0 + $0xb0] sm:$0xff] }
  0x5c   :  { %v1002_v10 = vmax.f32 %v1000_v44, %v1001_v56  ;;  %v1040_v6 = vmax.f32 %v1038_v47, %v1039_v11  ;;  %v1046_v13 = vrot.slane %v1045_v58, 4  ;;  %v1034_v19 = vrot.slane %v1033_v4, 2 }
  0x5d   :  { %v1009_v15 = vmax.f32 %v1007_v48, %v1008_v18  ;;  %v1015_v17 = vrot.slane %v1014_v61, 1  ;;  %v1022_v41 = vrot.slane %v1021_v62, 1  ;;  %v1028_v45 = vmax.f32 %v1026_v55, %v1027_v63 }
  0x5e   :  { %v1041_v20 = vrot.slane %v1040_v6, 2  ;;  %v1047_v23 = vmax.f32 %v1045_v58, %v1046_v13  ;;  %v2188_v24 = vrot.slane %v6385_v2, 2  ;;  %v1035_v30 = vmax.f32 %v1033_v4, %v1034_v19 }
  0x5f   :  { %v1016_v0 = vmax.f32 %v1014_v61, %v1015_v17  ;;  %v1023_v54 = vmax.f32 %v1021_v62, %v1022_v41  ;;  %v1029_v26 = vrot.slane %v1028_v45, 1  ;;  %v1920_v8 = vsel %vm1892_vm1, %v1009_v15, %v1002_v10 }
  0x60   :  { %v6457_v28 = vld [vmem:[#allocation2 + $0x30] sm:$0xff]  ;;  %v2051_v3 = vld [vmem:[#allocation2 + $0x38] sm:$0x3]  ;;  %v1042_v31 = vmax.f32 %v1040_v6, %v1041_v20  ;;  %v1048_v42 = vrot.slane %v1047_v23, 2  ;;  %v2189_v32 = vrot.slane %v6387_v25, 2  ;;  %v1036_v36 = vrot.slane %v1035_v30, 1 }
  0x61   :  { %v2126_v1 = vrot.slane %v6457_v28, 1  ;;  %v2127_v7 = vrot.slane %v2051_v3, 1  ;;  %v1030_v14 = vmax.f32 %v1028_v45, %v1029_v26  ;;  %v1921_v34 = vsel %vm1894_vm2, %v1016_v0, %v1920_v8  ;;  %v45_v25 = vld [vmem:[%s8683_s0 + $0x90] sm:$0xff] }
  0x62   :  { %v1043_v9 = vrot.slane %v1042_v31, 1  ;;  %v1049_v21 = vmax.f32 %v1047_v23, %v1048_v42  ;;  %v1922_v39 = vsel %vm1896_vm3, %v1023_v54, %v1921_v34  ;;  %v6484_v12 = vpack.c.bf16 %v6457_v28, %v6385_v2 }
  0x63   :  { %v6479_v59 = vsel %vm2116_vm5, %v2126_v1, %v2127_v7  ;;  %v1923_v22 = vsel %vm1898_vm4, %v1030_v14, %v1922_v39  ;;  %v6487_v49 = vsel %vm2181_vm8, %v2188_v24, %v2189_v32  ;;  %v1037_v2 = vmax.f32 %v1035_v30, %v1036_v36 }
  0x64   :  { %v6500_v43 = vpack.c.bf16 %v6479_v59, %v6404_v16  ;;  %v1044_v44 = vmax.f32 %v1042_v31, %v1043_v9  ;;  %v1050_v46 = vrot.slane %v1049_v21, 1  ;;  %v2191_v47 = vrot.slane %v6457_v28, 2 }
  0x65   :  { %v2192_v48 = vrot.slane %v2051_v3, 2  ;;  %v99_v52 = vmax.f32 %v43_v35, %v45_v25  ;;  %v100_v53 = vmax.f32 %v44_v50, %v46_v40  ;;  %v1924_v56 = vsel %vm1900_vm6, %v1037_v2, %v1923_v22 }
  0x66   :  { %2956 = vmatprep.mubr.bf16.mxu0 %v6500_v43  ;;  %v1051_v55 = vmax.f32 %v1049_v21, %v1050_v46  ;;  %v6505_v57 = vmax.f32 %v47_v5, %v49_v60  ;;  %v6507_v11 = vmax.f32 %v48_v51, %v50_v27  ;;  %v1925_v58 = vsel %vm1902_vm7, %v1044_v44, %v1924_v56  ;;  %v5908_v60 = vld [vmem:[%s8682_s1 + $0x158] sm:$0xff]  }
  0x67   :  { %2957 = vmatmul.mubr.bf16.gmra.mxu0 %v6484_v12  ;;  %v6512_v18 = vsel %vm2181_vm8, %v2191_v47, %v2192_v48  ;;  %v291_v61 = vcombine.high %v99_v52, %v99_v52  ;;  %v298_v62 = vrot.slane %v99_v52, %v6196_v38  ;;  %v308_v4 = vcombine.high %v100_v53, %v100_v53  ;;  %v5909_v47 = vld [vmem:[%s8682_s1 + $0x1f8] sm:$0xff]  }
  0x68   :  { %v1926_v63 = vsel %vm1904_vm9, %v1051_v55, %v1925_v58  ;;  %v6518_v10 = vpack.c.bf16 %v6512_v18, %v6487_v49  ;;  %v315_v6 = vrot.slane %v100_v53, %v6196_v38  ;;  %v325_v41 = vcombine.high %v6505_v57, %v6505_v57  ;;  %v5910_v48 = vld [vmem:[%s8682_s1 + $0x118] sm:$0xff]   ;;  %5394 = vmatprep.subr.bf16.mxu0 %v5908_v60 }
  0x69   :  { %2031 = vst [vmem:[#allocation2 + $0x41] sm:$0xff] %v1926_v63  ;;  %v305_v13 = vrot.slane %v291_v61, %v6196_v38  ;;  %v306_v15 = vcombine.high %v298_v62, %v298_v62  ;;  %v1052_v17 = vsel %vm827_vm0, %v298_v62, -inf  ;;  %v322_v45 = vrot.slane %v308_v4, %v6196_v38  ;;  %v5911_v52 = vld [vmem:[%s8682_s1 + $0x1b8] sm:$0xff]   ;;  %5450 = vmatprep.subr.bf16.mxu1 %v5909_v47 }
  0x6a   :  { %8712 = vst [vmem:[#allocation3_spill] sm:$0xff] %v6518_v10  ;;  %v323_v19 = vcombine.high %v315_v6, %v315_v6  ;;  %v1053_v20 = vrot.slane %v1052_v17, 4  ;;  %v1080_v23 = vsel %vm827_vm0, %v315_v6, -inf  ;;  %5395 = vmatpush3.bf16.msra.mxu0 %v5910_v48  ;;  %5451 = vmatpush3.bf16.msra.mxu1 %v5911_v52 }
  0x6b   :  { %v307_v24 = vcombine.high %v305_v13, %v305_v13  ;;  %v1059_v0 = vsel %vm827_vm0, %v306_v15, -inf  ;;  %v1066_v54 = vsel %vm827_vm0, %v305_v13, -inf  ;;  %v1081_v26 = vrot.slane %v1080_v23, 4 }
  0x6c   :  { %v324_v8 = vcombine.high %v322_v45, %v322_v45  ;;  %v1054_v3 = vmax.f32 %v1052_v17, %v1053_v20  ;;  %v1060_v30 = vrot.slane %v1059_v0, 4  ;;  %v1067_v31 = vrot.slane %v1066_v54, 4 }
  0x6d   :  { %v1073_v42 = vsel %vm827_vm0, %v307_v24, -inf  ;;  %v1082_v32 = vmax.f32 %v1080_v23, %v1081_v26  ;;  %v1087_v1 = vsel %vm827_vm0, %v323_v19, -inf  ;;  %v1094_v7 = vsel %vm827_vm0, %v322_v45, -inf }
  0x6e   :  { %v1055_v14 = vrot.slane %v1054_v3, 2  ;;  %v1061_v34 = vmax.f32 %v1059_v0, %v1060_v30  ;;  %v1068_v35 = vmax.f32 %v1066_v54, %v1067_v31  ;;  %v1074_v50 = vrot.slane %v1073_v42, 4 }
  0x6f   :  { %v1083_v36 = vrot.slane %v1082_v32, 2  ;;  %v1088_v9 = vrot.slane %v1087_v1, 4  ;;  %v1095_v21 = vrot.slane %v1094_v7, 4  ;;  %v1101_v39 = vsel %vm827_vm0, %v324_v8, -inf }
  0x70   :  { %v6533_v25 = vld [vmem:[#allocation2 + $0x40] sm:$0xff]  ;;  %v1056_v40 = vmax.f32 %v1054_v3, %v1055_v14  ;;  %v1062_v5 = vrot.slane %v1061_v34, 2  ;;  %v1069_v22 = vrot.slane %v1068_v35, 2  ;;  %v1075_v51 = vmax.f32 %v1073_v42, %v1074_v50  ;;  %v6553_v45 = vld [vmem:[#allocation2 + $0x48] sm:$0x3] }
  0x71   :  { %v2295_v27 = vpack.c.bf16 %v6533_v25, %v6457_v28  ;;  %v1084_v2 = vmax.f32 %v1082_v32, %v1083_v36  ;;  %v1089_v44 = vmax.f32 %v1087_v1, %v1088_v9  ;;  %v1096_v46 = vmax.f32 %v1094_v7, %v1095_v21  ;;  %v5912_v28 = vld [vmem:[%s8682_s1 + $0x1f0] sm:$0xff]  }
  0x72   :  { %v1057_v53 = vrot.slane %v1056_v40, 1  ;;  %v1063_v55 = vmax.f32 %v1061_v34, %v1062_v5  ;;  %v1070_v56 = vmax.f32 %v1068_v35, %v1069_v22  ;;  %v1076_v58 = vrot.slane %v1075_v51, 2  ;;  %5452 = vmatprep.subr.bf16.mxu1 %v5912_v28 }
  0x73   :  { %3053 = vmatprep.mubr.bf16.mxu1 %v2295_v27  ;;  %v1085_v61 = vrot.slane %v1084_v2, 1  ;;  %v1090_v62 = vrot.slane %v1089_v44, 2  ;;  %v1097_v63 = vrot.slane %v1096_v46, 2  ;;  %v1102_v4 = vrot.slane %v1101_v39, 4 }
  0x74   :  { %3054 = vmatmul.mubr.bf16.gmra.mxu1 %v6518_v10  ;;  %v1058_v6 = vmax.f32 %v1056_v40, %v1057_v53  ;;  %v1064_v13 = vrot.slane %v1063_v55, 1  ;;  %v1071_v15 = vrot.slane %v1070_v56, 1  ;;  %v1077_v17 = vmax.f32 %v1075_v51, %v1076_v58 }
  0x75   :  { %v1086_v19 = vmax.f32 %v1084_v2, %v1085_v61  ;;  %v1091_v20 = vmax.f32 %v1089_v44, %v1090_v62  ;;  %v1098_v23 = vmax.f32 %v1096_v46, %v1097_v63  ;;  %v1103_v24 = vmax.f32 %v1101_v39, %v1102_v4 }
  0x76   :  { %v1065_v0 = vmax.f32 %v1063_v55, %v1064_v13  ;;  %v1072_v54 = vmax.f32 %v1070_v56, %v1071_v15  ;;  %v1078_v26 = vrot.slane %v1077_v17, 1  ;;  %v2129_v8 = vrot.slane %v6533_v25, 1 }
  0x77   :  { %v1092_v3 = vrot.slane %v1091_v20, 1  ;;  %v1099_v30 = vrot.slane %v1098_v23, 1  ;;  %v1104_v31 = vrot.slane %v1103_v24, 2  ;;  %v2130_v42 = vrot.slane %v6553_v45, 1 }
  0x78   :  { %v1079_v32 = vmax.f32 %v1077_v17, %v1078_v26  ;;  %v1927_v1 = vsel %vm1892_vm1, %v1065_v0, %v1058_v6  ;;  %v332_v7 = vrot.slane %v6505_v57, %v6196_v38  ;;  %v339_v14 = vrot.slane %v325_v41, %v6196_v38 }
  0x79   :  { %v1093_v34 = vmax.f32 %v1091_v20, %v1092_v3  ;;  %v1100_v35 = vmax.f32 %v1098_v23, %v1099_v30  ;;  %v1105_v50 = vmax.f32 %v1103_v24, %v1104_v31  ;;  %v1928_v36 = vsel %vm1894_vm2, %v1072_v54, %v1927_v1  ;;  %v51_v1 = vld [vmem:[%s8683_s0 + $0xc0] sm:$0xff] }
  0x7a   :  { %v1929_v9 = vsel %vm1896_vm3, %v1079_v32, %v1928_v36  ;;  %v6567_v21 = vsel %vm2116_vm5, %v2129_v8, %v2130_v42  ;;  %v340_v39 = vcombine.high %v332_v7, %v332_v7  ;;  %v341_v40 = vcombine.high %v339_v14, %v339_v14 }
  0x7b   :  { %v1106_v5 = vrot.slane %v1105_v50, 1  ;;  %v1930_v22 = vsel %vm1898_vm4, %v1086_v19, %v1929_v9  ;;  %v342_v51 = vcombine.high %v6507_v11, %v6507_v11  ;;  %v349_v57 = vrot.slane %v6507_v11, %v6196_v38 }
  0x7c   :  { %v1931_v41 = vsel %vm1900_vm6, %v1093_v34, %v1930_v22  ;;  %v1108_v60 = vsel %vm827_vm0, %v332_v7, -inf  ;;  %v1115_v27 = vsel %vm827_vm0, %v340_v39, -inf  ;;  %v1122_v2 = vsel %vm827_vm0, %v339_v14, -inf  ;;  %v53_v7 = vld [vmem:[%s8683_s0 + $0xd0] sm:$0xff] }
  0x7d   :  { %v1107_v44 = vmax.f32 %v1105_v50, %v1106_v5  ;;  %v1932_v46 = vsel %vm1902_vm7, %v1100_v35, %v1931_v41  ;;  %v356_v47 = vrot.slane %v342_v51, %v6196_v38  ;;  %v357_v48 = vcombine.high %v349_v57, %v349_v57 }
  0x7e   :  { %v1109_v52 = vrot.slane %v1108_v60, 4  ;;  %v1116_v53 = vrot.slane %v1115_v27, 4  ;;  %v1123_v55 = vrot.slane %v1122_v2, 4  ;;  %v1129_v56 = vsel %vm827_vm0, %v341_v40, -inf }
  0x7f   :  { %v1933_v11 = vsel %vm1904_vm9, %v1107_v44, %v1932_v46  ;;  %v358_v58 = vcombine.high %v356_v47, %v356_v47  ;;  %v1130_v28 = vrot.slane %v1129_v56, 4  ;;  %v1136_v61 = vsel %vm827_vm0, %v349_v57, -inf }
  0x80   :  { %2032 = vst [vmem:[#allocation2 + $0x51] sm:$0xff] %v1933_v11  ;;  %v1110_v62 = vmax.f32 %v1108_v60, %v1109_v52  ;;  %v1117_v63 = vmax.f32 %v1115_v27, %v1116_v53  ;;  %v1124_v4 = vmax.f32 %v1122_v2, %v1123_v55  ;;  %v1137_v6 = vrot.slane %v1136_v61, 4 }
  0x81   :  { %v1131_v13 = vmax.f32 %v1129_v56, %v1130_v28  ;;  %v1143_v15 = vsel %vm827_vm0, %v357_v48, -inf  ;;  %v1150_v17 = vsel %vm827_vm0, %v356_v47, -inf  ;;  %v1157_v19 = vsel %vm827_vm0, %v358_v58, -inf }
  0x82   :  { %v1111_v20 = vrot.slane %v1110_v62, 2  ;;  %v1118_v23 = vrot.slane %v1117_v63, 2  ;;  %v1125_v24 = vrot.slane %v1124_v4, 2  ;;  %v1138_v0 = vmax.f32 %v1136_v61, %v1137_v6 }
  0x83   :  { %v1132_v54 = vrot.slane %v1131_v13, 2  ;;  %v1144_v26 = vrot.slane %v1143_v15, 4  ;;  %v1151_v8 = vrot.slane %v1150_v17, 4  ;;  %v1158_v3 = vrot.slane %v1157_v19, 4 }
  0x84   :  { %v1112_v30 = vmax.f32 %v1110_v62, %v1111_v20  ;;  %v1119_v31 = vmax.f32 %v1117_v63, %v1118_v23  ;;  %v1126_v42 = vmax.f32 %v1124_v4, %v1125_v24  ;;  %v1139_v32 = vrot.slane %v1138_v0, 2 }
  0x85   :  { %v1133_v14 = vmax.f32 %v1131_v13, %v1132_v54  ;;  %v1145_v34 = vmax.f32 %v1143_v15, %v1144_v26  ;;  %v1152_v35 = vmax.f32 %v1150_v17, %v1151_v8  ;;  %v1159_v50 = vmax.f32 %v1157_v19, %v1158_v3  ;;  %v52_v17 = vld [vmem:[%s8683_s0 + $0xc8] sm:$0xff]  ;;  %v54_v19 = vld [vmem:[%s8683_s0 + $0xd8] sm:$0xff] }
  0x86   :  { %v1113_v36 = vrot.slane %v1112_v30, 1  ;;  %v1120_v9 = vrot.slane %v1119_v31, 1  ;;  %v1127_v39 = vrot.slane %v1126_v42, 1  ;;  %v1140_v40 = vmax.f32 %v1138_v0, %v1139_v32 }
  0x87   :  { %v6592_v5 = vld [vmem:[#allocation2 + $0x50] sm:$0xff]  ;;  %v2055_v22 = vld [vmem:[#allocation2 + $0x58] sm:$0x3]  ;;  %v1134_v51 = vrot.slane %v1133_v14, 1  ;;  %v1146_v57 = vrot.slane %v1145_v34, 2  ;;  %v1153_v41 = vrot.slane %v1152_v35, 2  ;;  %v103_v60 = vmax.f32 %v51_v1, %v53_v7 }
  0x88   :  { %v2132_v27 = vrot.slane %v6592_v5, 1  ;;  %v2133_v2 = vrot.slane %v2055_v22, 1  ;;  %v1114_v44 = vmax.f32 %v1112_v30, %v1113_v36  ;;  %v1121_v46 = vmax.f32 %v1119_v31, %v1120_v9 }
  0x89   :  { %v1128_v47 = vmax.f32 %v1126_v42, %v1127_v39  ;;  %v1135_v48 = vmax.f32 %v1133_v14, %v1134_v51  ;;  %v1141_v52 = vrot.slane %v1140_v40, 1  ;;  %v1147_v53 = vmax.f32 %v1145_v34, %v1146_v57  ;;  %v56_v39 = vld [vmem:[%s8683_s0 + $0xe8] sm:$0xff] }
  0x8a   :  { %v6596_v55 = vsel %vm2116_vm5, %v2132_v27, %v2133_v2  ;;  %v1154_v56 = vmax.f32 %v1152_v35, %v1153_v41  ;;  %v1160_v11 = vrot.slane %v1159_v50, 2  ;;  %v1934_v58 = vsel %vm1892_vm1, %v1121_v46, %v1114_v44 }
  0x8b   :  { %v6601_v28 = vpack.c.bf16 %v6596_v55, %v6567_v21  ;;  %v1142_v61 = vmax.f32 %v1140_v40, %v1141_v52  ;;  %v1148_v62 = vrot.slane %v1147_v53, 1  ;;  %v1935_v63 = vsel %vm1894_vm2, %v1128_v47, %v1934_v58  ;;  %v58_v40 = vld [vmem:[%s8683_s0 + $0xf8] sm:$0xff] }
  0x8c   :  { %v1155_v4 = vrot.slane %v1154_v56, 1  ;;  %v1161_v6 = vmax.f32 %v1159_v50, %v1160_v11  ;;  %v1936_v13 = vsel %vm1896_vm3, %v1135_v48, %v1935_v63  ;;  %v6607_v15 = vpack.c.bf16 %v6592_v5, %v6533_v25 }
  0x8d   :  { %2964 = vmatprep.mubr.bf16.mxu0 %v6601_v28  ;;  %v1149_v20 = vmax.f32 %v1147_v53, %v1148_v62  ;;  %v1937_v23 = vsel %vm1898_vm4, %v1142_v61, %v1936_v13  ;;  %v2194_v24 = vrot.slane %v6533_v25, 2  ;;  %v2195_v0 = vrot.slane %v6553_v45, 2  ;;  %v55_v25 = vld [vmem:[%s8683_s0 + $0xe0] sm:$0xff]  ;;  %v57_v45 = vld [vmem:[%s8683_s0 + $0xf0] sm:$0xff] }
  0x8e   :  { %8713 = vst [vmem:[#allocation4_spill] sm:$0xff] %v6607_v15  ;;  %v1156_v54 = vmax.f32 %v1154_v56, %v1155_v4  ;;  %v1162_v26 = vrot.slane %v1161_v6, 1  ;;  %2965 = vmatmul.mubr.bf16.gmra.mxu0 %v6607_v15  ;;  %v2197_v8 = vrot.slane %v6592_v5, 2  ;;  %v2198_v3 = vrot.slane %v2055_v22, 2 }
  0x8f   :  { %v1938_v30 = vsel %vm1900_vm6, %v1149_v20, %v1937_v23  ;;  %v6623_v31 = vsel %vm2181_vm8, %v2194_v24, %v2195_v0  ;;  %v104_v42 = vmax.f32 %v52_v17, %v54_v19  ;;  %v359_v32 = vcombine.high %v103_v60, %v103_v60 }
  0x90   :  { %v1163_v1 = vmax.f32 %v1161_v6, %v1162_v26  ;;  %v1939_v7 = vsel %vm1902_vm7, %v1156_v54, %v1938_v30  ;;  %v6633_v14 = vsel %vm2181_vm8, %v2197_v8, %v2198_v3  ;;  %v366_v34 = vrot.slane %v103_v60, %v6196_v38  ;;  %v5914_v54 = vld [vmem:[%s8682_s1 + $0x1b0] sm:$0xff]  }
  0x91   :  { %v6638_v35 = vpack.c.bf16 %v6633_v14, %v6623_v31  ;;  %v373_v50 = vrot.slane %v359_v32, %v6196_v38  ;;  %v376_v36 = vcombine.high %v104_v42, %v104_v42  ;;  %v383_v9 = vrot.slane %v104_v42, %v6196_v38  ;;  %5453 = vmatpush3.bf16.msra.mxu1 %v5914_v54 }
  0x92   :  { %v1940_v22 = vsel %vm1904_vm9, %v1163_v1, %v1939_v7  ;;  %v374_v51 = vcombine.high %v366_v34, %v366_v34  ;;  %v1164_v57 = vsel %vm827_vm0, %v366_v34, -inf  ;;  %v6650_v41 = vmax.f32 %v55_v25, %v57_v45  ;;  %v5913_v7 = vld [vmem:[%s8682_s1 + $0x150] sm:$0xff]  }
  0x93   :  { %8714 = vst [vmem:[#allocation5_spill] sm:$0xff] %v6638_v35  ;;  %2033 = vst [vmem:[#allocation2 + $0x61] sm:$0xff] %v1940_v22  ;;  %v375_v60 = vcombine.high %v373_v50, %v373_v50  ;;  %v390_v27 = vrot.slane %v376_v36, %v6196_v38  ;;  %v391_v2 = vcombine.high %v383_v9, %v383_v9  ;;  %v1165_v44 = vrot.slane %v1164_v57, 4  ;;  %v5917_v22 = vld [vmem:[%s8682_s1 + $0x1a8] sm:$0xff]  }
  0x94   :  { %v1171_v46 = vsel %vm827_vm0, %v374_v51, -inf  ;;  %v1178_v47 = vsel %vm827_vm0, %v373_v50, -inf  ;;  %v1192_v48 = vsel %vm827_vm0, %v383_v9, -inf  ;;  %v6656_v52 = vmax.f32 %v56_v39, %v58_v40  ;;  %v5915_v39 = vld [vmem:[%s8682_s1 + $0x110] sm:$0xff]   ;;  %v5916_v40 = vld [vmem:[%s8682_s1 + $0x1e8] sm:$0xff]   ;;  %5396 = vmatprep.subr.bf16.mxu0 %v5913_v7 }
  0x95   :  { %v392_v53 = vcombine.high %v390_v27, %v390_v27  ;;  %v1166_v56 = vmax.f32 %v1164_v57, %v1165_v44  ;;  %v1172_v11 = vrot.slane %v1171_v46, 4  ;;  %v1179_v58 = vrot.slane %v1178_v47, 4  ;;  %5397 = vmatpush3.bf16.msra.mxu0 %v5915_v39  ;;  %5454 = vmatprep.subr.bf16.mxu1 %v5916_v40 }
  0x96   :  { %v1185_v61 = vsel %vm827_vm0, %v375_v60, -inf  ;;  %v1193_v62 = vrot.slane %v1192_v48, 4  ;;  %v1199_v63 = vsel %vm827_vm0, %v391_v2, -inf  ;;  %v1206_v4 = vsel %vm827_vm0, %v390_v27, -inf  ;;  %5455 = vmatpush3.bf16.msra.mxu1 %v5917_v22 }
  0x97   :  { %v1167_v6 = vrot.slane %v1166_v56, 2  ;;  %v1173_v13 = vmax.f32 %v1171_v46, %v1172_v11  ;;  %v1180_v17 = vmax.f32 %v1178_v47, %v1179_v58  ;;  %v1186_v19 = vrot.slane %v1185_v61, 4 }
  0x98   :  { %v1194_v20 = vmax.f32 %v1192_v48, %v1193_v62  ;;  %v1200_v23 = vrot.slane %v1199_v63, 4  ;;  %v1207_v24 = vrot.slane %v1206_v4, 4  ;;  %v1213_v0 = vsel %vm827_vm0, %v392_v53, -inf }
  0x99   :  { %v1168_v26 = vmax.f32 %v1166_v56, %v1167_v6  ;;  %v1174_v8 = vrot.slane %v1173_v13, 2  ;;  %v1181_v3 = vrot.slane %v1180_v17, 2  ;;  %v1187_v30 = vmax.f32 %v1185_v61, %v1186_v19 }
  0x9a   :  { %v6665_v42 = vld [vmem:[#allocation2 + $0x60] sm:$0xff]  ;;  %v1195_v32 = vrot.slane %v1194_v20, 2  ;;  %v1201_v25 = vmax.f32 %v1199_v63, %v1200_v23  ;;  %v1208_v45 = vmax.f32 %v1206_v4, %v1207_v24  ;;  %v1214_v1 = vrot.slane %v1213_v0, 4  ;;  %v6685_v58 = vld [vmem:[#allocation2 + $0x68] sm:$0x3] }
  0x9b   :  { %v2301_v34 = vpack.c.bf16 %v6665_v42, %v6592_v5  ;;  %v1169_v50 = vrot.slane %v1168_v26, 1  ;;  %v1175_v36 = vmax.f32 %v1173_v13, %v1174_v8  ;;  %v1182_v9 = vmax.f32 %v1180_v17, %v1181_v3  ;;  %v5918_v5 = vld [vmem:[%s8682_s1 + $0x1e0] sm:$0xff]  }
  0x9c   :  { %v1188_v51 = vrot.slane %v1187_v30, 2  ;;  %v1196_v57 = vmax.f32 %v1194_v20, %v1195_v32  ;;  %v1202_v60 = vrot.slane %v1201_v25, 2  ;;  %v1209_v27 = vrot.slane %v1208_v45, 2  ;;  %5456 = vmatprep.subr.bf16.mxu1 %v5918_v5 }
  0x9d   :  { %3061 = vmatprep.mubr.bf16.mxu1 %v2301_v34  ;;  %v1170_v2 = vmax.f32 %v1168_v26, %v1169_v50  ;;  %v1176_v44 = vrot.slane %v1175_v36, 1  ;;  %v1183_v46 = vrot.slane %v1182_v9, 1  ;;  %v1215_v47 = vmax.f32 %v1213_v0, %v1214_v1 }
  0x9e   :  { %3062 = vmatmul.mubr.bf16.gmra.mxu1 %v6638_v35  ;;  %v1189_v48 = vmax.f32 %v1187_v30, %v1188_v51  ;;  %v1197_v53 = vrot.slane %v1196_v57, 1  ;;  %v1203_v56 = vmax.f32 %v1201_v25, %v1202_v60  ;;  %v1210_v11 = vmax.f32 %v1208_v45, %v1209_v27 }
  0x9f   :  { %v1177_v61 = vmax.f32 %v1175_v36, %v1176_v44  ;;  %v1184_v62 = vmax.f32 %v1182_v9, %v1183_v46  ;;  %v1216_v63 = vrot.slane %v1215_v47, 2  ;;  %v2135_v4 = vrot.slane %v6665_v42, 1 }
  0xa0   :  { %v1190_v6 = vrot.slane %v1189_v48, 1  ;;  %v1198_v13 = vmax.f32 %v1196_v57, %v1197_v53  ;;  %v1204_v17 = vrot.slane %v1203_v56, 1  ;;  %v1211_v19 = vrot.slane %v1210_v11, 1 }
  0xa1   :  { %v1217_v20 = vmax.f32 %v1215_v47, %v1216_v63  ;;  %v1941_v23 = vsel %vm1892_vm1, %v1177_v61, %v1170_v2  ;;  %v2136_v24 = vrot.slane %v6685_v58, 1  ;;  %v393_v0 = vcombine.high %v6650_v41, %v6650_v41 }
  0xa2   :  { %v1191_v54 = vmax.f32 %v1189_v48, %v1190_v6  ;;  %v1205_v26 = vmax.f32 %v1203_v56, %v1204_v17  ;;  %v1212_v8 = vmax.f32 %v1210_v11, %v1211_v19  ;;  %v1942_v3 = vsel %vm1894_vm2, %v1184_v62, %v1941_v23 }
  0xa3   :  { %v1218_v30 = vrot.slane %v1217_v20, 1  ;;  %v6694_v32 = vsel %vm2116_vm5, %v2135_v4, %v2136_v24  ;;  %v400_v25 = vrot.slane %v6650_v41, %v6196_v38  ;;  %v407_v45 = vrot.slane %v393_v0, %v6196_v38 }
  0xa4   :  { %v1943_v1 = vsel %vm1896_vm3, %v1191_v54, %v1942_v3  ;;  %v410_v7 = vcombine.high %v6656_v52, %v6656_v52  ;;  %v417_v34 = vrot.slane %v6656_v52, %v6196_v38  ;;  %v2200_v50 = vrot.slane %v6665_v42, 2 }
  0xa5   :  { %v1219_v36 = vmax.f32 %v1217_v20, %v1218_v30  ;;  %v1944_v9 = vsel %vm1898_vm4, %v1198_v13, %v1943_v1  ;;  %v408_v39 = vcombine.high %v400_v25, %v400_v25  ;;  %v409_v40 = vcombine.high %v407_v45, %v407_v45 }
  0xa6   :  { %v1945_v22 = vsel %vm1900_vm6, %v1205_v26, %v1944_v9  ;;  %v424_v41 = vrot.slane %v410_v7, %v6196_v38  ;;  %v425_v51 = vcombine.high %v417_v34, %v417_v34  ;;  %v1220_v57 = vsel %vm827_vm0, %v400_v25, -inf }
  0xa7   :  { %v1946_v60 = vsel %vm1902_vm7, %v1212_v8, %v1945_v22  ;;  %v1221_v27 = vrot.slane %v1220_v57, 4  ;;  %v1227_v5 = vsel %vm827_vm0, %v408_v39, -inf  ;;  %v1234_v52 = vsel %vm827_vm0, %v407_v45, -inf }
  0xa8   :  { %v1947_v2 = vsel %vm1904_vm9, %v1219_v36, %v1946_v60  ;;  %v426_v44 = vcombine.high %v424_v41, %v424_v41  ;;  %v1228_v46 = vrot.slane %v1227_v5, 4  ;;  %v1235_v47 = vrot.slane %v1234_v52, 4 }
  0xa9   :  { %2034 = vst [vmem:[#allocation2 + $0x71] sm:$0xff] %v1947_v2  ;;  %v1222_v48 = vmax.f32 %v1220_v57, %v1221_v27  ;;  %v1241_v53 = vsel %vm827_vm0, %v409_v40, -inf  ;;  %v1248_v56 = vsel %vm827_vm0, %v417_v34, -inf  ;;  %v1255_v11 = vsel %vm827_vm0, %v425_v51, -inf }
  0xaa   :  { %v1229_v61 = vmax.f32 %v1227_v5, %v1228_v46  ;;  %v1236_v62 = vmax.f32 %v1234_v52, %v1235_v47  ;;  %v1242_v63 = vrot.slane %v1241_v53, 4  ;;  %v1249_v4 = vrot.slane %v1248_v56, 4 }
  0xab   :  { %v1223_v6 = vrot.slane %v1222_v48, 2  ;;  %v1256_v13 = vrot.slane %v1255_v11, 4  ;;  %v1262_v17 = vsel %vm827_vm0, %v424_v41, -inf  ;;  %v1269_v19 = vsel %vm827_vm0, %v426_v44, -inf }
  0xac   :  { %v1230_v20 = vrot.slane %v1229_v61, 2  ;;  %v1237_v23 = vrot.slane %v1236_v62, 2  ;;  %v1243_v24 = vmax.f32 %v1241_v53, %v1242_v63  ;;  %v1250_v0 = vmax.f32 %v1248_v56, %v1249_v4 }
  0xad   :  { %v1224_v54 = vmax.f32 %v1222_v48, %v1223_v6  ;;  %v1257_v26 = vmax.f32 %v1255_v11, %v1256_v13  ;;  %v1263_v8 = vrot.slane %v1262_v17, 4  ;;  %v1270_v3 = vrot.slane %v1269_v19, 4  ;;  %v59_v6 = vld [vmem:[%s8683_s0 + $0x100] sm:$0xff] }
  0xae   :  { %v1231_v30 = vmax.f32 %v1229_v61, %v1230_v20  ;;  %v1238_v25 = vmax.f32 %v1236_v62, %v1237_v23  ;;  %v1244_v45 = vrot.slane %v1243_v24, 2  ;;  %v1251_v1 = vrot.slane %v1250_v0, 2  ;;  %v60_v23 = vld [vmem:[%s8683_s0 + $0x108] sm:$0xff] }
  0xaf   :  { %v1225_v7 = vrot.slane %v1224_v54, 1  ;;  %v1258_v34 = vrot.slane %v1257_v26, 2  ;;  %v1264_v36 = vmax.f32 %v1262_v17, %v1263_v8  ;;  %v1271_v9 = vmax.f32 %v1269_v19, %v1270_v3 }
  0xb0   :  { %v6718_v39 = vld [vmem:[#allocation2 + $0x70] sm:$0xff]  ;;  %v2059_v40 = vld [vmem:[#allocation2 + $0x78] sm:$0x3]  ;;  %v1232_v22 = vrot.slane %v1231_v30, 1  ;;  %v1239_v41 = vrot.slane %v1238_v25, 1  ;;  %v1245_v51 = vmax.f32 %v1243_v24, %v1244_v45  ;;  %v1252_v57 = vmax.f32 %v1250_v0, %v1251_v1 }
  0xb1   :  { %v2138_v60 = vrot.slane %v6718_v39, 1  ;;  %v2139_v27 = vrot.slane %v2059_v40, 1  ;;  %v1226_v5 = vmax.f32 %v1224_v54, %v1225_v7  ;;  %v1259_v52 = vmax.f32 %v1257_v26, %v1258_v34  ;;  %v61_v24 = vld [vmem:[%s8683_s0 + $0x110] sm:$0xff]  ;;  %v62_v0 = vld [vmem:[%s8683_s0 + $0x118] sm:$0xff] }
  0xb2   :  { %v1233_v2 = vmax.f32 %v1231_v30, %v1232_v22  ;;  %v1240_v44 = vmax.f32 %v1238_v25, %v1239_v41  ;;  %v1246_v46 = vrot.slane %v1245_v51, 1  ;;  %v1253_v47 = vrot.slane %v1252_v57, 1  ;;  %v6758_v22 = vld [vmem:[#allocation2 + $0xa8] sm:$0x3] }
  0xb3   :  { %v6722_v48 = vsel %vm2116_vm5, %v2138_v60, %v2139_v27  ;;  %v1260_v53 = vrot.slane %v1259_v52, 1  ;;  %v1265_v56 = vrot.slane %v1264_v36, 2  ;;  %v1272_v11 = vrot.slane %v1271_v9, 2 }
  0xb4   :  { %v6726_v61 = vpack.c.bf16 %v6722_v48, %v6694_v32  ;;  %v1247_v62 = vmax.f32 %v1245_v51, %v1246_v46  ;;  %v1254_v63 = vmax.f32 %v1252_v57, %v1253_v47  ;;  %v1948_v4 = vsel %vm1892_vm1, %v1233_v2, %v1226_v5 }
  0xb5   :  { %v1261_v13 = vmax.f32 %v1259_v52, %v1260_v53  ;;  %v1266_v17 = vmax.f32 %v1264_v36, %v1265_v56  ;;  %v1273_v19 = vmax.f32 %v1271_v9, %v1272_v11  ;;  %v1949_v20 = vsel %vm1894_vm2, %v1240_v44, %v1948_v4 }
  0xb6   :  { %8715 = vst [vmem:[#allocation6_spill] sm:$0xff] %v6726_v61  ;;  %2972 = vmatprep.mubr.bf16.mxu0 %v6726_v61  ;;  %v1950_v54 = vsel %vm1896_vm3, %v1247_v62, %v1949_v20  ;;  %v6746_v26 = vpack.c.bf16 %v6718_v39, %v6665_v42  ;;  %v2201_v8 = vrot.slane %v6685_v58, 2  ;;  %v2203_v3 = vrot.slane %v6718_v39, 2  ;;  %v63_v58 = vld [vmem:[%s8683_s0 + $0x120] sm:$0xff] }
  0xb7   :  { %v1267_v30 = vrot.slane %v1266_v17, 1  ;;  %v1274_v25 = vrot.slane %v1273_v19, 1  ;;  %v1951_v45 = vsel %vm1898_vm4, %v1254_v63, %v1950_v54  ;;  %v2204_v1 = vrot.slane %v2059_v40, 2  ;;  %v65_v40 = vld [vmem:[%s8683_s0 + $0x130] sm:$0xff]  ;;  %v6769_v42 = vld [vmem:[#allocation2] sm:$0xff] }
  0xb8   :  { %8716 = vst [vmem:[#allocation7_spill] sm:$0xff] %v6746_v26  ;;  %v1952_v7 = vsel %vm1900_vm6, %v1261_v13, %v1951_v45  ;;  %2973 = vmatmul.mubr.bf16.gmra.mxu0 %v6746_v26  ;;  %v6756_v34 = vsel %vm2181_vm8, %v2200_v50, %v2201_v8  ;;  %v107_v36 = vmax.f32 %v59_v6, %v61_v24  ;;  %v2141_v50 = vrot.slane %v6769_v42, 1 }
  0xb9   :  { %v108_v9 = vmax.f32 %v60_v23, %v62_v0  ;;  %v1268_v41 = vmax.f32 %v1266_v17, %v1267_v30  ;;  %v1275_v51 = vmax.f32 %v1273_v19, %v1274_v25  ;;  %v6767_v57 = vsel %vm2181_vm8, %v2203_v3, %v2204_v1 }
  0xba   :  { %v6774_v60 = vpack.c.bf16 %v6767_v57, %v6756_v34  ;;  %v427_v27 = vcombine.high %v107_v36, %v107_v36  ;;  %v434_v5 = vrot.slane %v107_v36, %v6196_v38  ;;  %v2142_v46 = vrot.slane %v6758_v22, 1 }
  0xbb   :  { %v444_v52 = vcombine.high %v108_v9, %v108_v9  ;;  %v1953_v2 = vsel %vm1902_vm7, %v1268_v41, %v1952_v7  ;;  %v451_v44 = vrot.slane %v108_v9, %v6196_v38  ;;  %v6780_v47 = vmax.f32 %v63_v58, %v65_v40  ;;  %v5920_v58 = vld [vmem:[%s8682_s1 + $0x1a0] sm:$0xff]  }
  0xbc   :  { %8717 = vst [vmem:[#allocation8_spill] sm:$0xff] %v6774_v60  ;;  %v1954_v53 = vsel %vm1904_vm9, %v1275_v51, %v1953_v2  ;;  %v441_v56 = vrot.slane %v427_v27, %v6196_v38  ;;  %v442_v11 = vcombine.high %v434_v5, %v434_v5  ;;  %v1276_v4 = vsel %vm827_vm0, %v434_v5, -inf  ;;  %5457 = vmatpush3.bf16.msra.mxu1 %v5920_v58 }
  0xbd   :  { %v458_v62 = vrot.slane %v444_v52, %v6196_v38  ;;  %2035 = vst [vmem:[#allocation2 + $0x81] sm:$0xff] %v1954_v53  ;;  %v459_v63 = vcombine.high %v451_v44, %v451_v44  ;;  %v1304_v6 = vsel %vm827_vm0, %v451_v44, -inf  ;;  %v6788_v13 = vsel %vm2116_vm5, %v2141_v50, %v2142_v46  ;;  %v5919_v44 = vld [vmem:[%s8682_s1 + $0x148] sm:$0xff]  }
  0xbe   :  { %v443_v17 = vcombine.high %v441_v56, %v441_v56  ;;  %v1277_v20 = vrot.slane %v1276_v4, 4  ;;  %v1283_v23 = vsel %vm827_vm0, %v442_v11, -inf  ;;  %v1290_v0 = vsel %vm827_vm0, %v441_v56, -inf  ;;  %5398 = vmatprep.subr.bf16.mxu0 %v5919_v44 }
  0xbf   :  { %v460_v19 = vcombine.high %v458_v62, %v458_v62  ;;  %v1284_v24 = vrot.slane %v1283_v23, 4  ;;  %v1305_v54 = vrot.slane %v1304_v6, 4  ;;  %v1311_v8 = vsel %vm827_vm0, %v459_v63, -inf  ;;  %v5921_v63 = vld [vmem:[%s8682_s1 + $0x108] sm:$0xff]  }
  0xc0   :  { %v1278_v3 = vmax.f32 %v1276_v4, %v1277_v20  ;;  %v1291_v30 = vrot.slane %v1290_v0, 4  ;;  %v1297_v25 = vsel %vm827_vm0, %v443_v17, -inf  ;;  %v1312_v45 = vrot.slane %v1311_v8, 4  ;;  %v5922_v4 = vld [vmem:[%s8682_s1 + $0x1d8] sm:$0xff]   ;;  %5399 = vmatpush3.bf16.msra.mxu0 %v5921_v63 }
  0xc1   :  { %v1285_v1 = vmax.f32 %v1283_v23, %v1284_v24  ;;  %v1298_v7 = vrot.slane %v1297_v25, 4  ;;  %v1306_v36 = vmax.f32 %v1304_v6, %v1305_v54  ;;  %v1318_v9 = vsel %vm827_vm0, %v458_v62, -inf  ;;  %v5923_v23 = vld [vmem:[%s8682_s1 + $0x198] sm:$0xff]   ;;  %v5924_v24 = vld [vmem:[%s8682_s1 + $0x1d0] sm:$0xff]   ;;  %5458 = vmatprep.subr.bf16.mxu1 %v5922_v4 }
  0xc2   :  { %v1279_v40 = vrot.slane %v1278_v3, 2  ;;  %v1292_v41 = vmax.f32 %v1290_v0, %v1291_v30  ;;  %v1313_v51 = vmax.f32 %v1311_v8, %v1312_v45  ;;  %v1319_v50 = vrot.slane %v1318_v9, 4  ;;  %5459 = vmatpush3.bf16.msra.mxu1 %v5923_v23 }
  0xc3   :  { %v1286_v27 = vrot.slane %v1285_v1, 2  ;;  %v1299_v5 = vmax.f32 %v1297_v25, %v1298_v7  ;;  %v1307_v52 = vrot.slane %v1306_v36, 2  ;;  %v1325_v2 = vsel %vm827_vm0, %v460_v19, -inf  ;;  %v66_v7 = vld [vmem:[%s8683_s0 + $0x138] sm:$0xff]  ;;  %5460 = vmatprep.subr.bf16.mxu1 %v5924_v24 }
  0xc4   :  { %v2060_v46 = vld [vmem:[#allocation2 + $0x80] sm:$0xff]  ;;  %v1280_v53 = vmax.f32 %v1278_v3, %v1279_v40  ;;  %v1293_v56 = vrot.slane %v1292_v41, 2  ;;  %v1314_v11 = vrot.slane %v1313_v51, 2  ;;  %v1320_v62 = vmax.f32 %v1318_v9, %v1319_v50 }
  0xc5   :  { %v2307_v6 = vpack.c.bf16 %v2060_v46, %v6718_v39  ;;  %v1287_v17 = vmax.f32 %v1285_v1, %v1286_v27  ;;  %v1300_v19 = vrot.slane %v1299_v5, 2  ;;  %v1308_v20 = vmax.f32 %v1306_v36, %v1307_v52  ;;  %v64_v1 = vld [vmem:[%s8683_s0 + $0x128] sm:$0xff] }
  0xc6   :  { %v1281_v0 = vrot.slane %v1280_v53, 1  ;;  %v1294_v54 = vmax.f32 %v1292_v41, %v1293_v56  ;;  %v1315_v8 = vmax.f32 %v1313_v51, %v1314_v11  ;;  %v1321_v3 = vrot.slane %v1320_v62, 2 }
  0xc7   :  { %3069 = vmatprep.mubr.bf16.mxu1 %v2307_v6  ;;  %v1288_v39 = vrot.slane %v1287_v17, 1  ;;  %v1301_v30 = vmax.f32 %v1299_v5, %v1300_v19  ;;  %v1309_v25 = vrot.slane %v1308_v20, 1  ;;  %v1326_v45 = vrot.slane %v1325_v2, 4 }
  0xc8   :  { %3070 = vmatmul.mubr.bf16.gmra.mxu1 %v6774_v60  ;;  %v1282_v36 = vmax.f32 %v1280_v53, %v1281_v0  ;;  %v1295_v9 = vrot.slane %v1294_v54, 1  ;;  %v1316_v58 = vrot.slane %v1315_v8, 1  ;;  %v1322_v40 = vmax.f32 %v1320_v62, %v1321_v3 }
  0xc9   :  { %v1289_v41 = vmax.f32 %v1287_v17, %v1288_v39  ;;  %v1302_v51 = vrot.slane %v1301_v30, 1  ;;  %v1310_v50 = vmax.f32 %v1308_v20, %v1309_v25  ;;  %v1327_v27 = vmax.f32 %v1325_v2, %v1326_v45 }
  0xca   :  { %v1296_v5 = vmax.f32 %v1294_v54, %v1295_v9  ;;  %v1317_v52 = vmax.f32 %v1315_v8, %v1316_v58  ;;  %v1323_v44 = vrot.slane %v1322_v40, 1  ;;  %v110_v46 = vmax.f32 %v64_v1, %v66_v7 }
  0xcb   :  { %v1303_v56 = vmax.f32 %v1301_v30, %v1302_v51  ;;  %v1328_v11 = vrot.slane %v1327_v27, 2  ;;  %v1955_v63 = vsel %vm1892_vm1, %v1289_v41, %v1282_v36  ;;  %v461_v4 = vcombine.high %v6780_v47, %v6780_v47 }
  0xcc   :  { %v1324_v53 = vmax.f32 %v1322_v40, %v1323_v44  ;;  %v1956_v6 = vsel %vm1894_vm2, %v1296_v5, %v1955_v63  ;;  %v468_v62 = vrot.slane %v6780_v47, %v6196_v38  ;;  %v478_v17 = vcombine.high %v110_v46, %v110_v46 }
  0xcd   :  { %v1329_v19 = vmax.f32 %v1327_v27, %v1328_v11  ;;  %v1957_v2 = vsel %vm1896_vm3, %v1303_v56, %v1956_v6  ;;  %v475_v20 = vrot.slane %v461_v4, %v6196_v38  ;;  %v485_v23 = vrot.slane %v110_v46, %v6196_v38 }
  0xce   :  { %v1958_v24 = vsel %vm1898_vm4, %v1310_v50, %v1957_v2  ;;  %v476_v0 = vcombine.high %v468_v62, %v468_v62  ;;  %v492_v54 = vrot.slane %v478_v17, %v6196_v38  ;;  %v1332_v8 = vsel %vm827_vm0, %v468_v62, -inf }
  0xcf   :  { %v1330_v3 = vrot.slane %v1329_v19, 1  ;;  %v1959_v39 = vsel %vm1900_vm6, %v1317_v52, %v1958_v24  ;;  %v477_v30 = vcombine.high %v475_v20, %v475_v20  ;;  %v493_v47 = vcombine.high %v485_v23, %v485_v23 }
  0xd0   :  { %v1960_v25 = vsel %vm1902_vm7, %v1324_v53, %v1959_v39  ;;  %v494_v45 = vcombine.high %v492_v54, %v492_v54  ;;  %v1333_v1 = vrot.slane %v1332_v8, 4  ;;  %v1339_v7 = vsel %vm827_vm0, %v476_v0, -inf }
  0xd1   :  { %v1331_v36 = vmax.f32 %v1329_v19, %v1330_v3  ;;  %v1340_v9 = vrot.slane %v1339_v7, 4  ;;  %v1346_v58 = vsel %vm827_vm0, %v475_v20, -inf  ;;  %v1353_v40 = vsel %vm827_vm0, %v477_v30, -inf }
  0xd2   :  { %v1334_v41 = vmax.f32 %v1332_v8, %v1333_v1  ;;  %v1347_v51 = vrot.slane %v1346_v58, 4  ;;  %v1354_v50 = vrot.slane %v1353_v40, 4  ;;  %v1360_v27 = vsel %vm827_vm0, %v485_v23, -inf }
  0xd3   :  { %v1961_v5 = vsel %vm1904_vm9, %v1331_v36, %v1960_v25  ;;  %v1341_v52 = vmax.f32 %v1339_v7, %v1340_v9  ;;  %v1361_v44 = vrot.slane %v1360_v27, 4  ;;  %v1367_v46 = vsel %vm827_vm0, %v493_v47, -inf }
  0xd4   :  { %2036 = vst [vmem:[#allocation2 + $0xb1] sm:$0xff] %v1961_v5  ;;  %v1335_v56 = vrot.slane %v1334_v41, 2  ;;  %v1348_v11 = vmax.f32 %v1346_v58, %v1347_v51  ;;  %v1355_v63 = vmax.f32 %v1353_v40, %v1354_v50  ;;  %v1368_v4 = vrot.slane %v1367_v46, 4 }
  0xd5   :  { %v1342_v53 = vrot.slane %v1341_v52, 2  ;;  %v1362_v6 = vmax.f32 %v1360_v27, %v1361_v44  ;;  %v1374_v62 = vsel %vm827_vm0, %v492_v54, -inf  ;;  %v1381_v17 = vsel %vm827_vm0, %v494_v45, -inf }
  0xd6   :  { %v1336_v19 = vmax.f32 %v1334_v41, %v1335_v56  ;;  %v1349_v2 = vrot.slane %v1348_v11, 2  ;;  %v1356_v20 = vrot.slane %v1355_v63, 2  ;;  %v1369_v23 = vmax.f32 %v1367_v46, %v1368_v4 }
  0xd7   :  { %v1343_v24 = vmax.f32 %v1341_v52, %v1342_v53  ;;  %v1363_v0 = vrot.slane %v1362_v6, 2  ;;  %v1375_v8 = vrot.slane %v1374_v62, 4  ;;  %v1382_v3 = vrot.slane %v1381_v17, 4 }
  0xd8   :  { %v1337_v39 = vrot.slane %v1336_v19, 1  ;;  %v1350_v30 = vmax.f32 %v1348_v11, %v1349_v2  ;;  %v1357_v47 = vmax.f32 %v1355_v63, %v1356_v20  ;;  %v1370_v25 = vrot.slane %v1369_v23, 2  ;;  %v67_v20 = vld [vmem:[%s8683_s0 + $0x140] sm:$0xff] }
  0xd9   :  { %v1344_v1 = vrot.slane %v1343_v24, 1  ;;  %v1364_v7 = vmax.f32 %v1362_v6, %v1363_v0  ;;  %v1376_v36 = vmax.f32 %v1374_v62, %v1375_v8  ;;  %v1383_v9 = vmax.f32 %v1381_v17, %v1382_v3 }
  0xda   :  { %v1338_v58 = vmax.f32 %v1336_v19, %v1337_v39  ;;  %v1351_v54 = vrot.slane %v1350_v30, 1  ;;  %v1358_v40 = vrot.slane %v1357_v47, 1  ;;  %v1371_v45 = vmax.f32 %v1369_v23, %v1370_v25  ;;  %v69_v23 = vld [vmem:[%s8683_s0 + $0x150] sm:$0xff]  ;;  %v68_v39 = vld [vmem:[%s8683_s0 + $0x148] sm:$0xff] }
  0xdb   :  { %v6844_v41 = vld [vmem:[#allocation2 + $0xb0] sm:$0xff]  ;;  %v2067_v51 = vld [vmem:[#allocation2 + $0xb8] sm:$0x3]  ;;  %v1345_v50 = vmax.f32 %v1343_v24, %v1344_v1  ;;  %v1365_v27 = vrot.slane %v1364_v7, 1  ;;  %v1377_v5 = vrot.slane %v1376_v36, 2  ;;  %v1384_v52 = vrot.slane %v1383_v9, 2 }
  0xdc   :  { %v2144_v44 = vrot.slane %v6844_v41, 1  ;;  %v2145_v46 = vrot.slane %v2067_v51, 1  ;;  %v1352_v56 = vmax.f32 %v1350_v30, %v1351_v54  ;;  %v1359_v11 = vmax.f32 %v1357_v47, %v1358_v40  ;;  %v73_v54 = vld [vmem:[%s8683_s0 + $0x170] sm:$0xff] }
  0xdd   :  { %v1366_v63 = vmax.f32 %v1364_v7, %v1365_v27  ;;  %v1372_v4 = vrot.slane %v1371_v45, 1  ;;  %v1378_v53 = vmax.f32 %v1376_v36, %v1377_v5  ;;  %v1385_v6 = vmax.f32 %v1383_v9, %v1384_v52 }
  0xde   :  { %v6848_v62 = vsel %vm2116_vm5, %v2144_v44, %v2145_v46  ;;  %v1962_v17 = vsel %vm1892_vm1, %v1345_v50, %v1338_v58  ;;  %v2313_v19 = vpack.c.bf16 %v6844_v41, %v6769_v42  ;;  %v2206_v2 = vrot.slane %v6769_v42, 2  ;;  %v70_v42 = vld [vmem:[%s8683_s0 + $0x158] sm:$0xff]  ;;  %v71_v58 = vld [vmem:[%s8683_s0 + $0x160] sm:$0xff] }
  0xdf   :  { %8718 = vst [vmem:[#allocation9_spill] sm:$0xff] %v6848_v62  ;;  %v2314_v24 = vpack.c.bf16 %v6848_v62, %v6788_v13  ;;  %v1373_v0 = vmax.f32 %v1371_v45, %v1372_v4  ;;  %v1379_v8 = vrot.slane %v1378_v53, 1  ;;  %v1386_v3 = vrot.slane %v1385_v6, 1 }
  0xe0   :  { %v1963_v30 = vsel %vm1894_vm2, %v1352_v56, %v1962_v17  ;;  %v2207_v47 = vrot.slane %v6758_v22, 2  ;;  %v2209_v25 = vrot.slane %v6844_v41, 2  ;;  %v2210_v1 = vrot.slane %v2067_v51, 2 }
  0xe1   :  { %2980 = vmatprep.mubr.bf16.mxu0 %v2314_v24  ;;  %v1380_v13 = vmax.f32 %v1378_v53, %v1379_v8  ;;  %v1387_v7 = vmax.f32 %v1385_v6, %v1386_v3  ;;  %v1964_v36 = vsel %vm1896_vm3, %v1359_v11, %v1963_v30  ;;  %v111_v9 = vmax.f32 %v67_v20, %v69_v23 }
  0xe2   :  { %v1965_v40 = vsel %vm1898_vm4, %v1366_v63, %v1964_v36  ;;  %2981 = vmatmul.mubr.bf16.gmra.mxu0 %v2313_v19  ;;  %v6880_v22 = vsel %vm2181_vm8, %v2206_v2, %v2207_v47  ;;  %v6883_v45 = vsel %vm2181_vm8, %v2209_v25, %v2210_v1  ;;  %v112_v51 = vmax.f32 %v68_v39, %v70_v42 }
  0xe3   :  { %8719 = vst [vmem:[#allocation10_spill] sm:$0xff] %v6883_v45  ;;  %v1966_v50 = vsel %vm1900_vm6, %v1373_v0, %v1965_v40  ;;  %v2315_v27 = vpack.c.bf16 %v6883_v45, %v6880_v22  ;;  %v495_v5 = vcombine.high %v111_v9, %v111_v9  ;;  %v502_v52 = vrot.slane %v111_v9, %v6196_v38  ;;  %v5931_v22 = vld [vmem:[%s8682_s1 + $0x180] sm:$0xff]  }
  0xe4   :  { %v1967_v44 = vsel %vm1902_vm7, %v1380_v13, %v1966_v50  ;;  %v512_v46 = vcombine.high %v112_v51, %v112_v51  ;;  %v519_v56 = vrot.slane %v112_v51, %v6196_v38  ;;  %v6891_v11 = vmax.f32 %v71_v58, %v73_v54  ;;  %v5926_v54 = vld [vmem:[%s8682_s1 + $0x190] sm:$0xff]  }
  0xe5   :  { %v1968_v63 = vsel %vm1904_vm9, %v1387_v7, %v1967_v44  ;;  %v509_v4 = vrot.slane %v495_v5, %v6196_v38  ;;  %v510_v53 = vcombine.high %v502_v52, %v502_v52  ;;  %v1388_v6 = vsel %vm827_vm0, %v502_v52, -inf  ;;  %5461 = vmatpush3.bf16.msra.mxu1 %v5926_v54 }
  0xe6   :  { %2037 = vst [vmem:[#allocation2 + $0xc1] sm:$0xff] %v1968_v63  ;;  %v526_v17 = vrot.slane %v512_v46, %v6196_v38  ;;  %v527_v19 = vcombine.high %v519_v56, %v519_v56  ;;  %v1389_v2 = vrot.slane %v1388_v6, 4  ;;  %v1416_v20 = vsel %vm827_vm0, %v519_v56, -inf  ;;  %v5925_v63 = vld [vmem:[%s8682_s1 + $0x140] sm:$0xff]  }
  0xe7   :  { %v511_v23 = vcombine.high %v509_v4, %v509_v4  ;;  %v1395_v24 = vsel %vm827_vm0, %v510_v53, -inf  ;;  %v1402_v0 = vsel %vm827_vm0, %v509_v4, -inf  ;;  %v1417_v8 = vrot.slane %v1416_v20, 4  ;;  %5400 = vmatprep.subr.bf16.mxu0 %v5925_v63 }
  0xe8   :  { %v528_v3 = vcombine.high %v526_v17, %v526_v17  ;;  %v1390_v39 = vmax.f32 %v1388_v6, %v1389_v2  ;;  %v1396_v42 = vrot.slane %v1395_v24, 4  ;;  %v1403_v30 = vrot.slane %v1402_v0, 4  ;;  %v5927_v2 = vld [vmem:[%s8682_s1 + $0x100] sm:$0xff]  }
  0xe9   :  { %v1409_v47 = vsel %vm827_vm0, %v511_v23, -inf  ;;  %v1418_v25 = vmax.f32 %v1416_v20, %v1417_v8  ;;  %v1423_v1 = vsel %vm827_vm0, %v527_v19, -inf  ;;  %v1430_v13 = vsel %vm827_vm0, %v526_v17, -inf  ;;  %v5928_v8 = vld [vmem:[%s8682_s1 + $0x1c8] sm:$0xff]   ;;  %5401 = vmatpush3.bf16.msra.mxu0 %v5927_v2 }
  0xea   :  { %v1391_v7 = vrot.slane %v1390_v39, 2  ;;  %v1397_v36 = vmax.f32 %v1395_v24, %v1396_v42  ;;  %v1404_v9 = vmax.f32 %v1402_v0, %v1403_v30  ;;  %v1410_v58 = vrot.slane %v1409_v47, 4  ;;  %5462 = vmatprep.subr.bf16.mxu1 %v5928_v8 }
  0xeb   :  { %v1419_v40 = vrot.slane %v1418_v25, 2  ;;  %v1424_v51 = vrot.slane %v1423_v1, 4  ;;  %v1431_v50 = vrot.slane %v1430_v13, 4  ;;  %v1437_v5 = vsel %vm827_vm0, %v528_v3, -inf  ;;  %v5929_v3 = vld [vmem:[%s8682_s1 + $0x188] sm:$0xff]  }
  0xec   :  { %v1392_v52 = vmax.f32 %v1390_v39, %v1391_v7  ;;  %v1398_v44 = vrot.slane %v1397_v36, 2  ;;  %v1405_v46 = vrot.slane %v1404_v9, 2  ;;  %v1411_v56 = vmax.f32 %v1409_v47, %v1410_v58  ;;  %5463 = vmatpush3.bf16.msra.mxu1 %v5929_v3 }
  0xed   :  { %v6910_v4 = vld [vmem:[#allocation2 + $0xc0] sm:$0xff]  ;;  %v1420_v53 = vmax.f32 %v1418_v25, %v1419_v40  ;;  %v1425_v6 = vmax.f32 %v1423_v1, %v1424_v51  ;;  %v1432_v17 = vmax.f32 %v1430_v13, %v1431_v50  ;;  %v1438_v19 = vrot.slane %v1437_v5, 4  ;;  %v5932_v25 = vld [vmem:[%s8682_s1 + $0x238] sm:$0xff]   ;;  %v72_v50 = vld [vmem:[%s8683_s0 + $0x168] sm:$0xff] }
  0xee   :  { %v2316_v20 = vpack.c.bf16 %v6910_v4, %v6844_v41  ;;  %v1393_v23 = vrot.slane %v1392_v52, 1  ;;  %v1399_v24 = vmax.f32 %v1397_v36, %v1398_v44  ;;  %v1406_v0 = vmax.f32 %v1404_v9, %v1405_v46  ;;  %v5930_v41 = vld [vmem:[%s8682_s1 + $0x1c0] sm:$0xff]   ;;  %v6929_v9 = vld [vmem:[#allocation2 + $0xc8] sm:$0x3]  ;;  %5802 = vmatprep.subr.bf16.mxu0 %v5932_v25 }
  0xef   :  { %v1412_v39 = vrot.slane %v1411_v56, 2  ;;  %v1421_v42 = vrot.slane %v1420_v53, 1  ;;  %v1426_v30 = vrot.slane %v1425_v6, 2  ;;  %v1433_v47 = vrot.slane %v1432_v17, 2  ;;  %5464 = vmatprep.subr.bf16.mxu1 %v5930_v41 }
  0xf0   :  { %3077 = vmatprep.mubr.bf16.mxu1 %v2316_v20  ;;  %v1394_v1 = vmax.f32 %v1392_v52, %v1393_v23  ;;  %v1400_v13 = vrot.slane %v1399_v24, 1  ;;  %v1407_v7 = vrot.slane %v1406_v0, 1  ;;  %v1439_v36 = vmax.f32 %v1437_v5, %v1438_v19  ;;  %v74_v52 = vld [vmem:[%s8683_s0 + $0x178] sm:$0xff]  ;;  %5465 = vmatpush3.bf16.msra.mxu1 %v5931_v22 }
  0xf1   :  { %3078 = vmatmul.mubr.bf16.gmra.mxu1 %v2315_v27  ;;  %v1413_v58 = vmax.f32 %v1411_v56, %v1412_v39  ;;  %v1422_v54 = vmax.f32 %v1420_v53, %v1421_v42  ;;  %v1427_v40 = vmax.f32 %v1425_v6, %v1426_v30  ;;  %v1434_v51 = vmax.f32 %v1432_v17, %v1433_v47 }
  0xf2   :  { %v1401_v5 = vmax.f32 %v1399_v24, %v1400_v13  ;;  %v1408_v44 = vmax.f32 %v1406_v0, %v1407_v7  ;;  %v1440_v46 = vrot.slane %v1439_v36, 2  ;;  %v2147_v63 = vrot.slane %v6910_v4, 1 }
  0xf3   :  { %v1414_v27 = vrot.slane %v1413_v58, 1  ;;  %v1428_v56 = vrot.slane %v1427_v40, 1  ;;  %v1435_v53 = vrot.slane %v1434_v51, 1  ;;  %v2148_v6 = vrot.slane %v6929_v9, 1 }
  0xf4   :  { %v1441_v17 = vmax.f32 %v1439_v36, %v1440_v46  ;;  %v1969_v19 = vsel %vm1892_vm1, %v1401_v5, %v1394_v1  ;;  %v114_v2 = vmax.f32 %v72_v50, %v74_v52  ;;  %v529_v20 = vcombine.high %v6891_v11, %v6891_v11 }
  0xf5   :  { %v1415_v23 = vmax.f32 %v1413_v58, %v1414_v27  ;;  %v1429_v24 = vmax.f32 %v1427_v40, %v1428_v56  ;;  %v1436_v0 = vmax.f32 %v1434_v51, %v1435_v53  ;;  %v1970_v8 = vsel %vm1894_vm2, %v1408_v44, %v1969_v19 }
  0xf6   :  { %v1442_v3 = vrot.slane %v1441_v17, 1  ;;  %v6950_v39 = vsel %vm2116_vm5, %v2147_v63, %v2148_v6  ;;  %v536_v42 = vrot.slane %v6891_v11, %v6196_v38  ;;  %v543_v30 = vrot.slane %v529_v20, %v6196_v38 }
  0xf7   :  { %8720 = vst [vmem:[#allocation11_spill] sm:$0xff] %v6950_v39  ;;  %v1971_v47 = vsel %vm1896_vm3, %v1415_v23, %v1970_v8  ;;  %v546_v41 = vcombine.high %v114_v2, %v114_v2  ;;  %v553_v25 = vrot.slane %v114_v2, %v6196_v38  ;;  %v2212_v1 = vrot.slane %v6910_v4, 2 }
  0xf8   :  { %v1443_v13 = vmax.f32 %v1441_v17, %v1442_v3  ;;  %v1972_v7 = vsel %vm1898_vm4, %v1422_v54, %v1971_v47  ;;  %v544_v36 = vcombine.high %v536_v42, %v536_v42  ;;  %v545_v58 = vcombine.high %v543_v30, %v543_v30 }
  0xf9   :  { %v1973_v40 = vsel %vm1900_vm6, %v1429_v24, %v1972_v7  ;;  %v560_v51 = vrot.slane %v546_v41, %v6196_v38  ;;  %v561_v11 = vcombine.high %v553_v25, %v553_v25  ;;  %v1444_v50 = vsel %vm827_vm0, %v536_v42, -inf }
  0xfa   :  { %v1974_v52 = vsel %vm1902_vm7, %v1436_v0, %v1973_v40  ;;  %v1445_v5 = vrot.slane %v1444_v50, 4  ;;  %v1451_v44 = vsel %vm827_vm0, %v544_v36, -inf  ;;  %v1458_v46 = vsel %vm827_vm0, %v543_v30, -inf }
  0xfb   :  { %v1975_v63 = vsel %vm1904_vm9, %v1443_v13, %v1974_v52  ;;  %v562_v22 = vcombine.high %v560_v51, %v560_v51  ;;  %v1452_v54 = vrot.slane %v1451_v44, 4  ;;  %v1459_v27 = vrot.slane %v1458_v46, 4 }
  0xfc   :  { %2038 = vst [vmem:[#allocation2 + $0xd1] sm:$0xff] %v1975_v63  ;;  %v1446_v56 = vmax.f32 %v1444_v50, %v1445_v5  ;;  %v1465_v53 = vsel %vm827_vm0, %v545_v58, -inf  ;;  %v1472_v6 = vsel %vm827_vm0, %v553_v25, -inf  ;;  %v1479_v17 = vsel %vm827_vm0, %v561_v11, -inf }
  0xfd   :  { %v1453_v19 = vmax.f32 %v1451_v44, %v1452_v54  ;;  %v1460_v2 = vmax.f32 %v1458_v46, %v1459_v27  ;;  %v1466_v20 = vrot.slane %v1465_v53, 4  ;;  %v1473_v23 = vrot.slane %v1472_v6, 4 }
  0xfe   :  { %v1447_v24 = vrot.slane %v1446_v56, 2  ;;  %v1480_v0 = vrot.slane %v1479_v17, 4  ;;  %v1486_v8 = vsel %vm827_vm0, %v560_v51, -inf  ;;  %v1493_v3 = vsel %vm827_vm0, %v562_v22, -inf }
  0xff   :  { %v1454_v42 = vrot.slane %v1453_v19, 2  ;;  %v1461_v30 = vrot.slane %v1460_v2, 2  ;;  %v1467_v47 = vmax.f32 %v1465_v53, %v1466_v20  ;;  %v1474_v41 = vmax.f32 %v1472_v6, %v1473_v23 }
 0x100   :  { %v1448_v13 = vmax.f32 %v1446_v56, %v1447_v24  ;;  %v1481_v7 = vmax.f32 %v1479_v17, %v1480_v0  ;;  %v1487_v36 = vrot.slane %v1486_v8, 4  ;;  %v1494_v25 = vrot.slane %v1493_v3, 4 }
 0x101   :  { %v1455_v58 = vmax.f32 %v1453_v19, %v1454_v42  ;;  %v1462_v40 = vmax.f32 %v1460_v2, %v1461_v30  ;;  %v1468_v11 = vrot.slane %v1467_v47, 2  ;;  %v1475_v50 = vrot.slane %v1474_v41, 2 }
 0x102   :  { %v1449_v52 = vrot.slane %v1448_v13, 1  ;;  %v1482_v5 = vrot.slane %v1481_v7, 2  ;;  %v1488_v44 = vmax.f32 %v1486_v8, %v1487_v36  ;;  %v1495_v46 = vmax.f32 %v1493_v3, %v1494_v25 }
 0x103   :  { %v6971_v63 = vld [vmem:[#allocation2 + $0xd0] sm:$0xff]  ;;  %v2071_v51 = vld [vmem:[#allocation2 + $0xd8] sm:$0x3]  ;;  %v1456_v22 = vrot.slane %v1455_v58, 1  ;;  %v1463_v54 = vrot.slane %v1462_v40, 1  ;;  %v1469_v27 = vmax.f32 %v1467_v47, %v1468_v11  ;;  %v1476_v53 = vmax.f32 %v1474_v41, %v1475_v50  ;;  %v76_v11 = vld [vmem:[%s8683_s0 + $0x188] sm:$0xff] }
 0x104   :  { %v2150_v56 = vrot.slane %v6971_v63, 1  ;;  %v2151_v6 = vrot.slane %v2071_v51, 1  ;;  %v1450_v17 = vmax.f32 %v1448_v13, %v1449_v52  ;;  %v1483_v20 = vmax.f32 %v1481_v7, %v1482_v5  ;;  %v75_v13 = vld [vmem:[%s8683_s0 + $0x180] sm:$0xff]  ;;  %v77_v50 = vld [vmem:[%s8683_s0 + $0x190] sm:$0xff]  ;;  %v78_v52 = vld [vmem:[%s8683_s0 + $0x198] sm:$0xff] }
 0x105   :  { %v1457_v19 = vmax.f32 %v1455_v58, %v1456_v22  ;;  %v1464_v2 = vmax.f32 %v1462_v40, %v1463_v54  ;;  %v1470_v23 = vrot.slane %v1469_v27, 1  ;;  %v1477_v24 = vrot.slane %v1476_v53, 1  ;;  %v79_v54 = vld [vmem:[%s8683_s0 + $0x1a0] sm:$0xff] }
 0x106   :  { %v6975_v0 = vsel %vm2116_vm5, %v2150_v56, %v2151_v6  ;;  %v1484_v8 = vrot.slane %v1483_v20, 1  ;;  %v1489_v3 = vrot.slane %v1488_v44, 2  ;;  %v1496_v42 = vrot.slane %v1495_v46, 2 }
 0x107   :  { %8721 = vst [vmem:[#allocation12_spill] sm:$0xff] %v6975_v0  ;;  %v6979_v30 = vpack.c.bf16 %v6975_v0, %v6950_v39  ;;  %v1471_v47 = vmax.f32 %v1469_v27, %v1470_v23  ;;  %v1478_v41 = vmax.f32 %v1476_v53, %v1477_v24  ;;  %v1976_v36 = vsel %vm1892_vm1, %v1457_v19, %v1450_v17  ;;  %v81_v27 = vld [vmem:[%s8683_s0 + $0x1b0] sm:$0xff]  ;;  %v80_v23 = vld [vmem:[%s8683_s0 + $0x1a8] sm:$0xff]  ;;  %v82_v24 = vld [vmem:[%s8683_s0 + $0x1b8] sm:$0xff] }
 0x108   :  { %v1485_v7 = vmax.f32 %v1483_v20, %v1484_v8  ;;  %v1490_v25 = vmax.f32 %v1488_v44, %v1489_v3  ;;  %v1497_v58 = vmax.f32 %v1495_v46, %v1496_v42  ;;  %v1977_v40 = vsel %vm1894_vm2, %v1464_v2, %v1976_v36 }
 0x109   :  { %8722 = vst [vmem:[#allocation13_spill] sm:$0xff] %v6979_v30  ;;  %2988 = vmatprep.mubr.bf16.mxu0 %v6979_v30  ;;  %v1978_v5 = vsel %vm1896_vm3, %v1471_v47, %v1977_v40  ;;  %v6999_v44 = vpack.c.bf16 %v6971_v63, %v6910_v4  ;;  %v2213_v46 = vrot.slane %v6929_v9, 2  ;;  %v2215_v22 = vrot.slane %v6971_v63, 2 }
 0x10a   :  { %v1491_v53 = vrot.slane %v1490_v25, 1  ;;  %v1498_v56 = vrot.slane %v1497_v58, 1  ;;  %v1979_v6 = vsel %vm1898_vm4, %v1478_v41, %v1978_v5  ;;  %v2216_v17 = vrot.slane %v2071_v51, 2 }
 0x10b   :  { %8723 = vst [vmem:[#allocation14_spill] sm:$0xff] %v6999_v44  ;;  %v1980_v20 = vsel %vm1900_vm6, %v1485_v7, %v1979_v6  ;;  %2989 = vmatmul.mubr.bf16.gmra.mxu0 %v6999_v44  ;;  %v7015_v9 = vsel %vm2181_vm8, %v2212_v1, %v2213_v46  ;;  %v115_v19 = vmax.f32 %v75_v13, %v77_v50 }
 0x10c   :  { %8724 = vst [vmem:[#allocation15_spill] sm:$0xff] %v7015_v9  ;;  %v116_v2 = vmax.f32 %v76_v11, %v78_v52  ;;  %v1492_v51 = vmax.f32 %v1490_v25, %v1491_v53  ;;  %v1499_v8 = vmax.f32 %v1497_v58, %v1498_v56  ;;  %v7024_v3 = vsel %vm2181_vm8, %v2215_v22, %v2216_v17 }
 0x10d   :  { %8725 = vst [vmem:[#allocation16_spill] sm:$0xff] %v7024_v3  ;;  %v7026_v42 = vmax.f32 %v79_v54, %v81_v27  ;;  %v7030_v4 = vpack.c.bf16 %v7024_v3, %v7015_v9  ;;  %v563_v1 = vcombine.high %v115_v19, %v115_v19  ;;  %v570_v47 = vrot.slane %v115_v19, %v6196_v38 }
 0x10e   :  { %v580_v41 = vcombine.high %v116_v2, %v116_v2  ;;  %v1981_v36 = vsel %vm1902_vm7, %v1492_v51, %v1980_v20  ;;  %v587_v13 = vrot.slane %v116_v2, %v6196_v38  ;;  %v7035_v7 = vmax.f32 %v80_v23, %v82_v24 }
 0x10f   :  { %8726 = vst [vmem:[#allocation17_spill] sm:$0xff] %v7030_v4  ;;  %v1982_v58 = vsel %vm1904_vm9, %v1499_v8, %v1981_v36  ;;  %v577_v40 = vrot.slane %v563_v1, %v6196_v38  ;;  %v578_v11 = vcombine.high %v570_v47, %v570_v47  ;;  %v1500_v5 = vsel %vm827_vm0, %v570_v47, -inf }
 0x110   :  { %v594_v50 = vrot.slane %v580_v41, %v6196_v38  ;;  %2039 = vst [vmem:[#allocation2 + $0xe1] sm:$0xff] %v1982_v58  ;;  %v595_v52 = vcombine.high %v587_v13, %v587_v13  ;;  %v1528_v46 = vsel %vm827_vm0, %v587_v13, -inf  ;;  %v7046_v22 = vrot.slane %v7026_v42, %v6196_v38 }
 0x111   :  { %v579_v54 = vcombine.high %v577_v40, %v577_v40  ;;  %v1501_v53 = vrot.slane %v1500_v5, 4  ;;  %v1507_v56 = vsel %vm827_vm0, %v578_v11, -inf  ;;  %v1514_v17 = vsel %vm827_vm0, %v577_v40, -inf }
 0x112   :  { %v596_v27 = vcombine.high %v594_v50, %v594_v50  ;;  %v1508_v6 = vrot.slane %v1507_v56, 4  ;;  %v1529_v20 = vrot.slane %v1528_v46, 4  ;;  %v1535_v19 = vsel %vm827_vm0, %v595_v52, -inf }
 0x113   :  { %v1502_v2 = vmax.f32 %v1500_v5, %v1501_v53  ;;  %v1515_v23 = vrot.slane %v1514_v17, 4  ;;  %v1521_v24 = vsel %vm827_vm0, %v579_v54, -inf  ;;  %v1536_v51 = vrot.slane %v1535_v19, 4 }
 0x114   :  { %v1509_v8 = vmax.f32 %v1507_v56, %v1508_v6  ;;  %v1522_v1 = vrot.slane %v1521_v24, 4  ;;  %v1530_v47 = vmax.f32 %v1528_v46, %v1529_v20  ;;  %v1542_v41 = vsel %vm827_vm0, %v594_v50, -inf }
 0x115   :  { %v1503_v36 = vrot.slane %v1502_v2, 2  ;;  %v1516_v13 = vmax.f32 %v1514_v17, %v1515_v23  ;;  %v1537_v58 = vmax.f32 %v1535_v19, %v1536_v51  ;;  %v1543_v11 = vrot.slane %v1542_v41, 4 }
 0x116   :  { %v1510_v37 = vrot.slane %v1509_v8, 2  ;;  %v1523_v25 = vmax.f32 %v1521_v24, %v1522_v1  ;;  %v1531_v40 = vrot.slane %v1530_v47, 2  ;;  %v1549_v60 = vsel %vm827_vm0, %v596_v27, -inf }
 0x117   :  { %v7054_v52 = vld [vmem:[#allocation2 + $0xe0] sm:$0xff]  ;;  %v1504_v5 = vmax.f32 %v1502_v2, %v1503_v36  ;;  %v1517_v53 = vrot.slane %v1516_v13, 2  ;;  %v1538_v54 = vrot.slane %v1537_v58, 2  ;;  %v1544_v35 = vmax.f32 %v1542_v41, %v1543_v11  ;;  %v7059_v10 = vld [vmem:[#allocation2 + $0xe8] sm:$0x3] }
 0x118   :  { %v2322_v46 = vpack.c.bf16 %v7054_v52, %v6971_v63  ;;  %v1511_v56 = vmax.f32 %v1509_v8, %v1510_v37  ;;  %v1524_v50 = vrot.slane %v1523_v25, 2  ;;  %v1532_v6 = vmax.f32 %v1530_v47, %v1531_v40 }
 0x119   :  { %v1505_v17 = vrot.slane %v1504_v5, 1  ;;  %v1518_v20 = vmax.f32 %v1516_v13, %v1517_v53  ;;  %v1539_v19 = vmax.f32 %v1537_v58, %v1538_v54  ;;  %v1545_v23 = vrot.slane %v1544_v35, 2 }
 0x11a   :  { %3085 = vmatprep.mubr.bf16.mxu1 %v2322_v46  ;;  %v1512_v24 = vrot.slane %v1511_v56, 1  ;;  %v1525_v51 = vmax.f32 %v1523_v25, %v1524_v50  ;;  %v1533_v27 = vrot.slane %v1532_v6, 1  ;;  %v1550_v1 = vrot.slane %v1549_v60, 4 }
 0x11b   :  { %3086 = vmatmul.mubr.bf16.gmra.mxu1 %v7030_v4  ;;  %v1506_v2 = vmax.f32 %v1504_v5, %v1505_v17  ;;  %v1519_v36 = vrot.slane %v1518_v20, 1  ;;  %v1540_v41 = vrot.slane %v1539_v19, 1  ;;  %v1546_v11 = vmax.f32 %v1544_v35, %v1545_v23 }
 0x11c   :  { %v1513_v37 = vmax.f32 %v1511_v56, %v1512_v24  ;;  %v1526_v63 = vrot.slane %v1525_v51, 1  ;;  %v1534_v8 = vmax.f32 %v1532_v6, %v1533_v27  ;;  %v1551_v47 = vmax.f32 %v1549_v60, %v1550_v1 }
 0x11d   :  { %v1520_v13 = vmax.f32 %v1518_v20, %v1519_v36  ;;  %v1541_v58 = vmax.f32 %v1539_v19, %v1540_v41  ;;  %v1547_v40 = vrot.slane %v1546_v11, 1  ;;  %v2153_v53 = vrot.slane %v7054_v52, 1 }
 0x11e   :  { %v1527_v25 = vmax.f32 %v1525_v51, %v1526_v63  ;;  %v1552_v54 = vrot.slane %v1551_v47, 2  ;;  %v1983_v46 = vsel %vm1892_vm1, %v1513_v37, %v1506_v2  ;;  %v2154_v5 = vrot.slane %v7059_v10, 1 }
 0x11f   :  { %v1548_v50 = vmax.f32 %v1546_v11, %v1547_v40  ;;  %v1984_v35 = vsel %vm1894_vm2, %v1520_v13, %v1983_v46  ;;  %v8727_v56 = vcombine.high %v7026_v42, %v7026_v42  ;;  %v612_v60 = vcombine.high %v7046_v22, %v7046_v22 }
 0x120   :  { %v1553_v17 = vmax.f32 %v1551_v47, %v1552_v54  ;;  %v1985_v20 = vsel %vm1896_vm3, %v1527_v25, %v1984_v35  ;;  %v7073_v19 = vsel %vm2116_vm5, %v2153_v53, %v2154_v5  ;;  %v614_v23 = vcombine.high %v7035_v7, %v7035_v7 }
 0x121   :  { %v611_v6 = vrot.slane %v8727_v56, %v6196_v38  ;;  %8728 = vst [vmem:[#allocation18_spill] sm:$0xff] %v7073_v19  ;;  %v1986_v24 = vsel %vm1898_vm4, %v1534_v8, %v1985_v20  ;;  %v621_v27 = vrot.slane %v7035_v7, %v6196_v38  ;;  %v1556_v42 = vsel %vm827_vm0, %v7046_v22, -inf }
 0x122   :  { %v1554_v1 = vrot.slane %v1553_v17, 1  ;;  %v1987_v2 = vsel %vm1900_vm6, %v1541_v58, %v1986_v24  ;;  %v628_v36 = vrot.slane %v614_v23, %v6196_v38  ;;  %v1557_v41 = vrot.slane %v1556_v42, 4 }
 0x123   :  { %v613_v51 = vcombine.high %v611_v6, %v611_v6  ;;  %v1988_v11 = vsel %vm1902_vm7, %v1548_v50, %v1987_v2  ;;  %v629_v37 = vcombine.high %v621_v27, %v621_v27  ;;  %v1563_v63 = vsel %vm827_vm0, %v612_v60, -inf }
 0x124   :  { %v1570_v8 = vsel %vm827_vm0, %v611_v6, -inf  ;;  %v1555_v47 = vmax.f32 %v1553_v17, %v1554_v1  ;;  %v630_v13 = vcombine.high %v628_v36, %v628_v36  ;;  %v1558_v40 = vmax.f32 %v1556_v42, %v1557_v41 }
 0x125   :  { %v1564_v7 = vrot.slane %v1563_v63, 4  ;;  %v1571_v53 = vrot.slane %v1570_v8, 4  ;;  %v1577_v22 = vsel %vm827_vm0, %v613_v51, -inf  ;;  %v1584_v25 = vsel %vm827_vm0, %v621_v27, -inf }
 0x126   :  { %v1591_v58 = vsel %vm827_vm0, %v629_v37, -inf  ;;  %v1989_v54 = vsel %vm1904_vm9, %v1555_v47, %v1988_v11  ;;  %v1559_v46 = vrot.slane %v1558_v40, 2  ;;  %v1578_v50 = vrot.slane %v1577_v22, 4 }
 0x127   :  { %v1565_v5 = vmax.f32 %v1563_v63, %v1564_v7  ;;  %2040 = vst [vmem:[#allocation2 + $0xf1] sm:$0xff] %v1989_v54  ;;  %v1572_v35 = vmax.f32 %v1570_v8, %v1571_v53  ;;  %v1585_v56 = vrot.slane %v1584_v25, 4  ;;  %v1592_v6 = vrot.slane %v1591_v58, 4 }
 0x128   :  { %v1598_v60 = vsel %vm827_vm0, %v628_v36, -inf  ;;  %v1560_v17 = vmax.f32 %v1558_v40, %v1559_v46  ;;  %v1579_v23 = vmax.f32 %v1577_v22, %v1578_v50  ;;  %v1605_v1 = vsel %vm827_vm0, %v630_v13, -inf }
 0x129   :  { %v1566_v20 = vrot.slane %v1565_v5, 2  ;;  %v1599_v24 = vrot.slane %v1598_v60, 4  ;;  %v1573_v51 = vrot.slane %v1572_v35, 2  ;;  %v1586_v42 = vmax.f32 %v1584_v25, %v1585_v56 }
 0x12a   :  { %v1593_v27 = vmax.f32 %v1591_v58, %v1592_v6  ;;  %v1561_v2 = vrot.slane %v1560_v17, 1  ;;  %v1580_v11 = vrot.slane %v1579_v23, 2  ;;  %v1606_v7 = vrot.slane %v1605_v1, 4 }
 0x12b   :  { %v1567_v41 = vmax.f32 %v1565_v5, %v1566_v20  ;;  %v1600_v37 = vmax.f32 %v1598_v60, %v1599_v24  ;;  %v1574_v63 = vmax.f32 %v1572_v35, %v1573_v51  ;;  %v1587_v47 = vrot.slane %v1586_v42, 2 }
 0x12c   :  { %v1594_v8 = vrot.slane %v1593_v27, 2  ;;  %v1562_v53 = vmax.f32 %v1560_v17, %v1561_v2  ;;  %v1581_v36 = vmax.f32 %v1579_v23, %v1580_v11  ;;  %v1607_v4 = vmax.f32 %v1605_v1, %v1606_v7 }
 0x12d   :  { %v1568_v54 = vrot.slane %v1567_v41, 1  ;;  %v1601_v40 = vrot.slane %v1600_v37, 2  ;;  %v1575_v46 = vrot.slane %v1574_v63, 1  ;;  %v1588_v22 = vmax.f32 %v1586_v42, %v1587_v47  ;;  %v83_v42 = vld [vmem:[%s8683_s0 + $0x1c0] sm:$0xff]  ;;  %v86_v47 = vld [vmem:[%s8683_s0 + $0x1d8] sm:$0xff] }
 0x12e   :  { %v1595_v50 = vmax.f32 %v1593_v27, %v1594_v8  ;;  %v7093_v25 = vld [vmem:[#allocation2 + $0xf0] sm:$0xff]  ;;  %v2075_v58 = vld [vmem:[#allocation2 + $0xf8] sm:$0x3]  ;;  %v1582_v56 = vrot.slane %v1581_v36, 1  ;;  %v2218_v6 = vrot.slane %v7054_v52, 2  ;;  %v1608_v2 = vrot.slane %v1607_v4, 2 }
 0x12f   :  { %v1569_v13 = vmax.f32 %v1567_v41, %v1568_v54  ;;  %v1602_v5 = vmax.f32 %v1600_v37, %v1601_v40  ;;  %v2156_v35 = vrot.slane %v7093_v25, 1  ;;  %v2157_v60 = vrot.slane %v2075_v58, 1  ;;  %v84_v37 = vld [vmem:[%s8683_s0 + $0x1c8] sm:$0xff]  ;;  %v87_v54 = vld [vmem:[%s8683_s0 + $0x1e0] sm:$0xff] }
 0x130   :  { %v1576_v20 = vmax.f32 %v1574_v63, %v1575_v46  ;;  %v1589_v17 = vrot.slane %v1588_v22, 1  ;;  %v1583_v24 = vmax.f32 %v1581_v36, %v1582_v56  ;;  %v1596_v23 = vrot.slane %v1595_v50, 1  ;;  %v85_v63 = vld [vmem:[%s8683_s0 + $0x1d0] sm:$0xff] }
 0x131   :  { %v1603_v51 = vrot.slane %v1602_v5, 1  ;;  %v7101_v27 = vsel %vm2116_vm5, %v2156_v35, %v2157_v60  ;;  %v1990_v41 = vsel %vm1892_vm1, %v1569_v13, %v1562_v53  ;;  %v7106_v11 = vpack.c.bf16 %v7093_v25, %v7054_v52  ;;  %v89_v36 = vld [vmem:[%s8683_s0 + $0x1f0] sm:$0xff] }
 0x132   :  { %8729 = vst [vmem:[#allocation19_spill] sm:$0xff] %v7101_v27  ;;  %v1590_v1 = vmax.f32 %v1588_v22, %v1589_v17  ;;  %v7119_v8 = vpack.c.bf16 %v7101_v27, %v7073_v19  ;;  %v1597_v7 = vmax.f32 %v1595_v50, %v1596_v23  ;;  %v1609_v52 = vmax.f32 %v1607_v4, %v1608_v2 }
 0x133   :  { %8730 = vst [vmem:[#allocation20_spill] sm:$0xff] %v7106_v11  ;;  %v1604_v53 = vmax.f32 %v1602_v5, %v1603_v51  ;;  %v1991_v40 = vsel %vm1894_vm2, %v1576_v20, %v1990_v41  ;;  %v2219_v46 = vrot.slane %v7059_v10, 2  ;;  %v2221_v22 = vrot.slane %v7093_v25, 2  ;;  %v88_v10 = vld [vmem:[%s8683_s0 + $0x1e8] sm:$0xff] }
 0x134   :  { %8731 = vst [vmem:[#allocation21_spill] sm:$0xff] %v7119_v8  ;;  %v2222_v13 = vrot.slane %v2075_v58, 2  ;;  %2996 = vmatprep.mubr.bf16.mxu0 %v7119_v8  ;;  %v1610_v50 = vrot.slane %v1609_v52, 1  ;;  %v1992_v4 = vsel %vm1896_vm3, %v1583_v24, %v1991_v40  ;;  %v119_v56 = vmax.f32 %v83_v42, %v85_v63  ;;  %v90_v58 = vld [vmem:[%s8683_s0 + $0x1f8] sm:$0xff] }
 0x135   :  { %v120_v5 = vmax.f32 %v84_v37, %v86_v47  ;;  %v1993_v35 = vsel %vm1898_vm4, %v1590_v1, %v1992_v4  ;;  %2997 = vmatmul.mubr.bf16.gmra.mxu0 %v7106_v11  ;;  %v7135_v60 = vsel %vm2181_vm8, %v2218_v6, %v2219_v46  ;;  %v7146_v17 = vmax.f32 %v87_v54, %v89_v36 }
 0x136   :  { %8732 = vst [vmem:[#allocation22_spill] sm:$0xff] %v7135_v60  ;;  %v7138_v20 = vsel %vm2181_vm8, %v2221_v22, %v2222_v13  ;;  %v1611_v24 = vmax.f32 %v1609_v52, %v1610_v50  ;;  %v1994_v23 = vsel %vm1900_vm6, %v1597_v7, %v1993_v35  ;;  %v631_v51 = vcombine.high %v119_v56, %v119_v56 }
 0x137   :  { %8733 = vst [vmem:[#allocation23_spill] sm:$0xff] %v7138_v20  ;;  %v7151_v6 = vpack.c.bf16 %v7138_v20, %v7135_v60  ;;  %v1995_v2 = vsel %vm1902_vm7, %v1604_v53, %v1994_v23  ;;  %v638_v42 = vrot.slane %v119_v56, %v6196_v38  ;;  %v648_v1 = vcombine.high %v120_v5, %v120_v5 }
 0x138   :  { %v655_v41 = vrot.slane %v120_v5, %v6196_v38  ;;  %v1996_v37 = vsel %vm1904_vm9, %v1611_v24, %v1995_v2  ;;  %v645_v63 = vrot.slane %v631_v51, %v6196_v38  ;;  %v7158_v47 = vmax.f32 %v88_v10, %v90_v58 }
 0x139   :  { %8734 = vst [vmem:[#allocation24_spill] sm:$0xff] %v7151_v6  ;;  %2041 = vst [vmem:[#allocation2 + $0x101] sm:$0xff] %v1996_v37  ;;  %v646_v52 = vcombine.high %v638_v42, %v638_v42  ;;  %v662_v54 = vrot.slane %v648_v1, %v6196_v38  ;;  %v1612_v53 = vsel %vm827_vm0, %v638_v42, -inf }
 0x13a   :  { %v663_v36 = vcombine.high %v655_v41, %v655_v41  ;;  %v647_v40 = vcombine.high %v645_v63, %v645_v63  ;;  %v1613_v46 = vrot.slane %v1612_v53, 4  ;;  %v1626_v22 = vsel %vm827_vm0, %v645_v63, -inf }
 0x13b   :  { %v1640_v13 = vsel %vm827_vm0, %v655_v41, -inf  ;;  %v664_v50 = vcombine.high %v662_v54, %v662_v54  ;;  %v1619_v4 = vsel %vm827_vm0, %v646_v52, -inf  ;;  %v1627_v56 = vrot.slane %v1626_v22, 4 }
 0x13c   :  { %v1641_v5 = vrot.slane %v1640_v13, 4  ;;  %v1614_v35 = vmax.f32 %v1612_v53, %v1613_v46  ;;  %v1620_v10 = vrot.slane %v1619_v4, 4  ;;  %v1633_v58 = vsel %vm827_vm0, %v647_v40, -inf }
 0x13d   :  { %v1647_v24 = vsel %vm827_vm0, %v663_v36, -inf  ;;  %v1628_v23 = vmax.f32 %v1626_v22, %v1627_v56  ;;  %v1634_v51 = vrot.slane %v1633_v58, 4  ;;  %v1654_v63 = vsel %vm827_vm0, %v662_v54, -inf  ;;  %v7173_v22 = vpop.f32.mrf.mxu0 }
 0x13e   :  { %v1642_v2 = vmax.f32 %v1640_v13, %v1641_v5  ;;  %v1648_v42 = vrot.slane %v1647_v24, 4  ;;  %v1615_v1 = vrot.slane %v1614_v35, 2  ;;  %v1621_v37 = vmax.f32 %v1619_v4, %v1620_v10  ;;  %v7175_v13 = vpop.f32.mrf.mxu1 }
 0x13f   :  { %v1661_v41 = vsel %vm827_vm0, %v664_v50, -inf  ;;  %v1629_v7 = vrot.slane %v1628_v23, 2  ;;  %v1635_v52 = vmax.f32 %v1633_v58, %v1634_v51  ;;  %v1655_v44 = vrot.slane %v1654_v63, 4 }
 0x140   :  { %v1643_v11 = vrot.slane %v1642_v2, 2  ;;  %v1649_v8 = vmax.f32 %v1647_v24, %v1648_v42  ;;  %v7171_v53 = vld [vmem:[#allocation2 + $0x100] sm:$0xff]  ;;  %v1616_v46 = vmax.f32 %v1614_v35, %v1615_v1  ;;  %v1622_v40 = vrot.slane %v1621_v37, 2  ;;  %v7180_v0 = vld [vmem:[#allocation2 + $0x108] sm:$0x3] }
 0x141   :  { %v1662_v36 = vrot.slane %v1661_v41, 4  ;;  %v2328_v4 = vpack.c.bf16 %v7171_v53, %v7093_v25  ;;  %v1630_v54 = vmax.f32 %v1628_v23, %v1629_v7  ;;  %v1636_v56 = vrot.slane %v1635_v52, 2  ;;  %v7182_v25 = vpop.f32.mrf.mxu0 }
 0x142   :  { %v1644_v50 = vmax.f32 %v1642_v2, %v1643_v11  ;;  %v1617_v5 = vrot.slane %v1616_v46, 1  ;;  %v1623_v10 = vmax.f32 %v1621_v37, %v1622_v40  ;;  %v1650_v58 = vrot.slane %v1649_v8, 2  ;;  %v7184_v11 = vpop.f32.mrf.mxu1 }
 0x143   :  { %v1656_v24 = vmax.f32 %v1654_v63, %v1655_v44  ;;  %3093 = vmatprep.mubr.bf16.mxu1 %v2328_v4  ;;  %v1631_v51 = vrot.slane %v1630_v54, 1  ;;  %v1637_v35 = vmax.f32 %v1635_v52, %v1636_v56  ;;  %v1663_v1 = vmax.f32 %v1661_v41, %v1662_v36 }
 0x144   :  { %v1645_v42 = vrot.slane %v1644_v50, 1  ;;  %3094 = vmatmul.mubr.bf16.gmra.mxu1 %v7151_v6  ;;  %v1618_v27 = vmax.f32 %v1616_v46, %v1617_v5  ;;  %v1624_v30 = vrot.slane %v1623_v10, 1  ;;  %v1651_v20 = vmax.f32 %v1649_v8, %v1650_v58 }
 0x145   :  { %v1657_v19 = vrot.slane %v1656_v24, 2  ;;  %v1632_v7 = vmax.f32 %v1630_v54, %v1631_v51  ;;  %v1638_v23 = vrot.slane %v1637_v35, 1  ;;  %v1664_v2 = vrot.slane %v1663_v1, 2 }
 0x146   :  { %v1646_v44 = vmax.f32 %v1644_v50, %v1645_v42  ;;  %v1625_v37 = vmax.f32 %v1623_v10, %v1624_v30  ;;  %v1652_v63 = vrot.slane %v1651_v20, 1  ;;  %v2159_v41 = vrot.slane %v7171_v53, 1  ;;  %v7195_v50 = vpop.f32.mrf.mxu0 }
 0x147   :  { %v1658_v52 = vmax.f32 %v1656_v24, %v1657_v19  ;;  %v1639_v40 = vmax.f32 %v1637_v35, %v1638_v23  ;;  %v1665_v46 = vmax.f32 %v1663_v1, %v1664_v2  ;;  %v2160_v8 = vrot.slane %v7180_v0, 1  ;;  %v7197_v19 = vpop.f32.mrf.mxu1 }
 0x148   :  { %v672_v36 = vrot.slane %v7146_v17, %v6196_v38  ;;  %v1653_v4 = vmax.f32 %v1651_v20, %v1652_v63  ;;  %v1997_v5 = vsel %vm1892_vm1, %v1625_v37, %v1618_v27  ;;  %v8735_v54 = vcombine.high %v7146_v17, %v7146_v17 }
 0x149   :  { %v1659_v56 = vrot.slane %v1658_v52, 1  ;;  %v1666_v10 = vrot.slane %v1665_v46, 1  ;;  %v1998_v58 = vsel %vm1894_vm2, %v1632_v7, %v1997_v5  ;;  %v7201_v24 = vsel %vm2116_vm5, %v2159_v41, %v2160_v8  ;;  %v7213_v41 = vpop.f32.mrf.mxu0 }
 0x14a   :  { %v679_v30 = vrot.slane %v8735_v54, %v6196_v38  ;;  %v680_v51 = vcombine.high %v672_v36, %v672_v36  ;;  %v1999_v35 = vsel %vm1896_vm3, %v1639_v40, %v1998_v58  ;;  %v682_v42 = vcombine.high %v7158_v47, %v7158_v47  ;;  %v7215_v40 = vpop.f32.mrf.mxu1 }
 0x14b   :  { %v1660_v20 = vmax.f32 %v1658_v52, %v1659_v56  ;;  %v1667_v17 = vmax.f32 %v1665_v46, %v1666_v10  ;;  %v2000_v1 = vsel %vm1898_vm4, %v1646_v44, %v1999_v35  ;;  %v689_v23 = vrot.slane %v7158_v47, %v6196_v38 }
 0x14c   :  { %v681_v27 = vcombine.high %v679_v30, %v679_v30  ;;  %v1668_v2 = vsel %vm827_vm0, %v672_v36, -inf  ;;  %v2001_v7 = vsel %vm1900_vm6, %v1653_v4, %v2000_v1  ;;  %v696_v37 = vrot.slane %v682_v42, %v6196_v38  ;;  %v7223_v1 = vpop.f32.mrf.mxu0 }
 0x14d   :  { %v1669_v63 = vrot.slane %v1668_v2, 4  ;;  %v1675_v52 = vsel %vm827_vm0, %v680_v51, -inf  ;;  %v2002_v46 = vsel %vm1902_vm7, %v1660_v20, %v2001_v7  ;;  %v697_v8 = vcombine.high %v689_v23, %v689_v23 }
 0x14e   :  { %v1676_v44 = vrot.slane %v1675_v52, 4  ;;  %v1682_v56 = vsel %vm827_vm0, %v679_v30, -inf  ;;  %v2003_v47 = vsel %vm1904_vm9, %v1667_v17, %v2002_v46  ;;  %v698_v36 = vcombine.high %v696_v37, %v696_v37  ;;  %v7225_v30 = vpop.f32.mrf.mxu1  ;;  %v7229_v3 = vpop.f32.mrf.mxu0 }
 0x14f   :  { %v1670_v5 = vmax.f32 %v1668_v2, %v1669_v63  ;;  %v1683_v4 = vrot.slane %v1682_v56, 4  ;;  %2042 = vst [vmem:[#allocation2 + $0x111] sm:$0xff] %v2003_v47  ;;  %v1689_v54 = vsel %vm827_vm0, %v681_v27, -inf  ;;  %v1696_v10 = vsel %vm827_vm0, %v689_v23, -inf }
 0x150   :  { %v1677_v38 = vmax.f32 %v1675_v52, %v1676_v44  ;;  %v1703_v58 = vsel %vm827_vm0, %v697_v8, -inf  ;;  %v1690_v20 = vrot.slane %v1689_v54, 4  ;;  %v1697_v42 = vrot.slane %v1696_v10, 4  ;;  %v7231_v39 = vpop.f32.mrf.mxu1  ;;  %v7236_v45 = vpop.f32.mrf.mxu0 }
 0x151   :  { %v1671_v51 = vrot.slane %v1670_v5, 2  ;;  %v1684_v35 = vmax.f32 %v1682_v56, %v1683_v4  ;;  %v1704_v7 = vrot.slane %v1703_v58, 4  ;;  %v1710_v2 = vsel %vm827_vm0, %v696_v37, -inf }
 0x152   :  { %v1678_v17 = vrot.slane %v1677_v38, 2  ;;  %v1717_v63 = vsel %vm827_vm0, %v698_v36, -inf  ;;  %v1691_v46 = vmax.f32 %v1689_v54, %v1690_v20  ;;  %v1698_v23 = vmax.f32 %v1696_v10, %v1697_v42 }
 0x153   :  { %v1672_v52 = vmax.f32 %v1670_v5, %v1671_v51  ;;  %v1685_v27 = vrot.slane %v1684_v35, 2  ;;  %v1705_v8 = vmax.f32 %v1703_v58, %v1704_v7  ;;  %v1711_v47 = vrot.slane %v1710_v2, 4 }
 0x154   :  { %v1679_v44 = vmax.f32 %v1677_v38, %v1678_v17  ;;  %v1718_v56 = vrot.slane %v1717_v63, 4  ;;  %v1692_v26 = vrot.slane %v1691_v46, 2  ;;  %v1699_v60 = vrot.slane %v1698_v23, 2 }
 0x155   :  { %v1673_v4 = vrot.slane %v1672_v52, 1  ;;  %v1686_v6 = vmax.f32 %v1684_v35, %v1685_v27  ;;  %v1706_v37 = vrot.slane %v1705_v8, 2  ;;  %v1712_v61 = vmax.f32 %v1710_v2, %v1711_v47  ;;  %v7238_v2 = vpop.f32.mrf.mxu1 }
 0x156   :  { %v1680_v62 = vrot.slane %v1679_v44, 1  ;;  %v1719_v36 = vmax.f32 %v1717_v63, %v1718_v56  ;;  %v7233_v5 = vld [vmem:[#allocation2 + $0x110] sm:$0xff]  ;;  %v2079_v54 = vld [vmem:[#allocation2 + $0x118] sm:$0x3]  ;;  %v1693_v58 = vmax.f32 %v1691_v46, %v1692_v26  ;;  %v1700_v51 = vmax.f32 %v1698_v23, %v1699_v60 }
 0x157   :  { %v1674_v10 = vmax.f32 %v1672_v52, %v1673_v4  ;;  %v1687_v38 = vrot.slane %v1686_v6, 1  ;;  %v2162_v20 = vrot.slane %v7233_v5, 1  ;;  %v2163_v35 = vrot.slane %v2079_v54, 1 }
 0x158   :  { %v1681_v42 = vmax.f32 %v1679_v44, %v1680_v62  ;;  %v1707_v17 = vmax.f32 %v1705_v8, %v1706_v37  ;;  %v1694_v27 = vrot.slane %v1693_v58, 1  ;;  %v1701_v15 = vrot.slane %v1700_v51, 1 }
 0x159   :  { %v1688_v7 = vmax.f32 %v1686_v6, %v1687_v38  ;;  %v1713_v9 = vrot.slane %v1712_v61, 2  ;;  %v7241_v63 = vsel %vm2116_vm5, %v2162_v20, %v2163_v35  ;;  %v1720_v47 = vrot.slane %v1719_v36, 2  ;;  %v5348_v38 = vpop.f32.mrf.mxu1 }
 0x15a   :  { %v1708_v52 = vrot.slane %v1707_v17, 1  ;;  %v2004_v26 = vsel %vm1892_vm1, %v1681_v42, %v1674_v10  ;;  %v7246_v60 = vpack.c.bf16 %v7241_v63, %v7201_v24  ;;  %v1695_v62 = vmax.f32 %v1693_v58, %v1694_v27  ;;  %v5284_v10 = vpop.f32.mrf.mxu0 }
 0x15b   :  { %v1702_v6 = vmax.f32 %v1700_v51, %v1701_v15  ;;  %v1714_v46 = vmax.f32 %v1712_v61, %v1713_v9  ;;  %v1721_v44 = vmax.f32 %v1719_v36, %v1720_v47  ;;  %v2005_v8 = vsel %vm1894_vm2, %v1688_v7, %v2004_v26 }
 0x15c   :  { %v1709_v23 = vmax.f32 %v1707_v17, %v1708_v52  ;;  %v7251_v56 = vpack.c.bf16 %v7233_v5, %v7171_v53  ;;  %3004 = vmatprep.mubr.bf16.mxu0 %v7246_v60  ;;  %v2006_v37 = vsel %vm1896_vm3, %v1695_v62, %v2005_v8  ;;  %v2291_v9 = vpack.c.bf16 %v6487_v49, %v6398_v33  ;;  %v5286_v35 = vpop.f32.mrf.mxu0  ;;  %v5933_v33 = vld [vmem:[%s8682_s1 + $0x230] sm:$0xff]  }
 0x15d   :  { %v1715_v4 = vrot.slane %v1714_v46, 1  ;;  %v1722_v20 = vrot.slane %v1721_v44, 1  ;;  %v2007_v58 = vsel %vm1898_vm4, %v1702_v6, %v2006_v37  ;;  %v2224_v7 = vrot.slane %v7171_v53, 2 }
 0x15e   :  { %3005 = vmatmul.mubr.bf16.gmra.mxu0 %v7251_v56  ;;  %v2008_v61 = vsel %vm1900_vm6, %v1709_v23, %v2007_v58  ;;  %v5350_v42 = vpop.f32.mrf.mxu1  ;;  %v2225_v27 = vrot.slane %v7180_v0, 2  ;;  %v2227_v52 = vrot.slane %v7233_v5, 2  ;;  %v2228_v47 = vrot.slane %v2079_v54, 2  ;;  %v5287_v49 = vpop.f32.mrf.mxu0 }
 0x15f   :  { %v1716_v15 = vmax.f32 %v1714_v46, %v1715_v4  ;;  %v1723_v36 = vmax.f32 %v1721_v44, %v1722_v20  ;;  %3142 = vmatprep.mubr.bf16.mxu0 %v2291_v9  ;;  %v2297_v26 = vpack.c.bf16 %v6623_v31, %v6512_v18  ;;  %v8736_v6 = vpack.c.bf16 %v6404_v16, %v6390_v29  ;;  %v6017_v18 = vld [vmem:[%s8682_s1 + $0x238] sm:$0xff]   ;;  %v5934_v31 = vld [vmem:[%s8682_s1 + $0x228] sm:$0xff]  }
 0x160   :  { %v5351_v62 = vpop.f32.mrf.mxu1  ;;  %v7274_v53 = vsel %vm2181_vm8, %v2224_v7, %v2225_v27  ;;  %v7277_v0 = vsel %vm2181_vm8, %v2227_v52, %v2228_v47  ;;  %v5276_v29 = vadd.f32 %v7182_v25, %v7173_v22  ;;  %v5340_v16 = vadd.f32 %v7184_v11, %v7175_v13  ;;  %v2061_v44 = vld [vmem:[#allocation2 + $0x88] sm:$0x3]  ;;  %v5289_v4 = vpop.f32.mrf.mxu0  ;;  %v8737_v7 = vld [vmem:[#allocation10_spill] sm:$0xff]  ;;  %v8738_v27 = vld [vmem:[#allocation15_spill] sm:$0xff] }
 0x161   :  { %v2009_v51 = vsel %vm1902_vm7, %v1716_v15, %v2008_v61  ;;  %v5279_v54 = vadd.f32 %v7213_v41, %v7195_v50  ;;  %v5343_v46 = vadd.f32 %v7215_v40, %v7197_v19  ;;  %v2296_v23 = vpack.c.bf16 %v6567_v21, %v6479_v59  ;;  %v7356_v47 = vld [vmem:[#allocation2] sm:$0xff] }
 0x162   :  { %v2010_v17 = vsel %vm1904_vm9, %v1723_v36, %v2009_v51  ;;  %v5282_v8 = vadd.f32 %v7229_v3, %v7223_v1  ;;  %v5353_v37 = vpop.f32.mrf.mxu1  ;;  %v7301_v22 = vpack.c.bf16 %v7277_v0, %v7274_v53  ;;  %v7303_v13 = vadd.f32 %v5340_v16, %v5276_v29  ;;  %v7313_v3 = vld [vmem:[#allocation2 + $0x80] sm:$0xff] }
 0x163   :  { %2043 = vst [vmem:[#allocation2 + $0x121] sm:$0xff] %v2010_v17  ;;  %v7305_v25 = vadd.f32 %v5343_v46, %v5279_v54  ;;  %v5346_v11 = vadd.f32 %v7231_v39, %v7225_v30  ;;  %v2303_v21 = vpack.c.bf16 %v6756_v34, %v6633_v14  ;;  %v2258_v50 = vrot.slane %v7313_v3, 2  ;;  %v5935_v39 = vld [vmem:[%s8682_s1 + $0x220] sm:$0xff]   ;;  %v5290_v14 = vpop.f32.mrf.mxu0  ;;  %v8743_v54 = vld [vmem:[#allocation16_spill] sm:$0xff]  ;;  %v8744_v46 = vld [vmem:[#allocation22_spill] sm:$0xff] }
 0x164   :  { %v2259_v19 = vrot.slane %v2061_v44, 2  ;;  %v5285_v40 = vadd.f32 %v5284_v10, %v7236_v45  ;;  %v5349_v1 = vadd.f32 %v5348_v38, %v7238_v2  ;;  %v5288_v30 = vadd.f32 %v5287_v49, %v5286_v35  ;;  %v5354_v34 = vpop.f32.mrf.mxu1  ;;  %v5936_v38 = vld [vmem:[%s8682_s1 + $0x218] sm:$0xff]   ;;  %v5937_v35 = vld [vmem:[%s8682_s1 + $0x210] sm:$0xff]   ;;  %v5939_v49 = vld [vmem:[%s8682_s1 + $0x200] sm:$0xff]  }
 0x165   :  { %v7316_v41 = vadd.f32 %v5346_v11, %v5282_v8  ;;  %v5291_v15 = vadd.f32 %v5290_v14, %v5289_v4  ;;  %v5355_v2 = vadd.f32 %v5354_v34, %v5353_v37  ;;  %v2302_v61 = vpack.c.bf16 %v6694_v32, %v6596_v55  ;;  %v7348_v32 = vld [vmem:[#allocation2 + $0x98] sm:$0x3] }
 0x166   :  { %3143 = vmatmul.mubr.bf16.vlgmr.msra.gmra.mxu0 %v8736_v6  ;;  %v7325_v58 = vadd.f32 %v5349_v1, %v5285_v40  ;;  %v7328_v45 = vsel %vm2181_vm8, %v2258_v50, %v2259_v19  ;;  %v2250_v36 = vrot.slane %v7313_v3, 1  ;;  %v2251_v51 = vrot.slane %v2061_v44, 1  ;;  %v8745_v44 = vld [vmem:[#allocation7_spill] sm:$0xff] }
 0x167   :  { %5803 = vmatpush3.bf16.msra.mxu0 %v6017_v18  ;;  %3150 = vmatprep.mubr.bf16.mxu0 %v2297_v26  ;;  %v2309_v9 = vpack.c.bf16 %v7328_v45, %v6767_v57  ;;  %v5938_v57 = vld [vmem:[%s8682_s1 + $0x208] sm:$0xff]   ;;  %v2271_v26 = vrot.slane %v7348_v32, 1  ;;  %v8741_v18 = vld [vmem:[#allocation9_spill] sm:$0xff]  ;;  %v2310_v11 = vpack.c.bf16 %v7356_v47, %v7313_v3  ;;  %v8748_v19 = vld [vmem:[#allocation23_spill] sm:$0xff] }
 0x168   :  { %5804 = vmatprep.subr.bf16.mxu0 %v5933_v33  ;;  %v2252_v55 = vsel %vm2116_vm5, %v2250_v36, %v2251_v51  ;;  %v2330_v40 = vpack.c.bf16 %v7274_v53, %v8748_v19  ;;  %v8750_v53 = vld [vmem:[#allocation19_spill] sm:$0xff] }
 0x169   :  { %v2308_v17 = vpack.c.bf16 %v2252_v55, %v6722_v48  ;;  %v8740_v48 = vld [vmem:[#allocation6_spill] sm:$0xff]  ;;  %v2329_v36 = vpack.c.bf16 %v7201_v24, %v8750_v53  ;;  %v8753_v24 = vld [vmem:[#allocation20_spill] sm:$0xff] }
 0x16a   :  { %v7297_v20 = vld [vmem:[#allocation2 + $0x120] sm:$0xff]  ;;  %v2081_v4 = vld [vmem:[#allocation2 + $0x128] sm:$0x3] }
 0x16b   :  { %v2334_v59 = vpack.c.bf16 %v7297_v20, %v7233_v5  ;;  %5805 = vmatpush3.bf16.msra.mxu0 %v5933_v33  ;;  %v5352_v5 = vadd.f32 %v5351_v62, %v5350_v42  ;;  %v8739_v62 = vld [vmem:[#allocation4_spill] sm:$0xff] }
 0x16c   :  { %5806 = vmatprep.subr.bf16.mxu0 %v5934_v31 }
 0x16d   :  { %3101 = vmatprep.mubr.bf16.mxu1 %v2334_v59  ;;  %v7330_v10 = vadd.f32 %v5352_v5, %v5288_v30  ;;  %v8746_v59 = vld [vmem:[#allocation12_spill] sm:$0xff]  ;;  %v2261_v30 = vrot.slane %v7297_v20, 2  ;;  %v2262_v5 = vrot.slane %v2081_v4, 2 }
 0x16e   :  { %3102 = vmatmul.mubr.bf16.gmra.mxu1 %v7301_v22  ;;  %3151 = vmatmul.mubr.bf16.gmra.mxu0 %v2296_v23  ;;  %v2324_v23 = vpack.c.bf16 %v8744_v46, %v8743_v54 }
 0x16f   :  { %3239 = vmatprep.mubr.bf16.mxu1 %v6500_v43  ;;  %3158 = vmatprep.mubr.bf16.mxu0 %v2303_v21  ;;  %v7337_v43 = vadd.f32 %v5355_v2, %v5291_v15  ;;  %v8747_v21 = vld [vmem:[#allocation18_spill] sm:$0xff] }
 0x170   :  { %5807 = vmatpush3.bf16.msra.mxu0 %v5934_v31  ;;  %v8742_v31 = vld [vmem:[#allocation11_spill] sm:$0xff]  ;;  %v2323_v50 = vpack.c.bf16 %v8747_v21, %v8746_v59 }
 0x171   :  { %5808 = vmatprep.subr.bf16.mxu0 %v5935_v39  ;;  %v2317_v29 = vpack.c.bf16 %v8742_v31, %v8741_v18  ;;  %v8756_v31 = vld [vmem:[#allocation8_spill] sm:$0xff] }
 0x174   :  { %5809 = vmatpush3.bf16.msra.mxu0 %v5935_v39 }
 0x175   :  { %5810 = vmatprep.subr.bf16.mxu0 %v5936_v38 }
 0x176   :  { %3240 = vmatmul.mubr.bf16.vlgmr.msra.gmra.mxu1 %v6484_v12  ;;  %3159 = vmatmul.mubr.bf16.gmra.mxu0 %v2302_v61  ;;  %v2318_v12 = vpack.c.bf16 %v8738_v27, %v8737_v7  ;;  %v2263_v61 = vsel %vm2181_vm8, %v2261_v30, %v2262_v5  ;;  %v2083_v27 = vld [vmem:[#allocation2 + $0x138] sm:$0x3] }
 0x177   :  { %3247 = vmatprep.mubr.bf16.mxu1 %v6601_v28  ;;  %3166 = vmatprep.mubr.bf16.mxu0 %v2309_v9  ;;  %v2270_v28 = vrot.slane %v7356_v47, 1 }
 0x178   :  { %5811 = vmatpush3.bf16.msra.mxu0 %v5936_v38  ;;  %v5292_v42 = vpop.f32.mrf.mxu0  ;;  %v8749_v38 = vld [vmem:[#allocation13_spill] sm:$0xff] }
 0x179   :  { %5812 = vmatprep.subr.bf16.mxu0 %v5937_v35  ;;  %v2272_v6 = vsel %vm2116_vm5, %v2270_v28, %v2271_v26 }
 0x17a   :  { %v5293_v52 = vpop.f32.mrf.mxu0  ;;  %v2311_v16 = vpack.c.bf16 %v2272_v6, %v2252_v55  ;;  %v2253_v55 = vrot.slane %v7297_v20, 1 }
 0x17b   :  { %v5294_v33 = vadd.f32 %v5293_v52, %v5292_v42  ;;  %v8751_v42 = vld [vmem:[#allocation14_spill] sm:$0xff]  ;;  %v2274_v52 = vrot.slane %v2083_v27, 1 }
 0x17c   :  { %5813 = vmatpush3.bf16.msra.mxu0 %v5937_v35  ;;  %v5295_v8 = vpop.f32.mrf.mxu0  ;;  %v2336_v35 = vpack.c.bf16 %v2263_v61, %v7277_v0  ;;  %v8754_v0 = vld [vmem:[#allocation3_spill] sm:$0xff] }
 0x17d   :  { %5814 = vmatprep.subr.bf16.mxu0 %v5938_v57  ;;  %v2275_v26 = vsel %vm2116_vm5, %v2270_v28, %v2274_v52  ;;  %v2337_v28 = vpack.c.bf16 %v7356_v47, %v7297_v20 }
 0x17e   :  { %3248 = vmatmul.mubr.bf16.gmra.mxu1 %v8739_v62  ;;  %3167 = vmatmul.mubr.bf16.gmra.mxu0 %v2308_v17  ;;  %v5296_v1 = vpop.f32.mrf.mxu0  ;;  %v8752_v17 = vld [vmem:[#allocation21_spill] sm:$0xff]  ;;  %v2279_v62 = vrot.slane %v7348_v32, 2 }
 0x17f   :  { %3255 = vmatprep.mubr.bf16.mxu1 %v8740_v48  ;;  %3174 = vmatprep.mubr.bf16.mxu0 %v2318_v12  ;;  %v5297_v2 = vadd.f32 %v5296_v1, %v5295_v8  ;;  %v8757_v32 = vld [vmem:[#allocation17_spill] sm:$0xff]  ;;  %v8758_v8 = vld [vmem:[#allocation24_spill] sm:$0xff] }
 0x180   :  { %5815 = vmatpush3.bf16.msra.mxu0 %v5938_v57  ;;  %v2254_v57 = vrot.slane %v2081_v4, 1 }
 0x181   :  { %5816 = vmatprep.subr.bf16.mxu0 %v5939_v49 }
 0x182   :  { %v2255_v7 = vsel %vm2116_vm5, %v2253_v55, %v2254_v57 }
 0x183   :  { %v2335_v12 = vpack.c.bf16 %v2255_v7, %v7241_v63  ;;  %v8755_v63 = vld [vmem:[#allocation5_spill] sm:$0xff] }
 0x184   :  { %5817 = vmatpush3.bf16.msra.mxu0 %v5939_v49  ;;  %v2278_v49 = vrot.slane %v7356_v47, 2 }
 0x186   :  { %3256 = vmatmul.mubr.bf16.gmra.mxu1 %v8745_v44  ;;  %3175 = vmatmul.mubr.bf16.gmra.mxu0 %v2317_v29 }
 0x187   :  { %3263 = vmatprep.mubr.bf16.mxu1 %v2311_v16  ;;  %3182 = vmatprep.mubr.bf16.mxu0 %v2324_v23 }
 0x188   :  { %v5356_v37 = vpop.f32.mrf.mxu1 }
 0x18a   :  { %v5357_v39 = vpop.f32.mrf.mxu1 }
 0x18b   :  { %v5358_v14 = vadd.f32 %v5357_v39, %v5356_v37 }
 0x18c   :  { %v5359_v34 = vpop.f32.mrf.mxu1 }
 0x18d   :  { %v7378_v15 = vadd.f32 %v5358_v14, %v5294_v33  ;;  %v2338_v33 = vpack.c.bf16 %v2275_v26, %v2255_v7 }
 0x18e   :  { %3264 = vmatmul.mubr.bf16.gmra.mxu1 %v2310_v11  ;;  %3183 = vmatmul.mubr.bf16.gmra.mxu0 %v2323_v50  ;;  %v5360_v3 = vpop.f32.mrf.mxu1 }
 0x18f   :  { %3271 = vmatprep.mubr.bf16.mxu1 %v8749_v38  ;;  %3190 = vmatprep.mubr.bf16.mxu0 %v2330_v40  ;;  %v5361_v9 = vadd.f32 %v5360_v3, %v5359_v34 }
 0x191   :  { %v7384_v51 = vadd.f32 %v5361_v9, %v5297_v2 }
 0x196   :  { %3272 = vmatmul.mubr.bf16.gmra.mxu1 %v8751_v42  ;;  %3191 = vmatmul.mubr.bf16.gmra.mxu0 %v2329_v36 }
 0x197   :  { %3279 = vmatprep.mubr.bf16.mxu1 %v8752_v17  ;;  %3198 = vmatprep.mubr.bf16.mxu0 %v2336_v35 }
 0x19e   :  { %3280 = vmatmul.mubr.bf16.gmra.mxu1 %v8753_v24  ;;  %3199 = vmatmul.mubr.bf16.gmra.mxu0 %v2335_v12 }
 0x19f   :  { %3287 = vmatprep.mubr.bf16.mxu1 %v7246_v60  ;;  %5818 = vmatprep.mubr.bf16.mxu0 %v8754_v0  ;;  %v2280_v60 = vsel %vm2181_vm8, %v2278_v49, %v2279_v62 }
 0x1a0   :  { %v2312_v29 = vpack.c.bf16 %v2280_v60, %v7328_v45 }
 0x1a2   :  { %v5298_v48 = vpop.f32.mrf.mxu0 }
 0x1a4   :  { %v5299_v6 = vpop.f32.mrf.mxu0 }
 0x1a5   :  { %v5300_v18 = vadd.f32 %v5299_v6, %v5298_v48 }
 0x1a6   :  { %3288 = vmatmul.mubr.bf16.gmra.mxu1 %v7251_v56  ;;  %5819 = vmatmul.mubr.bf16.vlgmr.msra.gmra.mxu0 %v8755_v63  ;;  %v5301_v16 = vpop.f32.mrf.mxu0  ;;  %v2282_v56 = vrot.slane %v2083_v27, 2 }
 0x1a7   :  { %3295 = vmatprep.mubr.bf16.mxu1 %v2338_v33  ;;  %5822 = vmatprep.mubr.bf16.mxu0 %v8756_v31 }
 0x1a8   :  { %v5302_v23 = vpop.f32.mrf.mxu0  ;;  %v2283_v37 = vsel %vm2181_vm8, %v2278_v49, %v2282_v56 }
 0x1a9   :  { %v5303_v45 = vadd.f32 %v5302_v23, %v5301_v16  ;;  %v2339_v59 = vpack.c.bf16 %v2283_v37, %v2263_v61 }
 0x1ae   :  { %3296 = vmatmul.mubr.bf16.gmra.mxu1 %v2337_v28  ;;  %5823 = vmatmul.mubr.bf16.gmra.mxu0 %v2312_v29 }
 0x1af   :  { %5826 = vmatprep.mubr.bf16.mxu0 %v8757_v32 }
 0x1b1   :  { %v5362_v54 = vpop.f32.mrf.mxu1 }
 0x1b3   :  { %v5363_v46 = vpop.f32.mrf.mxu1 }
 0x1b4   :  { %v5364_v44 = vadd.f32 %v5363_v46, %v5362_v54 }
 0x1b5   :  { %v5365_v4 = vpop.f32.mrf.mxu1 }
 0x1b6   :  { %5827 = vmatmul.mubr.bf16.gmra.mxu0 %v8758_v8  ;;  %v7409_v20 = vadd.f32 %v5364_v44, %v5300_v18 }
 0x1b7   :  { %5830 = vmatprep.mubr.bf16.mxu0 %v7301_v22  ;;  %v5366_v47 = vpop.f32.mrf.mxu1 }
 0x1b8   :  { %v5367_v11 = vadd.f32 %v5366_v47, %v5365_v4  ;;  %v5941_v47 = vld [vmem:[%s8684_s4 + $0x38] sm:$0xff]  }
 0x1ba   :  { %v7411_v21 = vadd.f32 %v5367_v11, %v5303_v45 }
 0x1be   :  { %5831 = vmatmul.mubr.bf16.gmra.mxu0 %v2339_v59 }
 0x1cb   :  { %v5304_v50 = vpop.f32.mrf.mxu0 }
 0x1cd   :  { %v5305_v19 = vpop.f32.mrf.mxu0 }
 0x1ce   :  { %v5306_v40 = vadd.f32 %v5305_v19, %v5304_v50  ;;  %v5942_v50 = vld [vmem:[%s8684_s4 + $0x70] sm:$0xff]  }
 0x1cf   :  { %v5307_v39 = vpop.f32.mrf.mxu0 }
 0x1d1   :  { %v5308_v5 = vpop.f32.mrf.mxu0 }
 0x1d2   :  { %v5309_v2 = vadd.f32 %v5308_v5, %v5307_v39  ;;  %v5943_v39 = vld [vmem:[%s8684_s4 + $0x30] sm:$0xff]  }
 0x1db   :  { %v5368_v1 = vpop.f32.mrf.mxu1 }
 0x1dd   :  { %v5369_v30 = vpop.f32.mrf.mxu1 }
 0x1de   :  { %v5370_v14 = vadd.f32 %v5369_v30, %v5368_v1  ;;  %v5944_v1 = vld [vmem:[%s8684_s4 + $0x68] sm:$0xff]  }
 0x1df   :  { %v5371_v22 = vpop.f32.mrf.mxu1 }
 0x1e0   :  { %v7413_v34 = vadd.f32 %v5370_v14, %v5306_v40  ;;  %v5945_v14 = vld [vmem:[%s8684_s4 + $0x28] sm:$0xff]  }
 0x1e1   :  { %v5372_v38 = vpop.f32.mrf.mxu1 }
 0x1e2   :  { %8759 = vst [vmem:[#allocation10_spill] sm:$0xff] %v7413_v34  ;;  %v5373_v3 = vadd.f32 %v5372_v38, %v5371_v22  ;;  %v5946_v22 = vld [vmem:[%s8684_s4 + $0x60] sm:$0xff]  }
 0x1e4   :  { %v7415_v9 = vadd.f32 %v5373_v3, %v5309_v2  ;;  %v5947_v3 = vld [vmem:[%s8684_s4 + $0x20] sm:$0xff]  }
 0x1e6   :  { %8760 = vst [vmem:[#allocation15_spill] sm:$0xff] %v7415_v9 }
 0x1f5   :  { %v5310_v61 = vpop.f32.mrf.mxu0 }
 0x1f7   :  { %v5311_v53 = vpop.f32.mrf.mxu0 }
 0x1f8   :  { %v5312_v36 = vadd.f32 %v5311_v53, %v5310_v61  ;;  %v5949_v61 = vld [vmem:[%s8684_s4 + $0xf8] sm:$0xff]  }
 0x1f9   :  { %v5313_v35 = vpop.f32.mrf.mxu0  ;;  %v5948_v53 = vld [vmem:[%s8684_s4 + $0x58] sm:$0xff]   ;;  %5594 = vmatprep.subr.bf16.mxu0 %v5949_v61 }
 0x1fa   :  { %v5963_v61 = vld [vmem:[%s8684_s4 + $0x98] sm:$0xff]  }
 0x1fb   :  { %v5314_v42 = vpop.f32.mrf.mxu0 }
 0x1fc   :  { %v5315_v12 = vadd.f32 %v5314_v42, %v5313_v35 }
 0x204   :  { %v5374_v55 = vpop.f32.mrf.mxu1 }
 0x206   :  { %v5375_v57 = vpop.f32.mrf.mxu1 }
 0x207   :  { %v5376_v17 = vadd.f32 %v5375_v57, %v5374_v55  ;;  %v5951_v55 = vld [vmem:[%s8684_s4 + $0xb8] sm:$0xff]   ;;  %v5952_v57 = vld [vmem:[%s8684_s4 + $0xf0] sm:$0xff]  }
 0x208   :  { %v5377_v7 = vpop.f32.mrf.mxu1  ;;  %5595 = vmatpush3.bf16.msra.mxu0 %v5951_v55 }
 0x209   :  { %v7417_v27 = vadd.f32 %v5376_v17, %v5312_v36  ;;  %5596 = vmatprep.subr.bf16.mxu0 %v5952_v57  ;;  %v5964_v57 = vld [vmem:[%s8684_s4 + $0xd0] sm:$0xff]  }
 0x20a   :  { %v5378_v52 = vpop.f32.mrf.mxu1 }
 0x20b   :  { %8761 = vst [vmem:[#allocation4_spill] sm:$0xff] %v7417_v27  ;;  %v5379_v24 = vadd.f32 %v5378_v52, %v5377_v7  ;;  %v5953_v7 = vld [vmem:[%s8684_s4 + $0xb0] sm:$0xff]  }
 0x20c   :  { %5597 = vmatpush3.bf16.msra.mxu0 %v5953_v7  ;;  %v5966_v7 = vld [vmem:[%s8684_s4 + $0x40] sm:$0xff]  }
 0x20d   :  { %v7419_v0 = vadd.f32 %v5379_v24, %v5315_v12  ;;  %v5950_v12 = vld [vmem:[%s8684_s4 + $0x18] sm:$0xff]  }
 0x20f   :  { %8762 = vst [vmem:[#allocation6_spill] sm:$0xff] %v7419_v0 }
 0x21e   :  { %v5316_v26 = vpop.f32.mrf.mxu0 }
 0x220   :  { %v5317_v33 = vpop.f32.mrf.mxu0 }
 0x221   :  { %v5318_v49 = vadd.f32 %v5317_v33, %v5316_v26  ;;  %v5955_v26 = vld [vmem:[%s8684_s4 + $0xe8] sm:$0xff]   ;;  %v5954_v33 = vld [vmem:[%s8684_s4 + $0x50] sm:$0xff]  }
 0x222   :  { %v7421_v62 = vpop.f32.mrf.mxu0  ;;  %5598 = vmatprep.subr.bf16.mxu0 %v5955_v26 }
 0x224   :  { %v7423_v48 = vpop.f32.mrf.mxu0 }
 0x226   :  { %v5402_v6 = vpop.f32.mrf.mxu0 }
 0x228   :  { %v5403_v63 = vpop.f32.mrf.mxu0 }
 0x229   :  { %v5404_v18 = vadd.f32 %v5403_v63, %v5402_v6  ;;  %v5957_v63 = vld [vmem:[%s8684_s4 + $0xa8] sm:$0xff]  }
 0x22a   :  { %v7425_v31 = vpop.f32.mrf.mxu0  ;;  %5599 = vmatpush3.bf16.msra.mxu0 %v5957_v63 }
 0x22b   :  { %v7428_v60 = vadd.f32 %v5404_v18, %v7303_v13  ;;  %v5940_v13 = vld [vmem:[%s8684_s4 + $0x78] sm:$0xff]   ;;  %v5958_v18 = vld [vmem:[%s8684_s4 + $0xe0] sm:$0xff]  }
 0x22c   :  { %v7430_v28 = vpop.f32.mrf.mxu0  ;;  %5530 = vmatprep.subr.bf16.mxu1 %v5940_v13  ;;  %v5960_v13 = vld [vmem:[%s8684_s4 + $0x48] sm:$0xff]   ;;  %5600 = vmatprep.subr.bf16.mxu0 %v5958_v18 }
 0x22d   :  { %5531 = vmatpush3.bf16.msra.mxu1 %v5941_v47 }
 0x22e   :  { %v5380_v29 = vpop.f32.mrf.mxu1  ;;  %v7432_v32 = vpop.f32.mrf.mxu0  ;;  %5532 = vmatprep.subr.bf16.mxu1 %v5942_v50 }
 0x230   :  { %v5381_v16 = vpop.f32.mrf.mxu1  ;;  %v7434_v54 = vpop.f32.mrf.mxu0 }
 0x231   :  { %v5382_v56 = vadd.f32 %v5381_v16, %v5380_v29  ;;  %5533 = vmatpush3.bf16.msra.mxu1 %v5943_v39  ;;  %v5959_v39 = vld [vmem:[%s8684_s4 + $0xa0] sm:$0xff]  }
 0x232   :  { %v7436_v46 = vpop.f32.mrf.mxu1  ;;  %v7438_v23 = vpop.f32.mrf.mxu0  ;;  %5534 = vmatprep.subr.bf16.mxu1 %v5944_v1  ;;  %v5961_v1 = vld [vmem:[%s8684_s4 + $0xd8] sm:$0xff]   ;;  %5601 = vmatpush3.bf16.msra.mxu0 %v5959_v39 }
 0x233   :  { %v7440_v44 = vadd.f32 %v5382_v56, %v5318_v49  ;;  %v5956_v56 = vld [vmem:[%s8684_s4 + $0x10] sm:$0xff]   ;;  %5602 = vmatprep.subr.bf16.mxu0 %v5961_v1 }
 0x234   :  { %v7442_v8 = vpop.f32.mrf.mxu1  ;;  %v7444_v4 = vpop.f32.mrf.mxu0 }
 0x235   :  { %8763 = vst [vmem:[#allocation9_spill] sm:$0xff] %v7440_v44  ;;  %5535 = vmatpush3.bf16.msra.mxu1 %v5945_v14  ;;  %v5970_v44 = vld [vmem:[%s8684_s4 + $0xc0] sm:$0xff]  }
 0x236   :  { %v7449_v37 = vpop.f32.mrf.mxu1  ;;  %v7451_v45 = vpop.f32.mrf.mxu0  ;;  %5536 = vmatprep.subr.bf16.mxu1 %v5946_v22  ;;  %5603 = vmatpush3.bf16.msra.mxu0 %v5963_v61  ;;  %v5972_v61 = vld [vmem:[%s8684_s4 + $0x178] sm:$0xff]  }
 0x237   :  { %5604 = vmatprep.subr.bf16.mxu0 %v5964_v57 }
 0x238   :  { %v7456_v11 = vpop.f32.mrf.mxu1  ;;  %v7458_v59 = vpop.f32.mrf.mxu0 }
 0x239   :  { %5537 = vmatpush3.bf16.msra.mxu1 %v5947_v3  ;;  %v5962_v3 = vld [vmem:[%s8684_s4 + $0x8] sm:$0xff]  }
 0x23a   :  { %v7463_v19 = vpop.f32.mrf.mxu1  ;;  %v7465_v40 = vpop.f32.mrf.mxu0  ;;  %5538 = vmatprep.subr.bf16.mxu1 %v5948_v53 }
 0x23c   :  { %v7473_v30 = vpop.f32.mrf.mxu1  ;;  %v7475_v5 = vpop.f32.mrf.mxu0 }
 0x23d   :  { %5539 = vmatpush3.bf16.msra.mxu1 %v5950_v12 }
 0x23e   :  { %v7483_v2 = vpop.f32.mrf.mxu1  ;;  %v7485_v38 = vpop.f32.mrf.mxu0  ;;  %5540 = vmatprep.subr.bf16.mxu1 %v5954_v33  ;;  %v5968_v33 = vld [vmem:[%s8684_s4] sm:$0xff]  }
 0x240   :  { %v7496_v36 = vpop.f32.mrf.mxu1  ;;  %v7498_v35 = vpop.f32.mrf.mxu0 }
 0x241   :  { %5541 = vmatpush3.bf16.msra.mxu1 %v5956_v56  ;;  %v5965_v56 = vld [vmem:[%s8684_s4 + $0x90] sm:$0xff]  }
 0x242   :  { %v7506_v42 = vpop.f32.mrf.mxu1  ;;  %v7508_v17 = vpop.f32.mrf.mxu0  ;;  %5542 = vmatprep.subr.bf16.mxu1 %v5960_v13  ;;  %v5967_v13 = vld [vmem:[%s8684_s4 + $0xc8] sm:$0xff]   ;;  %5605 = vmatpush3.bf16.msra.mxu0 %v5965_v56 }
 0x243   :  { %5606 = vmatprep.subr.bf16.mxu0 %v5967_v13 }
 0x244   :  { %v7516_v52 = vpop.f32.mrf.mxu1  ;;  %v7518_v24 = vpop.f32.mrf.mxu0 }
 0x245   :  { %5543 = vmatpush3.bf16.msra.mxu1 %v5962_v3  ;;  %v5969_v3 = vld [vmem:[%s8684_s4 + $0x88] sm:$0xff]  }
 0x246   :  { %v7526_v49 = vpop.f32.mrf.mxu1  ;;  %v7528_v6 = vpop.f32.mrf.mxu0  ;;  %5544 = vmatprep.subr.bf16.mxu1 %v5966_v7  ;;  %5607 = vmatpush3.bf16.msra.mxu0 %v5969_v3 }
 0x247   :  { %5608 = vmatprep.subr.bf16.mxu0 %v5970_v44  ;;  %v5407_v44 = vadd.f32 %v7430_v28, %v7425_v31  ;;  %v5471_v31 = vadd.f32 %v7473_v30, %v7463_v19  ;;  %v5419_v19 = vadd.f32 %v7475_v5, %v7465_v40  ;;  %v5425_v40 = vadd.f32 %v7518_v24, %v7508_v17 }
 0x248   :  { %v7536_v29 = vpop.f32.mrf.mxu1  ;;  %v7538_v16 = vpop.f32.mrf.mxu0 }
 0x249   :  { %5545 = vmatpush3.bf16.msra.mxu1 %v5968_v33 }
 0x24a   :  { %v7546_v47 = vpop.f32.mrf.mxu1  ;;  %v7548_v50 = vpop.f32.mrf.mxu0  ;;  %5658 = vmatprep.subr.bf16.mxu1 %v5972_v61 }
 0x24c   :  { %v7556_v14 = vpop.f32.mrf.mxu1  ;;  %v7558_v22 = vpop.f32.mrf.mxu0 }
 0x24e   :  { %v7566_v53 = vpop.f32.mrf.mxu1  ;;  %v7568_v55 = vpop.f32.mrf.mxu0 }
 0x250   :  { %v7576_v12 = vpop.f32.mrf.mxu1  ;;  %v7578_v26 = vpop.f32.mrf.mxu0 }
 0x252   :  { %v7583_v63 = vpop.f32.mrf.mxu1  ;;  %v7585_v18 = vpop.f32.mrf.mxu0 }
 0x254   :  { %v7593_v39 = vpop.f32.mrf.mxu1  ;;  %v7595_v1 = vpop.f32.mrf.mxu0 }
 0x255   :  { %8764 = vst [vmem:[#allocation11_spill] sm:$0xff] %v7595_v1 }
 0x256   :  { %v7603_v7 = vpop.f32.mrf.mxu1  ;;  %v7605_v57 = vpop.f32.mrf.mxu0 }
 0x257   :  { %8765 = vst [vmem:[#allocation16_spill] sm:$0xff] %v7605_v57  ;;  %v5971_v57 = vld [vmem:[%s8684_s4 + $0x80] sm:$0xff]  }
 0x258   :  { %v7610_v0 = vpop.f32.mrf.mxu1  ;;  %v7612_v33 = vpop.f32.mrf.mxu0  ;;  %5609 = vmatpush3.bf16.msra.mxu0 %v5971_v57  ;;  %v5468_v57 = vadd.f32 %v7456_v11, %v7449_v37 }
 0x259   :  { %8766 = vst [vmem:[#allocation22_spill] sm:$0xff] %v7612_v33 }
 0x25a   :  { %v7614_v27 = vpop.f32.mrf.mxu1  ;;  %v7616_v9 = vpop.f32.mrf.mxu0 }
 0x25b   :  { %8767 = vst [vmem:[#allocation7_spill] sm:$0xff] %v7616_v9 }
 0x25c   :  { %v7621_v56 = vpop.f32.mrf.mxu1  ;;  %v7623_v13 = vpop.f32.mrf.mxu0 }
 0x25d   :  { %8768 = vst [vmem:[#allocation12_spill] sm:$0xff] %v7621_v56  ;;  %8769 = vst [vmem:[#allocation18_spill] sm:$0xff] %v7623_v13  ;;  %v5410_v56 = vadd.f32 %v7434_v54, %v7432_v32  ;;  %v5474_v32 = vadd.f32 %v7496_v36, %v7483_v2  ;;  %v5416_v54 = vadd.f32 %v7458_v59, %v7451_v45 }
 0x25e   :  { %v7625_v34 = vpop.f32.mrf.mxu1  ;;  %v7627_v1 = vpop.f32.mrf.mxu0  ;;  %v5422_v45 = vadd.f32 %v7498_v35, %v7485_v38 }
 0x25f   :  { %8770 = vst [vmem:[#allocation23_spill] sm:$0xff] %v7625_v34  ;;  %8771 = vst [vmem:[#allocation13_spill] sm:$0xff] %v7627_v1  ;;  %v3153_v28 = vadd.f32 %v5410_v56, %v7316_v41  ;;  %v3242_v41 = vadd.f32 %v5468_v57, %v7428_v60 }
 0x260   :  { %v7629_v61 = vpop.f32.mrf.mxu1  ;;  %v7631_v33 = vpop.f32.mrf.mxu0 }
 0x261   :  { %8772 = vst [vmem:[#allocation19_spill] sm:$0xff] %v7631_v33  ;;  %v5413_v33 = vadd.f32 %v7444_v4, %v7438_v23  ;;  %v5981_v23 = vld [vmem:[%s8684_s4 + $0x1f8] sm:$0xff]   ;;  %v5477_v4 = vadd.f32 %v7516_v52, %v7506_v42  ;;  %v3250_v2 = vadd.f32 %v5474_v32, %v3153_v28  ;;  %v5480_v42 = vadd.f32 %v7536_v29, %v7526_v49 }
 0x262   :  { %v7633_v9 = vpop.f32.mrf.mxu1  ;;  %v7635_v3 = vpop.f32.mrf.mxu0  ;;  %5722 = vmatprep.subr.bf16.mxu0 %v5981_v23  ;;  %v5321_v52 = vadd.f32 %v7423_v48, %v7421_v62  ;;  %v5431_v48 = vadd.f32 %v7558_v22, %v7548_v50  ;;  %v5489_v32 = vadd.f32 %v7593_v39, %v7583_v63  ;;  %v8775_v23 = vld [vmem:[#allocation11_spill] sm:$0xff] }
 0x263   :  { %8773 = vst [vmem:[#allocation14_spill] sm:$0xff] %v7633_v9  ;;  %8774 = vst [vmem:[#allocation21_spill] sm:$0xff] %v7635_v3  ;;  %v3148_v3 = vadd.f32 %v5407_v44, %v7305_v25  ;;  %v3156_v25 = vadd.f32 %v5413_v33, %v7325_v58  ;;  %v3161_v58 = vadd.f32 %v5416_v54, %v7330_v10 }
 0x264   :  { %v7641_v13 = vpop.f32.mrf.mxu1  ;;  %v7643_v34 = vpop.f32.mrf.mxu0  ;;  %v3164_v33 = vadd.f32 %v5419_v19, %v7337_v43  ;;  %v5428_v10 = vadd.f32 %v7538_v16, %v7528_v6  ;;  %v5483_v43 = vadd.f32 %v7556_v14, %v7546_v47  ;;  %v3172_v44 = vadd.f32 %v5425_v40, %v7384_v51 }
 0x265   :  { %v3245_v56 = vadd.f32 %v5471_v31, %v3148_v3  ;;  %v3253_v38 = vadd.f32 %v5477_v4, %v3156_v25  ;;  %v3169_v3 = vadd.f32 %v5422_v45, %v7378_v15  ;;  %v5486_v15 = vadd.f32 %v7576_v12, %v7566_v53 }
 0x266   :  { %v7649_v1 = vpop.f32.mrf.mxu1  ;;  %v5820_v9 = vpop.f32.mrf.mxu0  ;;  %v3258_v6 = vadd.f32 %v5480_v42, %v3161_v58  ;;  %v3177_v47 = vadd.f32 %v5428_v10, %v7409_v20  ;;  %v5434_v14 = vadd.f32 %v7578_v26, %v7568_v55  ;;  %v5492_v51 = vadd.f32 %v7610_v0, %v7603_v7  ;;  %v8778_v58 = vld [vmem:[#allocation16_spill] sm:$0xff] }
 0x267   :  { %v7681_v5 = vadd.f32 %v5820_v9, %v3250_v2  ;;  %v5385_v20 = vadd.f32 %v7442_v8, %v7436_v46  ;;  %v3180_v63 = vadd.f32 %v5431_v48, %v7411_v21  ;;  %v3266_v55 = vadd.f32 %v5486_v15, %v3169_v3  ;;  %v8777_v2 = vld [vmem:[#allocation12_spill] sm:$0xff]  ;;  %v8783_v48 = vld [vmem:[#allocation7_spill] sm:$0xff] }
 0x268   :  { %v7659_v37 = vpop.f32.mrf.mxu1  ;;  %v3338_v11 = vpop.f32.mrf.mxu0  ;;  %v3261_v26 = vadd.f32 %v5483_v43, %v3164_v33  ;;  %v5437_v25 = vadd.f32 %v8775_v23, %v7585_v18  ;;  %v3269_v46 = vadd.f32 %v5489_v32, %v3172_v44  ;;  %v8779_v18 = vld [vmem:[#allocation22_spill] sm:$0xff]  ;;  %v3274_v40 = vadd.f32 %v5492_v51, %v3177_v47  ;;  %v8785_v47 = vld [vmem:[#allocation4_spill] sm:$0xff] }
 0x269   :  { %v7674_v36 = vadd.f32 %v3338_v11, %v3242_v41  ;;  %v3425_v57 = vmul.f32 %v7681_v5, %v7681_v5  ;;  %v8776_v41 = vld [vmem:[#allocation10_spill] sm:$0xff]  ;;  %v5440_v42 = vadd.f32 %v8779_v18, %v8778_v58 }
 0x26a   :  { %v7672_v59 = vpop.f32.mrf.mxu1  ;;  %v5821_v30 = vpop.f32.mrf.mxu0  ;;  %v3185_v19 = vadd.f32 %v5434_v14, %v8776_v41  ;;  %v5504_v14 = vadd.f32 %v7659_v37, %v7649_v1 }
 0x26b   :  { %v3423_v9 = vmul.f32 %v7674_v36, %v7674_v36  ;;  %v7695_v17 = vadd.f32 %v5821_v30, %v3253_v38  ;;  %v8780_v38 = vld [vmem:[#allocation23_spill] sm:$0xff] }
 0x26c   :  { %v3341_v60 = vpop.f32.mrf.mxu0  ;;  %v7691_v49 = vpop.f32.mrf.mxu1  ;;  %v5498_v33 = vadd.f32 %v7629_v61, %v8780_v38 }
 0x26d   :  { %v7683_v35 = vadd.f32 %v3341_v60, %v3245_v56  ;;  %v3426_v12 = vmul.f32 %v7695_v17, %v7695_v17  ;;  %v5495_v56 = vadd.f32 %v8777_v2, %v7614_v27  ;;  %v8782_v27 = vld [vmem:[#allocation14_spill] sm:$0xff]  ;;  %v5507_v2 = vadd.f32 %v7691_v49, %v7672_v59 }
 0x26e   :  { %v5824_v29 = vpop.f32.mrf.mxu0  ;;  %v7716_v53 = vpop.f32.mrf.mxu1  ;;  %v5501_v15 = vadd.f32 %v7641_v13, %v8782_v27  ;;  %v8787_v13 = vld [vmem:[#allocation19_spill] sm:$0xff] }
 0x26f   :  { %v3401_v24 = vadd.f32 %v7683_v35, %v7674_v36  ;;  %v3424_v62 = vmul.f32 %v7683_v35, %v7683_v35  ;;  %v7734_v30 = vadd.f32 %v5824_v29, %v3266_v55 }
 0x270   :  { %v3354_v16 = vpop.f32.mrf.mxu0  ;;  %v5509_v45 = vpop.f32.mrf.mxu1 }
 0x271   :  { %v3402_v31 = vadd.f32 %v3401_v24, %v7681_v5  ;;  %v3439_v28 = vadd.f32 %v3424_v62, %v3423_v9  ;;  %v7718_v50 = vadd.f32 %v3354_v16, %v3258_v6  ;;  %v3107_v24 = vadd.f32 %v5385_v20, %v5321_v52  ;;  %v8781_v62 = vld [vmem:[#allocation15_spill] sm:$0xff]  ;;  %v8784_v6 = vld [vmem:[#allocation18_spill] sm:$0xff] }
 0x272   :  { %v5825_v22 = vpop.f32.mrf.mxu0  ;;  %v3188_v43 = vadd.f32 %v5437_v25, %v8781_v62  ;;  %v5443_v16 = vadd.f32 %v8784_v6, %v8783_v48  ;;  %v5511_v44 = vpop.f32.mrf.mxu1  ;;  %v3429_v61 = vmul.f32 %v7734_v30, %v7734_v30  ;;  %v3193_v52 = vadd.f32 %v5440_v42, %v8785_v47  ;;  %v8789_v25 = vld [vmem:[#allocation21_spill] sm:$0xff] }
 0x273   :  { %v3440_v54 = vadd.f32 %v3439_v28, %v3425_v57  ;;  %v3403_v11 = vadd.f32 %v3402_v31, %v7695_v17  ;;  %v3427_v0 = vmul.f32 %v7718_v50, %v7718_v50  ;;  %v7744_v3 = vadd.f32 %v5825_v22, %v3269_v46  ;;  %v8786_v22 = vld [vmem:[#allocation13_spill] sm:$0xff] }
 0x274   :  { %v3357_v39 = vpop.f32.mrf.mxu0  ;;  %v5446_v51 = vadd.f32 %v8787_v13, %v8786_v22  ;;  %v3282_v20 = vadd.f32 %v5498_v33, %v3185_v19  ;;  %v5512_v1 = vpop.f32.mrf.mxu1  ;;  %v3290_v18 = vadd.f32 %v5504_v14, %v3193_v52  ;;  %v5510_v42 = vadd.f32 %v5509_v45, %v7716_v53 }
 0x275   :  { %v3404_v4 = vadd.f32 %v3403_v11, %v7718_v50  ;;  %v3441_v7 = vadd.f32 %v3440_v54, %v3426_v12  ;;  %v7736_v8 = vadd.f32 %v3357_v39, %v3261_v26  ;;  %v3277_v12 = vadd.f32 %v5495_v56, %v3180_v63  ;;  %v8788_v39 = vld [vmem:[#allocation6_spill] sm:$0xff]  ;;  %v8790_v56 = vld [vmem:[#allocation9_spill] sm:$0xff] }
 0x276   :  { %v5828_v21 = vpop.f32.mrf.mxu0  ;;  %v3430_v54 = vmul.f32 %v7744_v3, %v7744_v3  ;;  %v3196_v23 = vadd.f32 %v5443_v16, %v8788_v39  ;;  %v3201_v58 = vadd.f32 %v5446_v51, %v8790_v56 }
 0x277   :  { %v3442_v60 = vadd.f32 %v3441_v7, %v3427_v0  ;;  %v3405_v10 = vadd.f32 %v3404_v4, %v7736_v8  ;;  %v3428_v29 = vmul.f32 %v7736_v8, %v7736_v8  ;;  %v5449_v4 = vadd.f32 %v7643_v34, %v8789_v25 }
 0x278   :  { %v3370_v9 = vpop.f32.mrf.mxu0  ;;  %v3285_v0 = vadd.f32 %v5501_v15, %v3188_v43  ;;  %v7772_v37 = vadd.f32 %v5828_v21, %v3282_v20  ;;  %v3293_v43 = vadd.f32 %v5507_v2, %v3196_v23  ;;  %v3298_v27 = vadd.f32 %v5510_v42, %v3201_v58 }
 0x279   :  { %v3406_v57 = vadd.f32 %v3405_v10, %v7734_v30  ;;  %v3443_v31 = vadd.f32 %v3442_v60, %v3428_v29  ;;  %v7757_v28 = vadd.f32 %v3370_v9, %v3274_v40  ;;  %v3204_v33 = vadd.f32 %v5449_v4, %v3107_v24 }
 0x27a   :  { %v5829_v32 = vpop.f32.mrf.mxu0  ;;  %v5513_v10 = vadd.f32 %v5512_v1, %v5511_v44  ;;  %v3433_v29 = vmul.f32 %v7772_v37, %v7772_v37 }
 0x27b   :  { %v3444_v11 = vadd.f32 %v3443_v31, %v3429_v61  ;;  %v3407_v55 = vadd.f32 %v3406_v57, %v7744_v3  ;;  %v3431_v41 = vmul.f32 %v7757_v28, %v7757_v28  ;;  %v7783_v60 = vadd.f32 %v5829_v32, %v3285_v0 }
 0x27c   :  { %v3373_v26 = vpop.f32.mrf.mxu0  ;;  %v3301_v24 = vadd.f32 %v5513_v10, %v3204_v33 }
 0x27d   :  { %v7770_v7 = vadd.f32 %v3373_v26, %v3277_v12  ;;  %v3408_v63 = vadd.f32 %v3407_v55, %v7757_v28  ;;  %v3445_v19 = vadd.f32 %v3444_v11, %v3430_v54  ;;  %v3434_v53 = vmul.f32 %v7783_v60, %v7783_v60 }
 0x27e   :  { %v5832_v46 = vpop.f32.mrf.mxu0 }
 0x27f   :  { %v3432_v34 = vmul.f32 %v7770_v7, %v7770_v7  ;;  %v3446_v21 = vadd.f32 %v3445_v19, %v3431_v41  ;;  %v3409_v40 = vadd.f32 %v3408_v63, %v7770_v7  ;;  %v7794_v16 = vadd.f32 %v5832_v46, %v3298_v27  ;;  %v7858_v27 = vld [vmem:[%s8686_s3] ss:$0 sm:$0xff] }
 0x280   :  { %v3386_v38 = vpop.f32.mrf.mxu0 }
 0x281   :  { %v3410_v59 = vadd.f32 %v3409_v40, %v7772_v37  ;;  %v3447_v49 = vadd.f32 %v3446_v21, %v3432_v34  ;;  %v7789_v9 = vadd.f32 %v3386_v38, %v3290_v18  ;;  %v3437_v14 = vmul.f32 %v7794_v16, %v7794_v16 }
 0x282   :  { %v5833_v62 = vpop.f32.mrf.mxu0 }
 0x283   :  { %v3448_v45 = vadd.f32 %v3447_v49, %v3433_v29  ;;  %v3411_v15 = vadd.f32 %v3410_v59, %v7783_v60  ;;  %v3435_v61 = vmul.f32 %v7789_v9, %v7789_v9  ;;  %v7799_v47 = vadd.f32 %v5833_v62, %v3301_v24  ;;  %v7842_v59 = vld [vmem:[#allocation2 + $0x8] sm:$0x3] }
 0x284   :  { %v3389_v48 = vpop.f32.mrf.mxu0 }
 0x285   :  { %v3390_v6 = vadd.f32 %v3389_v48, %v3293_v43  ;;  %v3412_v44 = vadd.f32 %v3411_v15, %v7789_v9  ;;  %v3449_v57 = vadd.f32 %v3448_v45, %v3434_v53  ;;  %v3438_v51 = vmul.f32 %v7799_v47, %v7799_v47 }
 0x287   :  { %v3436_v31 = vmul.f32 %v3390_v6, %v3390_v6  ;;  %v3450_v32 = vadd.f32 %v3449_v57, %v3435_v61  ;;  %v3413_v52 = vadd.f32 %v3412_v44, %v3390_v6 }
 0x289   :  { %v3414_v22 = vadd.f32 %v3413_v52, %v7794_v16  ;;  %v3451_v13 = vadd.f32 %v3450_v32, %v3436_v31 }
 0x28b   :  { %v3415_v12 = vadd.f32 %v3414_v22, %v7799_v47  ;;  %v3452_v54 = vadd.f32 %v3451_v13, %v3437_v14 }
 0x28d   :  { %v3416_v11 = vrot.slane %v3415_v12, 4  ;;  %v3453_v20 = vadd.f32 %v3452_v54, %v3438_v51 }
 0x28f   :  { %v3417_v55 = vadd.f32 %v3416_v11, %v3415_v12  ;;  %v3454_v26 = vrot.slane %v3453_v20, 4 }
 0x291   :  { %v3418_v39 = vrot.slane %v3417_v55, 2  ;;  %v3455_v23 = vadd.f32 %v3454_v26, %v3453_v20 }
 0x293   :  { %v3419_v25 = vadd.f32 %v3418_v39, %v3417_v55  ;;  %v3456_v4 = vrot.slane %v3455_v23, 2 }
 0x295   :  { %v3420_v0 = vrot.slane %v3419_v25, 1  ;;  %v3457_v1 = vadd.f32 %v3456_v4, %v3455_v23 }
 0x297   :  { %v3421_v63 = vadd.f32 %v3420_v0, %v3419_v25  ;;  %v3458_v41 = vrot.slane %v3457_v1, 1 }
 0x299   :  { %v7807_v19 = vmul.f32 0.0078125, %v3421_v63  ;;  %v3459_v46 = vadd.f32 %v3458_v41, %v3457_v1 }
 0x29b   :  { %v3460_v2 = vmul.f32 0.0078125, %v3459_v46  ;;  %v3461_v56 = vmul.f32 %v7807_v19, %v7807_v19  ;;  %v3477_v58 = vsub.f32 %v3390_v6, %v7807_v19  ;;  %v3464_v34 = vsub.f32 %v7674_v36, %v7807_v19 }
 0x29c   :  { %v3465_v18 = vsub.f32 %v7683_v35, %v7807_v19  ;;  %v3466_v42 = vsub.f32 %v7681_v5, %v7807_v19  ;;  %v3467_v21 = vsub.f32 %v7695_v17, %v7807_v19  ;;  %v3468_v40 = vsub.f32 %v7718_v50, %v7807_v19 }
 0x29d   :  { %v3462_v38 = vsub.f32 %v3460_v2, %v3461_v56  ;;  %v3469_v33 = vsub.f32 %v7736_v8, %v7807_v19  ;;  %v3470_v10 = vsub.f32 %v7734_v30, %v7807_v19  ;;  %v3471_v36 = vsub.f32 %v7744_v3, %v7807_v19 }
 0x29e   :  { %v3472_v35 = vsub.f32 %v7757_v28, %v7807_v19  ;;  %v3473_v5 = vsub.f32 %v7770_v7, %v7807_v19  ;;  %v3474_v17 = vsub.f32 %v7772_v37, %v7807_v19  ;;  %v3475_v50 = vsub.f32 %v7783_v60, %v7807_v19  ;;  %v7847_v37 = vld [vmem:[%s8685_s2] ss:$0 sm:$0xff] }
 0x29f   :  { %v3463_v29 = vmax.f32 %v3462_v38, 0.0  ;;  %v3476_v8 = vsub.f32 %v7789_v9, %v7807_v19  ;;  %v3478_v30 = vsub.f32 %v7794_v16, %v7807_v19  ;;  %v3479_v3 = vsub.f32 %v7799_v47, %v7807_v19  ;;  %v7849_v60 = vld [vmem:[#allocation2] sm:$0xff] }
 0x2a0   :  { %v7852_v49 = vrot.slane %v7849_v60, 1  ;;  %v3649_v9 = vrot.slane %v7842_v59, 1 }
 0x2a1   :  { %v3480_v28 = vadd.f32 1e-05, %v3463_v29 }
 0x2a3   :  { %6012 = vrsqrt.f32 %v3480_v28 }
 0x2b0   :  { %v6013_v7 = vpop.eup %6012 }
 0x2b1   :  { %v3495_v62 = vmul.f32 %v6013_v7, %v3477_v58  ;;  %v3482_v43 = vmul.f32 %v6013_v7, %v3464_v34  ;;  %v3483_v53 = vmul.f32 %v6013_v7, %v3465_v18  ;;  %v3484_v45 = vmul.f32 %v6013_v7, %v3466_v42 }
 0x2b2   :  { %v3485_v15 = vmul.f32 %v6013_v7, %v3467_v21  ;;  %v3486_v48 = vmul.f32 %v6013_v7, %v3468_v40  ;;  %v3487_v24 = vmul.f32 %v6013_v7, %v3469_v33  ;;  %v3488_v6 = vmul.f32 %v6013_v7, %v3470_v10 }
 0x2b3   :  { %v3518_v16 = vmul.f32 %v7847_v37, %v3495_v62  ;;  %v3505_v44 = vmul.f32 %v7847_v37, %v3482_v43  ;;  %v3506_v61 = vmul.f32 %v7847_v37, %v3483_v53  ;;  %v3507_v57 = vmul.f32 %v7847_v37, %v3484_v45 }
 0x2b4   :  { %v3508_v31 = vmul.f32 %v7847_v37, %v3485_v15  ;;  %v3509_v32 = vmul.f32 %v7847_v37, %v3486_v48  ;;  %v3510_v52 = vmul.f32 %v7847_v37, %v3487_v24  ;;  %v3489_v14 = vmul.f32 %v6013_v7, %v3471_v36 }
 0x2b5   :  { %v3541_v22 = vadd.f32 %v7858_v27, %v3518_v16  ;;  %v3528_v13 = vadd.f32 %v7858_v27, %v3505_v44  ;;  %v3529_v51 = vadd.f32 %v7858_v27, %v3506_v61  ;;  %v3530_v12 = vadd.f32 %v7858_v27, %v3507_v57 }
 0x2b6   :  { %v3531_v54 = vadd.f32 %v7858_v27, %v3508_v31  ;;  %v3532_v11 = vadd.f32 %v7858_v27, %v3509_v32  ;;  %v3533_v20 = vadd.f32 %v7858_v27, %v3510_v52  ;;  %v3511_v55 = vmul.f32 %v7847_v37, %v3488_v6 }
 0x2b7   :  { %v3557_v26 = vmax.f32 %v3541_v22, 0.0  ;;  %v3544_v39 = vmax.f32 %v3528_v13, 0.0  ;;  %v3545_v23 = vmax.f32 %v3529_v51, 0.0  ;;  %v3546_v25 = vmax.f32 %v3530_v12, 0.0 }
 0x2b8   :  { %v3547_v4 = vmax.f32 %v3531_v54, 0.0  ;;  %v3548_v0 = vmax.f32 %v3532_v11, 0.0  ;;  %v3549_v1 = vmax.f32 %v3533_v20, 0.0  ;;  %v3512_v63 = vmul.f32 %v7847_v37, %v3489_v14  ;;  %v5973_v20 = vld [vmem:[%s8684_s4 + $0x138] sm:$0xff]  }
 0x2b9   :  { %3573 = vst [vmem:[#allocation2 + $0x101] sm:$0xff] %v3557_v26  ;;  %3560 = vst [vmem:[#allocation2 + $0x11] sm:$0xff] %v3544_v39  ;;  %v3534_v41 = vadd.f32 %v7858_v27, %v3511_v55  ;;  %v3490_v46 = vmul.f32 %v6013_v7, %v3472_v35  ;;  %v3491_v2 = vmul.f32 %v6013_v7, %v3473_v5 }
 0x2ba   :  { %3561 = vst [vmem:[#allocation2 + $0x21] sm:$0xff] %v3545_v23  ;;  %3562 = vst [vmem:[#allocation2 + $0x31] sm:$0xff] %v3546_v25  ;;  %v3492_v56 = vmul.f32 %v6013_v7, %v3474_v17  ;;  %v3535_v58 = vadd.f32 %v7858_v27, %v3512_v63  ;;  %v3493_v34 = vmul.f32 %v6013_v7, %v3475_v50 }
 0x2bb   :  { %3563 = vst [vmem:[#allocation2 + $0x41] sm:$0xff] %v3547_v4  ;;  %3564 = vst [vmem:[#allocation2 + $0x51] sm:$0xff] %v3548_v0  ;;  %v3494_v18 = vmul.f32 %v6013_v7, %v3476_v8  ;;  %v7878_v42 = vmul.f32 %v6013_v7, %v3478_v30  ;;  %v3550_v21 = vmax.f32 %v3534_v41, 0.0  ;;  %v3513_v40 = vmul.f32 %v7847_v37, %v3490_v46  ;;  %v5974_v4 = vld [vmem:[%s8684_s4 + $0x170] sm:$0xff]  }
 0x2bc   :  { %3565 = vst [vmem:[#allocation2 + $0x61] sm:$0xff] %v3549_v1  ;;  %v3514_v38 = vmul.f32 %v7847_v37, %v3491_v2  ;;  %v3515_v33 = vmul.f32 %v7847_v37, %v3492_v56  ;;  %v3551_v10 = vmax.f32 %v3535_v58, 0.0  ;;  %v3516_v36 = vmul.f32 %v7847_v37, %v3493_v34  ;;  %v5983_v56 = vld [vmem:[%s8684_s4 + $0x1b8] sm:$0xff]  }
 0x2bd   :  { %v3517_v35 = vmul.f32 %v7847_v37, %v3494_v18  ;;  %v7888_v5 = vmul.f32 %v6013_v7, %v3479_v3  ;;  %3566 = vst [vmem:[#allocation2 + $0x71] sm:$0xff] %v3550_v21  ;;  %v3536_v17 = vadd.f32 %v7858_v27, %v3513_v40  ;;  %v7894_v8 = vrot.slane %v7849_v60, 2  ;;  %v5984_v21 = vld [vmem:[%s8684_s4 + $0x1f0] sm:$0xff]  }
 0x2be   :  { %v3537_v50 = vadd.f32 %v7858_v27, %v3514_v38  ;;  %v3538_v29 = vadd.f32 %v7858_v27, %v3515_v33  ;;  %v3713_v30 = vrot.slane %v7842_v59, 2  ;;  %3567 = vst [vmem:[#allocation2 + $0x81] sm:$0xff] %v3551_v10  ;;  %v3539_v28 = vadd.f32 %v7858_v27, %v3516_v36  ;;  %v5975_v40 = vld [vmem:[%s8684_s4 + $0x130] sm:$0xff]   ;;  %v5976_v10 = vld [vmem:[%s8684_s4 + $0x168] sm:$0xff]  }
 0x2bf   :  { %v3540_v62 = vadd.f32 %v7858_v27, %v3517_v35  ;;  %v3552_v47 = vmax.f32 %v3536_v17, 0.0  ;;  %v3650_v45 = vsel %vm2116_vm5, %v7852_v49, %v3649_v9 }
 0x2c0   :  { %v3553_v19 = vmax.f32 %v3537_v50, 0.0  ;;  %v3554_v3 = vmax.f32 %v3538_v29, 0.0  ;;  %v3578_v7 = vld [vmem:[#allocation2 + $0x10] sm:$0xff]  ;;  %v3579_v53 = vld [vmem:[#allocation2 + $0x18] sm:$0x3]  ;;  %v3555_v15 = vmax.f32 %v3539_v28, 0.0  ;;  %v3714_v59 = vsel %vm2181_vm8, %v7894_v8, %v3713_v30 }
 0x2c1   :  { %v7899_v43 = vld [vmem:[#allocation2 + $0x20] sm:$0xff]  ;;  %v3556_v48 = vmax.f32 %v3540_v62, 0.0  ;;  %v3715_v24 = vrot.slane %v3578_v7, 2  ;;  %v3651_v16 = vrot.slane %v3578_v7, 1  ;;  %v3652_v44 = vrot.slane %v3579_v53, 1  ;;  %v3582_v61 = vld [vmem:[#allocation2 + $0x30] sm:$0xff] }
 0x2c2   :  { %v3819_v6 = vpack.c.bf16 %v7899_v43, %v3578_v7  ;;  %v7906_v57 = vld [vmem:[#allocation2 + $0x40] sm:$0xff]  ;;  %3568 = vst [vmem:[#allocation2 + $0xb1] sm:$0xff] %v3552_v47  ;;  %3569 = vst [vmem:[#allocation2 + $0xc1] sm:$0xff] %v3553_v19  ;;  %v3716_v31 = vrot.slane %v3579_v53, 2  ;;  %v3581_v32 = vld [vmem:[#allocation2 + $0x28] sm:$0x3]  ;;  %v3816_v11 = vpack.c.bf16 %v3578_v7, %v7849_v60 }
 0x2c3   :  { %3570 = vst [vmem:[#allocation2 + $0xd1] sm:$0xff] %v3554_v3  ;;  %v3583_v52 = vld [vmem:[#allocation2 + $0x38] sm:$0x3]  ;;  %v3654_v9 = vrot.slane %v7899_v43, 1  ;;  %3571 = vst [vmem:[#allocation2 + $0xe1] sm:$0xff] %v3555_v15  ;;  %v7912_v14 = vsel %vm2116_vm5, %v3651_v16, %v3652_v44  ;;  %v3655_v22 = vrot.slane %v3581_v32, 1  ;;  %v3825_v39 = vpack.c.bf16 %v7906_v57, %v3582_v61 }
 0x2c4   :  { %3572 = vst [vmem:[#allocation2 + $0xf1] sm:$0xff] %v3556_v48  ;;  %4575 = vmatprep.mubr.bf16.mxu0 %v3819_v6  ;;  %v3657_v13 = vrot.slane %v3582_v61, 1  ;;  %v3658_v51 = vrot.slane %v3583_v52, 1  ;;  %v3817_v12 = vpack.c.bf16 %v7912_v14, %v3650_v45  ;;  %v7916_v54 = vsel %vm2181_vm8, %v3715_v24, %v3716_v31  ;;  %v7922_v55 = vld [vmem:[#allocation2 + $0x48] sm:$0x3]  ;;  %v7935_v0 = vld [vmem:[#allocation2 + $0x50] sm:$0xff] }
 0x2c5   :  { %v3818_v26 = vpack.c.bf16 %v7916_v54, %v3714_v59  ;;  %v7927_v23 = vsel %vm2116_vm5, %v3654_v9, %v3655_v22  ;;  %v7937_v1 = vld [vmem:[#allocation2 + $0x58] sm:$0x3]  ;;  %v3718_v63 = vrot.slane %v7899_v43, 2  ;;  %v3719_v41 = vrot.slane %v3581_v32, 2  ;;  %v7967_v17 = vld [vmem:[#allocation2 + $0x60] sm:$0xff]  ;;  %v5985_v50 = vld [vmem:[%s8684_s4 + $0x1b0] sm:$0xff]  }
 0x2c6   :  { %v7930_v25 = vsel %vm2116_vm5, %v3657_v13, %v3658_v51  ;;  %4478 = vmatprep.mubr.bf16.mxu1 %v3817_v12  ;;  %v3721_v46 = vrot.slane %v3582_v61, 2  ;;  %v3722_v2 = vrot.slane %v3583_v52, 2  ;;  %v3660_v34 = vrot.slane %v7906_v57, 1  ;;  %v7978_v28 = vld [vmem:[#allocation2 + $0x70] sm:$0xff]  ;;  %v7980_v62 = vld [vmem:[#allocation2 + $0x68] sm:$0x3] }
 0x2c7   :  { %4576 = vmatmul.mubr.bf16.vlgmr.msra.gmra.mxu0 %v3818_v26  ;;  %4479 = vmatmul.mubr.bf16.vlgmr.msra.gmra.mxu1 %v3816_v11  ;;  %v7945_v58 = vpack.c.bf16 %v7930_v25, %v7927_v23  ;;  %v3661_v18 = vrot.slane %v7922_v55, 1  ;;  %v3663_v38 = vrot.slane %v7935_v0, 1  ;;  %v3664_v33 = vrot.slane %v7937_v1, 1  ;;  %v7982_v47 = vld [vmem:[#allocation2 + $0x78] sm:$0x3]  ;;  %v5977_v45 = vld [vmem:[%s8684_s4 + $0x128] sm:$0xff]  }
 0x2c8   :  { %4583 = vmatprep.mubr.bf16.mxu0 %v3825_v39  ;;  %5659 = vmatpush3.bf16.msra.mxu1 %v5973_v20  ;;  %v7962_v36 = vsel %vm2181_vm8, %v3718_v63, %v3719_v41  ;;  %v7965_v35 = vsel %vm2181_vm8, %v3721_v46, %v3722_v2  ;;  %v7989_v3 = vpack.c.bf16 %v3582_v61, %v7899_v43  ;;  %v3724_v53 = vrot.slane %v7906_v57, 2  ;;  %v5987_v15 = vld [vmem:[%s8684_s4 + $0x1e8] sm:$0xff]   ;;  %v5978_v16 = vld [vmem:[%s8684_s4 + $0x160] sm:$0xff]  }
 0x2c9   :  { %4486 = vmatprep.mubr.bf16.mxu1 %v7945_v58  ;;  %5660 = vmatprep.subr.bf16.mxu1 %v5974_v4  ;;  %v7973_v29 = vsel %vm2116_vm5, %v3660_v34, %v3661_v18  ;;  %v7976_v30 = vsel %vm2116_vm5, %v3663_v38, %v3664_v33  ;;  %v7986_v19 = vpack.c.bf16 %v7965_v35, %v7962_v36  ;;  %v3725_v43 = vrot.slane %v7922_v55, 2  ;;  %v5989_v44 = vld [vmem:[%s8684_s4 + $0x1a8] sm:$0xff]   ;;  %v5990_v52 = vld [vmem:[%s8684_s4 + $0x1e0] sm:$0xff]   ;;  %v8050_v55 = vld [vmem:[#allocation2 + $0xb0] sm:$0xff] }
 0x2ca   :  { %5723 = vmatpush3.bf16.msra.mxu0 %v5983_v56  ;;  %v3831_v7 = vpack.c.bf16 %v7967_v17, %v7935_v0  ;;  %v8002_v48 = vpack.c.bf16 %v7976_v30, %v7973_v29  ;;  %v3727_v24 = vrot.slane %v7935_v0, 2  ;;  %v3728_v6 = vrot.slane %v7937_v1, 2  ;;  %v5979_v13 = vld [vmem:[%s8684_s4 + $0x120] sm:$0xff]   ;;  %v8052_v26 = vld [vmem:[#allocation2 + $0xa8] sm:$0x3]  ;;  %v5982_v56 = vld [vmem:[%s8684_s4 + $0x118] sm:$0xff]  }
 0x2cb   :  { %5724 = vmatprep.subr.bf16.mxu0 %v5984_v21  ;;  %v3666_v61 = vrot.slane %v7967_v17, 1  ;;  %v3667_v31 = vrot.slane %v7980_v62, 1  ;;  %v3669_v59 = vrot.slane %v7978_v28, 1  ;;  %v3670_v32 = vrot.slane %v7982_v47, 1  ;;  %v8036_v11 = vld [vmem:[#allocation2 + $0x80] sm:$0xff]  ;;  %v5986_v21 = vld [vmem:[%s8684_s4 + $0x150] sm:$0xff]  }
 0x2cc   :  { %5661 = vmatpush3.bf16.msra.mxu1 %v5975_v40  ;;  %v3519_v9 = vmul.f32 %v7847_v37, %v7878_v42  ;;  %v3520_v22 = vmul.f32 %v7847_v37, %v7888_v5  ;;  %v8031_v51 = vsel %vm2181_vm8, %v3724_v53, %v3725_v43  ;;  %v8034_v12 = vsel %vm2181_vm8, %v3727_v24, %v3728_v6  ;;  %v5980_v42 = vld [vmem:[%s8684_s4 + $0x158] sm:$0xff]   ;;  %v5991_v37 = vld [vmem:[%s8684_s4 + $0x1a0] sm:$0xff]   ;;  %v5997_v43 = vld [vmem:[%s8684_s4 + $0x190] sm:$0xff]  }
 0x2cd   :  { %5662 = vmatprep.subr.bf16.mxu1 %v5976_v10  ;;  %v8045_v5 = vsel %vm2116_vm5, %v3666_v61, %v3667_v31  ;;  %v8048_v20 = vsel %vm2116_vm5, %v3669_v59, %v3670_v32  ;;  %v8054_v39 = vld [vmem:[#allocation2 + $0xb8] sm:$0x3]  ;;  %v8060_v63 = vpack.c.bf16 %v8034_v12, %v8031_v51  ;;  %v8064_v41 = vpack.c.bf16 %v7935_v0, %v7906_v57  ;;  %v8112_v24 = vld [vmem:[#allocation2 + $0xc0] sm:$0xff]  ;;  %v8121_v61 = vld [vmem:[#allocation2 + $0xc8] sm:$0x3] }
 0x2ce   :  { %5725 = vmatpush3.bf16.msra.mxu0 %v5985_v50  ;;  %v3542_v4 = vadd.f32 %v7858_v27, %v3519_v9  ;;  %v3543_v1 = vadd.f32 %v7858_v27, %v3520_v22  ;;  %v3837_v46 = vpack.c.bf16 %v8036_v11, %v7978_v28  ;;  %v3730_v2 = vrot.slane %v7967_v17, 2  ;;  %v5993_v27 = vld [vmem:[%s8684_s4 + $0x1d8] sm:$0xff]   ;;  %v5996_v50 = vld [vmem:[%s8684_s4 + $0x1d0] sm:$0xff]   ;;  %v5994_v9 = vld [vmem:[%s8684_s4 + $0x108] sm:$0xff]  }
 0x2cf   :  { %4584 = vmatmul.mubr.bf16.gmra.mxu0 %v7986_v19  ;;  %4487 = vmatmul.mubr.bf16.gmra.mxu1 %v7989_v3  ;;  %v8077_v34 = vpack.c.bf16 %v8048_v20, %v8045_v5  ;;  %v3731_v57 = vrot.slane %v7980_v62, 2  ;;  %v3733_v0 = vrot.slane %v7978_v28, 2  ;;  %v3734_v18 = vrot.slane %v7982_v47, 2  ;;  %v5995_v40 = vld [vmem:[%s8684_s4 + $0x198] sm:$0xff]   ;;  %v5988_v62 = vld [vmem:[%s8684_s4 + $0x110] sm:$0xff]   ;;  %v5999_v22 = vld [vmem:[%s8684_s4 + $0x1c8] sm:$0xff]  }
 0x2d0   :  { %4591 = vmatprep.mubr.bf16.mxu0 %v3831_v7  ;;  %4494 = vmatprep.mubr.bf16.mxu1 %v8002_v48  ;;  %v3673_v38 = vrot.slane %v8052_v26, 1  ;;  %v3675_v33 = vrot.slane %v8050_v55, 1  ;;  %v3676_v10 = vrot.slane %v8054_v39, 1  ;;  %v3558_v47 = vmax.f32 %v3542_v4, 0.0  ;;  %v8123_v31 = vld [vmem:[#allocation2 + $0xd8] sm:$0x3] }
 0x2d1   :  { %5663 = vmatpush3.bf16.msra.mxu1 %v5977_v45  ;;  %5726 = vmatprep.subr.bf16.mxu0 %v5987_v15  ;;  %v8101_v7 = vsel %vm2181_vm8, %v3730_v2, %v3731_v57  ;;  %v8104_v53 = vsel %vm2181_vm8, %v3733_v0, %v3734_v18  ;;  %v5992_v45 = vld [vmem:[%s8684_s4 + $0x148] sm:$0xff]   ;;  %v3559_v15 = vmax.f32 %v3543_v1, 0.0  ;;  %v8131_v32 = vpack.c.bf16 %v7978_v28, %v7967_v17  ;;  %v5998_v28 = vld [vmem:[%s8684_s4 + $0x140] sm:$0xff]  }
 0x2d2   :  { %5664 = vmatprep.subr.bf16.mxu1 %v5978_v16  ;;  %5727 = vmatpush3.bf16.msra.mxu0 %v5989_v44  ;;  %v3674_v6 = vsel %vm2116_vm5, %v7852_v49, %v3673_v38  ;;  %v8117_v16 = vsel %vm2116_vm5, %v3675_v33, %v3676_v10  ;;  %3574 = vst [vmem:[#allocation2 + $0x111] sm:$0xff] %v3558_v47  ;;  %v8119_v44 = vld [vmem:[#allocation2 + $0xd0] sm:$0xff]  ;;  %v3740_v17 = vrot.slane %v8054_v39, 2  ;;  %v3678_v4 = vrot.slane %v8112_v24, 1  ;;  %v6002_v2 = vld [vmem:[%s8684_s4 + $0x1c0] sm:$0xff]  }
 0x2d3   :  { %5728 = vmatprep.subr.bf16.mxu0 %v5990_v52  ;;  %3575 = vst [vmem:[#allocation2 + $0x121] sm:$0xff] %v3559_v15  ;;  %v8127_v59 = vpack.c.bf16 %v8104_v53, %v8101_v7  ;;  %v3737_v52 = vrot.slane %v8052_v26, 2  ;;  %v6001_v26 = vld [vmem:[%s8684_s4 + $0x188] sm:$0xff]   ;;  %v3679_v1 = vrot.slane %v8121_v61, 1  ;;  %v3681_v39 = vrot.slane %v8119_v44, 1  ;;  %v3604_v0 = vld [vmem:[#allocation2 + $0xe0] sm:$0xff] }
 0x2d4   :  { %v6003_v18 = vld [vmem:[%s8684_s4 + $0x180] sm:$0xff]   ;;  %v3606_v33 = vld [vmem:[#allocation2 + $0xf0] sm:$0xff]  ;;  %v3605_v10 = vld [vmem:[#allocation2 + $0xe8] sm:$0x3]  ;;  %v3843_v47 = vpack.c.bf16 %v8050_v55, %v7849_v60  ;;  %v3742_v15 = vrot.slane %v8112_v24, 2 }
 0x2d5   :  { %5665 = vmatpush3.bf16.msra.mxu1 %v5979_v13  ;;  %v3846_v13 = vpack.c.bf16 %v8112_v24, %v8050_v55 }
 0x2d6   :  { %5666 = vmatprep.subr.bf16.mxu1 %v5980_v42  ;;  %5729 = vmatpush3.bf16.msra.mxu0 %v5991_v37  ;;  %v3844_v42 = vpack.c.bf16 %v8117_v16, %v3674_v6  ;;  %v3739_v37 = vrot.slane %v8050_v55, 2  ;;  %v3743_v6 = vrot.slane %v8121_v61, 2  ;;  %v3684_v55 = vrot.slane %v3604_v0, 1 }
 0x2d7   :  { %4592 = vmatmul.mubr.bf16.gmra.mxu0 %v8060_v63  ;;  %4495 = vmatmul.mubr.bf16.gmra.mxu1 %v8064_v41 }
 0x2d8   :  { %4599 = vmatprep.mubr.bf16.mxu0 %v3837_v46  ;;  %4502 = vmatprep.mubr.bf16.mxu1 %v8077_v34  ;;  %v3682_v46 = vrot.slane %v8123_v31, 1  ;;  %v8166_v57 = vsel %vm2181_vm8, %v3739_v37, %v3740_v17  ;;  %v8197_v37 = vsel %vm2181_vm8, %v3742_v15, %v3743_v6  ;;  %v3608_v17 = vld [vmem:[#allocation2 + $0x100] sm:$0xff] }
 0x2d9   :  { %5667 = vmatpush3.bf16.msra.mxu1 %v5982_v56  ;;  %5730 = vmatprep.subr.bf16.mxu0 %v5993_v27  ;;  %v6000_v56 = vld [vmem:[%s8684_s4 + $0x100] sm:$0xff]   ;;  %v3738_v27 = vsel %vm2181_vm8, %v7894_v8, %v3737_v52  ;;  %v3745_v52 = vrot.slane %v8119_v44, 2 }
 0x2da   :  { %5668 = vmatprep.subr.bf16.mxu1 %v5986_v21  ;;  %5731 = vmatpush3.bf16.msra.mxu0 %v5995_v40  ;;  %v8174_v21 = vld [vmem:[%s8684_s4 + $0x238] sm:$0xff]   ;;  %v8177_v40 = vsel %vm2116_vm5, %v3678_v4, %v3679_v1  ;;  %v8180_v38 = vsel %vm2116_vm5, %v3681_v39, %v3682_v46  ;;  %v3609_v4 = vld [vmem:[#allocation2 + $0x108] sm:$0x3]  ;;  %v8214_v46 = vpack.c.bf16 %v8119_v44, %v8112_v24 }
 0x2db   :  { %5732 = vmatprep.subr.bf16.mxu0 %v5996_v50  ;;  %v3607_v50 = vld [vmem:[#allocation2 + $0xf8] sm:$0x3]  ;;  %v3691_v15 = vrot.slane %v3609_v4, 1 }
 0x2dc   :  { %v3611_v1 = vld [vmem:[#allocation2 + $0x118] sm:$0x3] }
 0x2dd   :  { %5669 = vmatpush3.bf16.msra.mxu1 %v5988_v62  ;;  %v3845_v62 = vpack.c.bf16 %v8166_v57, %v3738_v27 }
 0x2de   :  { %5670 = vmatprep.subr.bf16.mxu1 %v5992_v45  ;;  %5733 = vmatpush3.bf16.msra.mxu0 %v5997_v43  ;;  %v3852_v45 = vpack.c.bf16 %v3604_v0, %v8119_v44  ;;  %v8189_v43 = vpack.c.bf16 %v8180_v38, %v8177_v40 }
 0x2df   :  { %4600 = vmatmul.mubr.bf16.gmra.mxu0 %v8127_v59  ;;  %4503 = vmatmul.mubr.bf16.gmra.mxu1 %v8131_v32 }
 0x2e0   :  { %4607 = vmatprep.mubr.bf16.mxu0 %v3846_v13  ;;  %4510 = vmatprep.mubr.bf16.mxu1 %v3844_v42  ;;  %v3687_v13 = vrot.slane %v3606_v33, 1  ;;  %v3688_v42 = vrot.slane %v3607_v50, 1 }
 0x2e1   :  { %5671 = vmatpush3.bf16.msra.mxu1 %v5994_v9  ;;  %5734 = vmatprep.subr.bf16.mxu0 %v5999_v22  ;;  %v3746_v9 = vrot.slane %v8123_v31, 2  ;;  %v3685_v22 = vrot.slane %v3605_v10, 1 }
 0x2e2   :  { %5672 = vmatprep.subr.bf16.mxu1 %v5998_v28  ;;  %5735 = vmatpush3.bf16.msra.mxu0 %v6001_v26  ;;  %v8206_v28 = vsel %vm2116_vm5, %v3687_v13, %v3688_v42  ;;  %v3610_v26 = vld [vmem:[#allocation2 + $0x110] sm:$0xff]  ;;  %v3754_v13 = vrot.slane %v3608_v17, 2  ;;  %v3755_v42 = vrot.slane %v3609_v4, 2 }
 0x2e3   :  { %5736 = vmatprep.subr.bf16.mxu0 %v6002_v2  ;;  %v8200_v61 = vsel %vm2181_vm8, %v3745_v52, %v3746_v9  ;;  %v8203_v31 = vsel %vm2116_vm5, %v3684_v55, %v3685_v22  ;;  %v3858_v2 = vpack.c.bf16 %v3608_v17, %v3606_v33  ;;  %v3693_v6 = vrot.slane %v3610_v26, 1 }
 0x2e4   :  { %v8210_v39 = vpack.c.bf16 %v8200_v61, %v8197_v37  ;;  %v8218_v27 = vpack.c.bf16 %v8206_v28, %v8203_v31  ;;  %v3694_v52 = vrot.slane %v3611_v1, 1  ;;  %v8241_v22 = vpack.c.bf16 %v3606_v33, %v3604_v0 }
 0x2e5   :  { %5673 = vmatpush3.bf16.msra.mxu1 %v6000_v56  ;;  %v3748_v56 = vrot.slane %v3604_v0, 2  ;;  %v8252_v0 = vsel %vm2181_vm8, %v3754_v13, %v3755_v42  ;;  %v3848_v13 = vpack.c.bf16 %v8197_v37, %v8166_v57  ;;  %v3615_v57 = vld [vmem:[#allocation2 + $0x138] sm:$0x3]  ;;  %v3613_v37 = vld [vmem:[#allocation2 + $0x128] sm:$0x3] }
 0x2e6   :  { %5737 = vmatpush3.bf16.msra.mxu0 %v6003_v18  ;;  %5834 = vmatprep.subr.bf16.mxu1 %v8174_v21  ;;  %v3749_v18 = vrot.slane %v3605_v10, 2  ;;  %v8229_v10 = vld [vmem:[#allocation2 + $0x120] sm:$0xff]  ;;  %v8235_v9 = vsel %vm2116_vm5, %v3693_v6, %v3694_v52  ;;  %v6009_v52 = vld [vmem:[%s8684_s4 + $0x210] sm:$0xff]  }
 0x2e7   :  { %4608 = vmatmul.mubr.bf16.gmra.mxu0 %v3845_v62  ;;  %4511 = vmatmul.mubr.bf16.gmra.mxu1 %v3843_v47  ;;  %v3751_v62 = vrot.slane %v3606_v33, 2  ;;  %v3752_v47 = vrot.slane %v3607_v50, 2 }
 0x2e8   :  { %4615 = vmatprep.mubr.bf16.mxu0 %v3852_v45  ;;  %4518 = vmatprep.mubr.bf16.mxu1 %v8189_v43  ;;  %v3690_v45 = vrot.slane %v3608_v17, 1  ;;  %v8224_v24 = vsel %vm2181_vm8, %v3748_v56, %v3749_v18  ;;  %v3757_v18 = vrot.slane %v3610_v26, 2 }
 0x2e9   :  { %v8227_v44 = vsel %vm2181_vm8, %v3751_v62, %v3752_v47  ;;  %v3758_v62 = vrot.slane %v3611_v1, 2  ;;  %v8261_v47 = vpack.c.bf16 %v3610_v26, %v3608_v17  ;;  %v3821_v1 = vpack.c.bf16 %v7962_v36, %v7916_v54 }
 0x2ea   :  { %v8232_v50 = vsel %vm2116_vm5, %v3690_v45, %v3691_v15  ;;  %v8239_v55 = vpack.c.bf16 %v8227_v44, %v8224_v24  ;;  %v3820_v45 = vpack.c.bf16 %v7927_v23, %v7912_v14  ;;  %v6005_v15 = vld [vmem:[%s8684_s4 + $0x230] sm:$0xff]   ;;  %v3827_v54 = vpack.c.bf16 %v8031_v51, %v7965_v35  ;;  %v6006_v14 = vld [vmem:[%s8684_s4 + $0x228] sm:$0xff]   ;;  %v8281_v23 = vld [vmem:[#allocation2 + $0x98] sm:$0x3] }
 0x2eb   :  { %v8246_v56 = vpack.c.bf16 %v8235_v9, %v8232_v50  ;;  %v8255_v33 = vsel %vm2181_vm8, %v3757_v18, %v3758_v62  ;;  %v3826_v36 = vpack.c.bf16 %v7973_v29, %v7930_v25  ;;  %v3833_v35 = vpack.c.bf16 %v8101_v7, %v8034_v12  ;;  %v6008_v25 = vld [vmem:[%s8684_s4 + $0x218] sm:$0xff]  }
 0x2ec   :  { %v8259_v4 = vpack.c.bf16 %v8255_v33, %v8252_v0  ;;  %v3780_v51 = vrot.slane %v8036_v11, 1  ;;  %v3788_v17 = vrot.slane %v8036_v11, 2  ;;  %v3832_v7 = vpack.c.bf16 %v8045_v5, %v7976_v30  ;;  %v6010_v30 = vld [vmem:[%s8684_s4 + $0x208] sm:$0xff]  }
 0x2ed   :  { %v3840_v5 = vpack.c.bf16 %v7849_v60, %v8036_v11  ;;  %v3847_v11 = vpack.c.bf16 %v8177_v40, %v8117_v16  ;;  %v3860_v42 = vpack.c.bf16 %v8252_v0, %v8227_v44  ;;  %v3783_v16 = vrot.slane %v8229_v10, 1 }
 0x2ee   :  { %v3784_v40 = vrot.slane %v3613_v37, 1  ;;  %v3867_v18 = vpack.c.bf16 %v7849_v60, %v8229_v10 }
 0x2ef   :  { %4616 = vmatmul.mubr.bf16.gmra.mxu0 %v8210_v39  ;;  %4519 = vmatmul.mubr.bf16.gmra.mxu1 %v8214_v46 }
 0x2f0   :  { %4623 = vmatprep.mubr.bf16.mxu0 %v3858_v2  ;;  %4526 = vmatprep.mubr.bf16.mxu1 %v8218_v27  ;;  %v3864_v2 = vpack.c.bf16 %v8229_v10, %v3610_v26 }
 0x2f7   :  { %4624 = vmatmul.mubr.bf16.gmra.mxu0 %v8239_v55  ;;  %4527 = vmatmul.mubr.bf16.gmra.mxu1 %v8241_v22 }
 0x2f8   :  { %4631 = vmatprep.mubr.bf16.mxu0 %v3864_v2  ;;  %4534 = vmatprep.mubr.bf16.mxu1 %v8246_v56  ;;  %v3804_v2 = vrot.slane %v3615_v57, 1 }
 0x2ff   :  { %4632 = vmatmul.mubr.bf16.gmra.mxu0 %v8259_v4  ;;  %4535 = vmatmul.mubr.bf16.gmra.mxu1 %v8261_v47 }
 0x300   :  { %4769 = vmatprep.mubr.bf16.mxu0 %v7945_v58  ;;  %4672 = vmatprep.mubr.bf16.mxu1 %v3821_v1  ;;  %v3593_v58 = vld [vmem:[#allocation2 + $0x88] sm:$0x3] }
 0x301   :  { %v3789_v26 = vrot.slane %v3593_v58, 2 }
 0x307   :  { %4770 = vmatmul.mubr.bf16.vlgmr.msra.gmra.mxu0 %v7989_v3  ;;  %4673 = vmatmul.mubr.bf16.vlgmr.msra.gmra.mxu1 %v3820_v45  ;;  %v3801_v3 = vrot.slane %v8281_v23, 1 }
 0x308   :  { %4777 = vmatprep.mubr.bf16.mxu0 %v8002_v48  ;;  %5835 = vmatpush3.bf16.msra.mxu1 %v8174_v21  ;;  %v6007_v48 = vld [vmem:[%s8684_s4 + $0x220] sm:$0xff]   ;;  %v3781_v21 = vrot.slane %v3593_v58, 1 }
 0x309   :  { %4680 = vmatprep.mubr.bf16.mxu1 %v3827_v54  ;;  %5836 = vmatprep.subr.bf16.mxu1 %v6005_v15  ;;  %v3802_v12 = vsel %vm2116_vm5, %v7852_v49, %v3801_v3 }
 0x30a   :  { %v3782_v29 = vsel %vm2116_vm5, %v3780_v51, %v3781_v21 }
 0x30c   :  { %5837 = vmatpush3.bf16.msra.mxu1 %v6005_v15 }
 0x30d   :  { %5838 = vmatprep.subr.bf16.mxu1 %v6006_v14 }
 0x30f   :  { %4778 = vmatmul.mubr.bf16.gmra.mxu0 %v8064_v41  ;;  %4681 = vmatmul.mubr.bf16.gmra.mxu1 %v3826_v36  ;;  %v8302_v41 = vsel %vm2181_vm8, %v3788_v17, %v3789_v26 }
 0x310   :  { %4785 = vmatprep.mubr.bf16.mxu0 %v8077_v34  ;;  %4688 = vmatprep.mubr.bf16.mxu1 %v3833_v35  ;;  %v3841_v34 = vpack.c.bf16 %v3802_v12, %v3782_v29  ;;  %v3839_v6 = vpack.c.bf16 %v8302_v41, %v8104_v53  ;;  %v3838_v53 = vpack.c.bf16 %v3782_v29, %v8048_v20 }
 0x311   :  { %5839 = vmatpush3.bf16.msra.mxu1 %v6006_v14  ;;  %v3854_v20 = vpack.c.bf16 %v8224_v24, %v8200_v61  ;;  %v3791_v61 = vrot.slane %v8229_v10, 2  ;;  %v3859_v24 = vpack.c.bf16 %v8232_v50, %v8206_v28 }
 0x312   :  { %5840 = vmatprep.subr.bf16.mxu1 %v6007_v48 }
 0x315   :  { %5841 = vmatpush3.bf16.msra.mxu1 %v6007_v48 }
 0x316   :  { %5842 = vmatprep.subr.bf16.mxu1 %v6008_v25 }
 0x317   :  { %4786 = vmatmul.mubr.bf16.gmra.mxu0 %v8131_v32  ;;  %4689 = vmatmul.mubr.bf16.gmra.mxu1 %v3832_v7  ;;  %v6011_v32 = vld [vmem:[%s8684_s4 + $0x200] sm:$0xff]  }
 0x318   :  { %4793 = vmatprep.mubr.bf16.mxu0 %v3841_v34  ;;  %4696 = vmatprep.mubr.bf16.mxu1 %v3839_v6 }
 0x319   :  { %5843 = vmatpush3.bf16.msra.mxu1 %v6008_v25 }
 0x31a   :  { %5844 = vmatprep.subr.bf16.mxu1 %v6009_v52 }
 0x31d   :  { %5845 = vmatpush3.bf16.msra.mxu1 %v6009_v52 }
 0x31e   :  { %5846 = vmatprep.subr.bf16.mxu1 %v6010_v30 }
 0x31f   :  { %4794 = vmatmul.mubr.bf16.gmra.mxu0 %v3840_v5  ;;  %4697 = vmatmul.mubr.bf16.gmra.mxu1 %v3838_v53 }
 0x320   :  { %4801 = vmatprep.mubr.bf16.mxu0 %v8189_v43  ;;  %4704 = vmatprep.mubr.bf16.mxu1 %v3848_v13  ;;  %v3853_v43 = vpack.c.bf16 %v8203_v31, %v8180_v38  ;;  %v3805_v38 = vsel %vm2116_vm5, %v7852_v49, %v3804_v2  ;;  %v3809_v49 = vrot.slane %v8281_v23, 2 }
 0x321   :  { %5847 = vmatpush3.bf16.msra.mxu1 %v6010_v30 }
 0x322   :  { %5848 = vmatprep.subr.bf16.mxu1 %v6011_v32  ;;  %v3810_v28 = vsel %vm2181_vm8, %v7894_v8, %v3809_v49 }
 0x323   :  { %v3842_v50 = vpack.c.bf16 %v3810_v28, %v8302_v41 }
 0x325   :  { %5849 = vmatpush3.bf16.msra.mxu1 %v6011_v32 }
 0x327   :  { %4802 = vmatmul.mubr.bf16.gmra.mxu0 %v8214_v46  ;;  %4705 = vmatmul.mubr.bf16.gmra.mxu1 %v3847_v11  ;;  %v3792_v46 = vrot.slane %v3613_v37, 2 }
 0x328   :  { %4809 = vmatprep.mubr.bf16.mxu0 %v8218_v27  ;;  %4712 = vmatprep.mubr.bf16.mxu1 %v3854_v20  ;;  %v3785_v27 = vsel %vm2116_vm5, %v3783_v16, %v3784_v40 }
 0x329   :  { %v3793_v31 = vsel %vm2181_vm8, %v3791_v61, %v3792_v46  ;;  %v3868_v44 = vpack.c.bf16 %v3805_v38, %v3785_v27 }
 0x32f   :  { %4810 = vmatmul.mubr.bf16.gmra.mxu0 %v8241_v22  ;;  %4713 = vmatmul.mubr.bf16.gmra.mxu1 %v3853_v43  ;;  %v3866_v22 = vpack.c.bf16 %v3793_v31, %v8255_v33 }
 0x330   :  { %4817 = vmatprep.mubr.bf16.mxu0 %v8246_v56  ;;  %4720 = vmatprep.mubr.bf16.mxu1 %v3860_v42  ;;  %v3865_v56 = vpack.c.bf16 %v3785_v27, %v8235_v9  ;;  %v3812_v9 = vrot.slane %v3615_v57, 2 }
 0x332   :  { %v3813_v60 = vsel %vm2181_vm8, %v7894_v8, %v3812_v9 }
 0x337   :  { %4818 = vmatmul.mubr.bf16.gmra.mxu0 %v8261_v47  ;;  %4721 = vmatmul.mubr.bf16.gmra.mxu1 %v3859_v24 }
 0x338   :  { %4825 = vmatprep.mubr.bf16.mxu0 %v3868_v44  ;;  %4728 = vmatprep.mubr.bf16.mxu1 %v3866_v22 }
 0x33f   :  { %4826 = vmatmul.mubr.bf16.gmra.mxu0 %v3867_v18  ;;  %4729 = vmatmul.mubr.bf16.gmra.mxu1 %v3865_v56 }
 0x340   :  { %5850 = vmatprep.mubr.bf16.mxu1 %v7986_v19  ;;  %v3869_v19 = vpack.c.bf16 %v3813_v60, %v3793_v31 }
 0x347   :  { %5851 = vmatmul.mubr.bf16.vlgmr.msra.gmra.mxu1 %v8060_v63 }
 0x348   :  { %5854 = vmatprep.mubr.bf16.mxu1 %v8127_v59 }
 0x34f   :  { %5855 = vmatmul.mubr.bf16.gmra.mxu1 %v3842_v50 }
 0x350   :  { %5858 = vmatprep.mubr.bf16.mxu1 %v8210_v39 }
 0x357   :  { %5859 = vmatmul.mubr.bf16.gmra.mxu1 %v8239_v55 }
 0x358   :  { %5862 = vmatprep.mubr.bf16.mxu1 %v8259_v4 }
 0x35f   :  { %5863 = vmatmul.mubr.bf16.gmra.mxu1 %v3869_v19 }
 0x387   :  { %v5610_v63 = vpop.f32.mrf.mxu0  ;;  %v5546_v59 = vpop.f32.mrf.mxu1 }
 0x389   :  { %v5611_v10 = vpop.f32.mrf.mxu0  ;;  %v5547_v62 = vpop.f32.mrf.mxu1 }
 0x38a   :  { %v5612_v0 = vadd.f32 %v5611_v10, %v5610_v63  ;;  %v5548_v33 = vadd.f32 %v5547_v62, %v5546_v59 }
 0x38b   :  { %v5613_v47 = vpop.f32.mrf.mxu0  ;;  %v5549_v1 = vpop.f32.mrf.mxu1 }
 0x38c   :  { %v8361_v45 = vadd.f32 %v5612_v0, %v5548_v33 }
 0x38d   :  { %v5614_v39 = vpop.f32.mrf.mxu0  ;;  %v5550_v15 = vpop.f32.mrf.mxu1 }
 0x38e   :  { %v5615_v55 = vadd.f32 %v5614_v39, %v5613_v47  ;;  %v5551_v54 = vadd.f32 %v5550_v15, %v5549_v1 }
 0x38f   :  { %v5616_v4 = vpop.f32.mrf.mxu0  ;;  %v5552_v14 = vpop.f32.mrf.mxu1 }
 0x390   :  { %v8363_v23 = vadd.f32 %v5615_v55, %v5551_v54 }
 0x391   :  { %v5617_v8 = vpop.f32.mrf.mxu0  ;;  %v5553_v58 = vpop.f32.mrf.mxu1 }
 0x392   :  { %v5618_v36 = vadd.f32 %v5617_v8, %v5616_v4  ;;  %v5554_v35 = vadd.f32 %v5553_v58, %v5552_v14 }
 0x393   :  { %v5619_v3 = vpop.f32.mrf.mxu0  ;;  %v5555_v48 = vpop.f32.mrf.mxu1 }
 0x394   :  { %v8365_v51 = vadd.f32 %v5618_v36, %v5554_v35 }
 0x395   :  { %v5620_v21 = vpop.f32.mrf.mxu0  ;;  %v5556_v17 = vpop.f32.mrf.mxu1 }
 0x396   :  { %v5621_v26 = vadd.f32 %v5620_v21, %v5619_v3  ;;  %v5557_v25 = vadd.f32 %v5556_v17, %v5555_v48 }
 0x397   :  { %v5622_v29 = vpop.f32.mrf.mxu0  ;;  %v5558_v12 = vpop.f32.mrf.mxu1 }
 0x398   :  { %v8367_v41 = vadd.f32 %v5621_v26, %v5557_v25 }
 0x399   :  { %v5623_v7 = vpop.f32.mrf.mxu0  ;;  %v5559_v34 = vpop.f32.mrf.mxu1 }
 0x39a   :  { %v5624_v6 = vadd.f32 %v5623_v7, %v5622_v29  ;;  %v5560_v52 = vadd.f32 %v5559_v34, %v5558_v12 }
 0x39b   :  { %v5625_v30 = vpop.f32.mrf.mxu0  ;;  %v5561_v5 = vpop.f32.mrf.mxu1 }
 0x39c   :  { %v8369_v53 = vadd.f32 %v5624_v6, %v5560_v52 }
 0x39d   :  { %v5626_v13 = vpop.f32.mrf.mxu0  ;;  %v5562_v32 = vpop.f32.mrf.mxu1 }
 0x39e   :  { %v5627_v11 = vadd.f32 %v5626_v13, %v5625_v30  ;;  %v5563_v20 = vadd.f32 %v5562_v32, %v5561_v5 }
 0x39f   :  { %v5628_v57 = vpop.f32.mrf.mxu0  ;;  %v5564_v37 = vpop.f32.mrf.mxu1 }
 0x3a0   :  { %v8371_v43 = vadd.f32 %v5627_v11, %v5563_v20 }
 0x3a1   :  { %v5629_v42 = vpop.f32.mrf.mxu0  ;;  %v5565_v2 = vpop.f32.mrf.mxu1 }
 0x3a2   :  { %v5630_v16 = vadd.f32 %v5629_v42, %v5628_v57  ;;  %v5566_v40 = vadd.f32 %v5565_v2, %v5564_v37 }
 0x3a3   :  { %v5631_v61 = vpop.f32.mrf.mxu0  ;;  %v5567_v46 = vpop.f32.mrf.mxu1 }
 0x3a4   :  { %v8373_v27 = vadd.f32 %v5630_v16, %v5566_v40 }
 0x3a5   :  { %v5632_v38 = vpop.f32.mrf.mxu0  ;;  %v5568_v31 = vpop.f32.mrf.mxu1 }
 0x3a6   :  { %v5633_v24 = vadd.f32 %v5632_v38, %v5631_v61  ;;  %v5569_v44 = vadd.f32 %v5568_v31, %v5567_v46 }
 0x3a7   :  { %v5634_v22 = vpop.f32.mrf.mxu0  ;;  %v5570_v56 = vpop.f32.mrf.mxu1 }
 0x3a8   :  { %v8375_v18 = vadd.f32 %v5633_v24, %v5569_v44 }
 0x3a9   :  { %v5635_v49 = vpop.f32.mrf.mxu0  ;;  %v5571_v28 = vpop.f32.mrf.mxu1 }
 0x3aa   :  { %v5636_v50 = vadd.f32 %v5635_v49, %v5634_v22  ;;  %v5572_v9 = vadd.f32 %v5571_v28, %v5570_v56 }
 0x3ab   :  { %v5637_v60 = vpop.f32.mrf.mxu0  ;;  %v5573_v19 = vpop.f32.mrf.mxu1 }
 0x3ac   :  { %v8377_v63 = vadd.f32 %v5636_v50, %v5572_v9 }
 0x3ad   :  { %v5638_v59 = vpop.f32.mrf.mxu0  ;;  %v5574_v10 = vpop.f32.mrf.mxu1 }
 0x3ae   :  { %v5639_v62 = vadd.f32 %v5638_v59, %v5637_v60  ;;  %v5575_v0 = vadd.f32 %v5574_v10, %v5573_v19 }
 0x3af   :  { %v5640_v33 = vpop.f32.mrf.mxu0  ;;  %v5576_v47 = vpop.f32.mrf.mxu1 }
 0x3b0   :  { %v8379_v1 = vadd.f32 %v5639_v62, %v5575_v0 }
 0x3b1   :  { %v5641_v39 = vpop.f32.mrf.mxu0  ;;  %v5577_v15 = vpop.f32.mrf.mxu1 }
 0x3b2   :  { %8791 = vst [vmem:[#allocation20_spill] sm:$0xff] %v8379_v1  ;;  %v5642_v55 = vadd.f32 %v5641_v39, %v5640_v33  ;;  %v5578_v54 = vadd.f32 %v5577_v15, %v5576_v47 }
 0x3b3   :  { %v5643_v4 = vpop.f32.mrf.mxu0  ;;  %v5579_v14 = vpop.f32.mrf.mxu1 }
 0x3b4   :  { %v8381_v8 = vadd.f32 %v5642_v55, %v5578_v54 }
 0x3b5   :  { %v5644_v58 = vpop.f32.mrf.mxu0  ;;  %v5580_v36 = vpop.f32.mrf.mxu1 }
 0x3b6   :  { %8792 = vst [vmem:[#allocation3_spill] sm:$0xff] %v8381_v8  ;;  %v5645_v35 = vadd.f32 %v5644_v58, %v5643_v4  ;;  %v5581_v3 = vadd.f32 %v5580_v36, %v5579_v14 }
 0x3b7   :  { %v5646_v48 = vpop.f32.mrf.mxu0  ;;  %v5582_v21 = vpop.f32.mrf.mxu1 }
 0x3b8   :  { %v8383_v17 = vadd.f32 %v5645_v35, %v5581_v3 }
 0x3b9   :  { %v5647_v26 = vpop.f32.mrf.mxu0  ;;  %v5583_v25 = vpop.f32.mrf.mxu1 }
 0x3ba   :  { %8793 = vst [vmem:[#allocation5_spill] sm:$0xff] %v8383_v17  ;;  %v5648_v29 = vadd.f32 %v5647_v26, %v5646_v48  ;;  %v5584_v12 = vadd.f32 %v5583_v25, %v5582_v21 }
 0x3bb   :  { %v5649_v7 = vpop.f32.mrf.mxu0  ;;  %v5585_v34 = vpop.f32.mrf.mxu1 }
 0x3bc   :  { %v8385_v6 = vadd.f32 %v5648_v29, %v5584_v12 }
 0x3bd   :  { %v5650_v52 = vpop.f32.mrf.mxu0  ;;  %v5586_v30 = vpop.f32.mrf.mxu1 }
 0x3be   :  { %8794 = vst [vmem:[#allocation8_spill] sm:$0xff] %v8385_v6  ;;  %v5651_v5 = vadd.f32 %v5650_v52, %v5649_v7  ;;  %v5587_v13 = vadd.f32 %v5586_v30, %v5585_v34 }
 0x3bf   :  { %v5652_v32 = vpop.f32.mrf.mxu0  ;;  %v5588_v11 = vpop.f32.mrf.mxu1 }
 0x3c0   :  { %v8387_v20 = vadd.f32 %v5651_v5, %v5587_v13 }
 0x3c1   :  { %v5653_v57 = vpop.f32.mrf.mxu0  ;;  %v5589_v37 = vpop.f32.mrf.mxu1 }
 0x3c2   :  { %8795 = vst [vmem:[#allocation17_spill] sm:$0xff] %v8387_v20  ;;  %v5654_v42 = vadd.f32 %v5653_v57, %v5652_v32  ;;  %v5590_v2 = vadd.f32 %v5589_v37, %v5588_v11 }
 0x3c3   :  { %v8389_v16 = vpop.f32.mrf.mxu0  ;;  %v5591_v40 = vpop.f32.mrf.mxu1 }
 0x3c4   :  { %v8391_v61 = vadd.f32 %v5654_v42, %v5590_v2 }
 0x3c5   :  { %v8393_v46 = vpop.f32.mrf.mxu0  ;;  %v5592_v38 = vpop.f32.mrf.mxu1 }
 0x3c6   :  { %8796 = vst [vmem:[#allocation24_spill] sm:$0xff] %v8391_v61  ;;  %v8395_v31 = vadd.f32 %v5592_v38, %v5591_v40 }
 0x3c7   :  { %v8397_v24 = vpop.f32.mrf.mxu0  ;;  %v5674_v44 = vpop.f32.mrf.mxu1 }
 0x3c8   :  { %8797 = vst [vmem:[#allocation11_spill] sm:$0xff] %v8395_v31 }
 0x3c9   :  { %v5739_v22 = vpop.f32.mrf.mxu0  ;;  %v5675_v56 = vpop.f32.mrf.mxu1 }
 0x3ca   :  { %v5676_v49 = vadd.f32 %v5675_v56, %v5674_v44 }
 0x3cb   :  { %v8399_v28 = vpop.f32.mrf.mxu0  ;;  %v5677_v50 = vpop.f32.mrf.mxu1 }
 0x3cc   :  { %v8402_v9 = vadd.f32 %v5676_v49, %v8361_v45 }
 0x3cd   :  { %v5742_v60 = vpop.f32.mrf.mxu0  ;;  %v5678_v19 = vpop.f32.mrf.mxu1 }
 0x3cf   :  { %v5744_v59 = vpop.f32.mrf.mxu0  ;;  %v5680_v10 = vpop.f32.mrf.mxu1 }
 0x3d1   :  { %v5745_v62 = vpop.f32.mrf.mxu0  ;;  %v5681_v0 = vpop.f32.mrf.mxu1 }
 0x3d3   :  { %v8404_v33 = vpop.f32.mrf.mxu0  ;;  %v5683_v47 = vpop.f32.mrf.mxu1 }
 0x3d5   :  { %v5748_v39 = vpop.f32.mrf.mxu0  ;;  %v5684_v15 = vpop.f32.mrf.mxu1 }
 0x3d7   :  { %v8406_v55 = vpop.f32.mrf.mxu0  ;;  %v5686_v54 = vpop.f32.mrf.mxu1 }
 0x3d9   :  { %v5751_v4 = vpop.f32.mrf.mxu0  ;;  %v5687_v14 = vpop.f32.mrf.mxu1 }
 0x3db   :  { %v8408_v58 = vpop.f32.mrf.mxu0  ;;  %v5689_v45 = vpop.f32.mrf.mxu1 }
 0x3dd   :  { %v8410_v36 = vpop.f32.mrf.mxu0  ;;  %v5690_v35 = vpop.f32.mrf.mxu1 }
 0x3df   :  { %v8412_v3 = vpop.f32.mrf.mxu0  ;;  %v5692_v48 = vpop.f32.mrf.mxu1 }
 0x3e1   :  { %v8414_v21 = vpop.f32.mrf.mxu0  ;;  %v5693_v26 = vpop.f32.mrf.mxu1 }
 0x3e3   :  { %v8416_v25 = vpop.f32.mrf.mxu0  ;;  %v5695_v29 = vpop.f32.mrf.mxu1 }
 0x3e5   :  { %v8418_v12 = vpop.f32.mrf.mxu0  ;;  %v5696_v7 = vpop.f32.mrf.mxu1 }
 0x3e7   :  { %v8420_v34 = vpop.f32.mrf.mxu0  ;;  %v5698_v52 = vpop.f32.mrf.mxu1 }
 0x3e9   :  { %v8422_v30 = vpop.f32.mrf.mxu0  ;;  %v5699_v5 = vpop.f32.mrf.mxu1 }
 0x3eb   :  { %v8424_v13 = vpop.f32.mrf.mxu1  ;;  %v8426_v32 = vpop.f32.mrf.mxu0 }
 0x3ec   :  { %8798 = vst [vmem:[#allocation10_spill] sm:$0xff] %v8426_v32  ;;  %v5679_v32 = vadd.f32 %v5678_v19, %v5677_v50  ;;  %v5746_v50 = vadd.f32 %v5745_v62, %v5744_v59  ;;  %v5700_v62 = vadd.f32 %v5699_v5, %v5698_v52 }
 0x3ed   :  { %v8428_v11 = vpop.f32.mrf.mxu1  ;;  %v8432_v37 = vpop.f32.mrf.mxu0 }
 0x3ee   :  { %8799 = vst [vmem:[#allocation12_spill] sm:$0xff] %v8432_v37  ;;  %v4707_v52 = vadd.f32 %v5700_v62, %v8377_v63  ;;  %v5764_v63 = vadd.f32 %v8422_v30, %v8420_v34 }
 0x3ef   :  { %v8430_v57 = vpop.f32.mrf.mxu1  ;;  %v8438_v40 = vpop.f32.mrf.mxu0 }
 0x3f0   :  { %8800 = vst [vmem:[#allocation16_spill] sm:$0xff] %v8438_v40 }
 0x3f1   :  { %v8434_v42 = vpop.f32.mrf.mxu1  ;;  %v8444_v56 = vpop.f32.mrf.mxu0 }
 0x3f2   :  { %8802 = vst [vmem:[#allocation23_spill] sm:$0xff] %v8444_v56 }
 0x3f3   :  { %v8436_v2 = vpop.f32.mrf.mxu1  ;;  %v8450_v20 = vpop.f32.mrf.mxu0 }
 0x3f4   :  { %8805 = vst [vmem:[#allocation7_spill] sm:$0xff] %v8450_v20  ;;  %v5740_v20 = vadd.f32 %v5739_v22, %v8397_v24  ;;  %v5749_v24 = vadd.f32 %v5748_v39, %v8404_v33 }
 0x3f5   :  { %v8440_v38 = vpop.f32.mrf.mxu1  ;;  %v8456_v17 = vpop.f32.mrf.mxu0 }
 0x3f6   :  { %8808 = vst [vmem:[#allocation13_spill] sm:$0xff] %v8456_v17 }
 0x3f7   :  { %v8442_v44 = vpop.f32.mrf.mxu1  ;;  %v8462_v8 = vpop.f32.mrf.mxu0 }
 0x3f8   :  { %8801 = vst [vmem:[#allocation22_spill] sm:$0xff] %v8442_v44  ;;  %v5682_v44 = vadd.f32 %v5681_v0, %v5680_v10  ;;  %v4772_v10 = vadd.f32 %v5740_v20, %v8402_v9 }
 0x3f9   :  { %v8446_v49 = vpop.f32.mrf.mxu1  ;;  %v8469_v17 = vpop.f32.mrf.mxu0 }
 0x3fa   :  { %8803 = vst [vmem:[#allocation15_spill] sm:$0xff] %v8446_v49  ;;  %v5685_v49 = vadd.f32 %v5684_v15, %v5683_v47  ;;  %v5691_v47 = vadd.f32 %v5690_v35, %v5689_v45  ;;  %v5694_v15 = vadd.f32 %v5693_v26, %v5692_v48 }
 0x3fb   :  { %v8448_v61 = vpop.f32.mrf.mxu1  ;;  %v8819_v62 = vld [vmem:[#allocation7_spill] sm:$0xff] }
 0x3fc   :  { %8804 = vst [vmem:[#allocation14_spill] sm:$0xff] %v8448_v61  ;;  %v5688_v61 = vadd.f32 %v5687_v14, %v5686_v54  ;;  %v4686_v19 = vadd.f32 %v5685_v49, %v8367_v41  ;;  %v8483_v41 = vadd.f32 %v8393_v46, %v8389_v16  ;;  %v4694_v9 = vadd.f32 %v5691_v47, %v8371_v43 }
 0x3fd   :  { %v8452_v31 = vpop.f32.mrf.mxu1  ;;  %v5755_v43 = vadd.f32 %v8410_v36, %v8408_v58  ;;  %v5761_v46 = vadd.f32 %v8418_v12, %v8416_v25  ;;  %v5703_v58 = vadd.f32 %v8428_v11, %v8424_v13  ;;  %v5706_v36 = vadd.f32 %v8434_v42, %v8430_v57 }
 0x3fe   :  { %8806 = vst [vmem:[#allocation18_spill] sm:$0xff] %v8452_v31  ;;  %v4678_v31 = vadd.f32 %v5679_v32, %v8363_v23  ;;  %v4691_v0 = vadd.f32 %v5688_v61, %v8369_v53  ;;  %v8476_v23 = vpop.f32.mrf.mxu0  ;;  %v4783_v20 = vadd.f32 %v5749_v24, %v4686_v19  ;;  %v5709_v13 = vadd.f32 %v8440_v38, %v8436_v2 }
 0x3ff   :  { %v8454_v6 = vpop.f32.mrf.mxu1  ;;  %v4791_v32 = vadd.f32 %v5755_v43, %v4694_v9  ;;  %v8813_v34 = vld [vmem:[#allocation22_spill] sm:$0xff]  ;;  %v4804_v38 = vadd.f32 %v5764_v63, %v4707_v52  ;;  %v8818_v9 = vld [vmem:[#allocation23_spill] sm:$0xff] }
 0x400   :  { %8807 = vst [vmem:[#allocation4_spill] sm:$0xff] %v8454_v6  ;;  %v4683_v6 = vadd.f32 %v5682_v44, %v8365_v51  ;;  %v8491_v39 = vpop.f32.mrf.mxu0 }
 0x401   :  { %v8458_v37 = vpop.f32.mrf.mxu1  ;;  %v8814_v30 = vld [vmem:[#allocation15_spill] sm:$0xff] }
 0x402   :  { %8809 = vst [vmem:[#allocation19_spill] sm:$0xff] %v8458_v37  ;;  %v4780_v51 = vadd.f32 %v5746_v50, %v4683_v6  ;;  %v4699_v6 = vadd.f32 %v5694_v15, %v8373_v27  ;;  %v5758_v27 = vadd.f32 %v8414_v21, %v8412_v3  ;;  %v8811_v50 = vld [vmem:[#allocation20_spill] sm:$0xff]  ;;  %v5712_v47 = vadd.f32 %v8814_v30, %v8813_v34 }
 0x403   :  { %v8460_v40 = vpop.f32.mrf.mxu1  ;;  %v4710_v19 = vadd.f32 %v5703_v58, %v8811_v50 }
 0x404   :  { %8810 = vst [vmem:[#allocation6_spill] sm:$0xff] %v8460_v40  ;;  %v5743_v40 = vadd.f32 %v5742_v60, %v8399_v28  ;;  %v5752_v28 = vadd.f32 %v5751_v4, %v8406_v55  ;;  %v5697_v60 = vadd.f32 %v5696_v7, %v5695_v29  ;;  %v4796_v3 = vadd.f32 %v5758_v27, %v4699_v6 }
 0x405   :  { %v8464_v56 = vpop.f32.mrf.mxu1 }
 0x406   :  { %v4775_v14 = vadd.f32 %v5743_v40, %v4678_v31  ;;  %v4788_v31 = vadd.f32 %v5752_v28, %v4691_v0  ;;  %v4702_v45 = vadd.f32 %v5697_v60, %v8375_v18  ;;  %v8518_v18 = vpop.f32.mrf.mxu0  ;;  %v8815_v28 = vld [vmem:[#allocation10_spill] sm:$0xff]  ;;  %v8816_v60 = vld [vmem:[#allocation12_spill] sm:$0xff] }
 0x407   :  { %v5852_v1 = vpop.f32.mrf.mxu1  ;;  %v8825_v58 = vld [vmem:[#allocation4_spill] sm:$0xff] }
 0x408   :  { %v8485_v53 = vadd.f32 %v5852_v1, %v4780_v51  ;;  %v4799_v57 = vadd.f32 %v5761_v46, %v4702_v45  ;;  %v5781_v15 = vpop.f32.mrf.mxu0 }
 0x409   :  { %v4868_v37 = vpop.f32.mrf.mxu1 }
 0x40a   :  { %v8478_v22 = vadd.f32 %v4868_v37, %v4772_v10  ;;  %v4955_v48 = vmul.f32 %v8485_v53, %v8485_v53  ;;  %v8812_v10 = vld [vmem:[#allocation3_spill] sm:$0xff] }
 0x40b   :  { %v5853_v54 = vpop.f32.mrf.mxu1  ;;  %v4715_v0 = vadd.f32 %v5706_v36, %v8812_v10  ;;  %v8826_v36 = vld [vmem:[#allocation19_spill] sm:$0xff] }
 0x40c   :  { %v4953_v55 = vmul.f32 %v8478_v22, %v8478_v22  ;;  %v8495_v4 = vadd.f32 %v5853_v54, %v4783_v20  ;;  %v8817_v20 = vld [vmem:[#allocation16_spill] sm:$0xff] }
 0x40d   :  { %v4871_v59 = vpop.f32.mrf.mxu1  ;;  %v5770_v6 = vadd.f32 %v8818_v9, %v8817_v20  ;;  %v5779_v20 = vadd.f32 %v8491_v39, %v8476_v23 }
 0x40e   :  { %v8487_v61 = vadd.f32 %v4871_v59, %v4775_v14  ;;  %v4956_v25 = vmul.f32 %v8495_v4, %v8495_v4  ;;  %v5767_v59 = vadd.f32 %v8816_v60, %v8815_v28 }
 0x40f   :  { %v5856_v33 = vpop.f32.mrf.mxu1 }
 0x410   :  { %v4931_v1 = vadd.f32 %v8487_v61, %v8478_v22  ;;  %v4954_v16 = vmul.f32 %v8487_v61, %v8487_v61  ;;  %v8527_v11 = vadd.f32 %v5856_v33, %v4796_v3  ;;  %v8820_v33 = vld [vmem:[#allocation13_spill] sm:$0xff]  ;;  %v5718_v3 = vadd.f32 %v8826_v36, %v8825_v58 }
 0x411   :  { %v4884_v35 = vpop.f32.mrf.mxu1 }
 0x412   :  { %v4932_v26 = vadd.f32 %v4931_v1, %v8485_v53  ;;  %v4969_v29 = vadd.f32 %v4954_v16, %v4953_v55  ;;  %v8511_v7 = vadd.f32 %v4884_v35, %v4788_v31  ;;  %v5773_v31 = vadd.f32 %v8820_v33, %v8819_v62  ;;  %v8821_v55 = vld [vmem:[#allocation5_spill] sm:$0xff]  ;;  %v8822_v35 = vld [vmem:[#allocation8_spill] sm:$0xff] }
 0x413   :  { %v5857_v21 = vpop.f32.mrf.mxu1  ;;  %v4718_v1 = vadd.f32 %v5709_v13, %v8821_v55  ;;  %v4959_v43 = vmul.f32 %v8527_v11, %v8527_v11  ;;  %v4807_v13 = vadd.f32 %v5767_v59, %v4710_v19 }
 0x414   :  { %v4970_v12 = vadd.f32 %v4969_v29, %v4955_v48  ;;  %v4933_v5 = vadd.f32 %v4932_v26, %v8495_v4  ;;  %v4957_v40 = vmul.f32 %v8511_v7, %v8511_v7  ;;  %v8538_v24 = vadd.f32 %v5857_v21, %v4799_v57  ;;  %v8823_v26 = vld [vmem:[#allocation14_spill] sm:$0xff] }
 0x415   :  { %v4887_v37 = vpop.f32.mrf.mxu1  ;;  %v4723_v48 = vadd.f32 %v5712_v47, %v8822_v35  ;;  %v8824_v29 = vld [vmem:[#allocation18_spill] sm:$0xff]  ;;  %v4812_v21 = vadd.f32 %v5770_v6, %v4715_v0  ;;  %v5776_v57 = vadd.f32 %v8469_v17, %v8462_v8  ;;  %v8828_v47 = vld [vmem:[#allocation11_spill] sm:$0xff]  ;;  %v8830_v17 = vld [vmem:[#allocation24_spill] sm:$0xff] }
 0x416   :  { %v4934_v42 = vadd.f32 %v4933_v5, %v8511_v7  ;;  %v4971_v44 = vadd.f32 %v4970_v12, %v4956_v25  ;;  %v8532_v49 = vadd.f32 %v4887_v37, %v4791_v32  ;;  %v5715_v52 = vadd.f32 %v8824_v29, %v8823_v26  ;;  %v5783_v12 = vpop.f32.mrf.mxu0  ;;  %v8827_v37 = vld [vmem:[#allocation6_spill] sm:$0xff] }
 0x417   :  { %v5860_v2 = vpop.f32.mrf.mxu1  ;;  %v4960_v5 = vmul.f32 %v8538_v24, %v8538_v24  ;;  %v4637_v19 = vadd.f32 %v8483_v41, %v8828_v47  ;;  %v5782_v41 = vadd.f32 %v5781_v15, %v8518_v18 }
 0x418   :  { %v4972_v54 = vadd.f32 %v4971_v44, %v4957_v40  ;;  %v4935_v51 = vadd.f32 %v4934_v42, %v8532_v49  ;;  %v4958_v14 = vmul.f32 %v8532_v49, %v8532_v49  ;;  %v5721_v42 = vadd.f32 %v8464_v56, %v8827_v37 }
 0x419   :  { %v4900_v16 = vpop.f32.mrf.mxu1  ;;  %v8567_v40 = vadd.f32 %v5860_v2, %v4812_v21  ;;  %v4815_v44 = vadd.f32 %v5773_v31, %v4718_v1  ;;  %v4820_v2 = vadd.f32 %v5776_v57, %v4723_v48 }
 0x41a   :  { %v4936_v27 = vadd.f32 %v4935_v51, %v8527_v11  ;;  %v4973_v46 = vadd.f32 %v4972_v54, %v4958_v14  ;;  %v8553_v45 = vadd.f32 %v4900_v16, %v4804_v38  ;;  %v8829_v38 = vld [vmem:[#allocation17_spill] sm:$0xff]  ;;  %v4731_v54 = vadd.f32 %v5718_v3, %v8830_v17  ;;  %v5784_v51 = vpop.f32.mrf.mxu0 }
 0x41b   :  { %v5861_v25 = vpop.f32.mrf.mxu1  ;;  %v4726_v8 = vadd.f32 %v5715_v52, %v8829_v38  ;;  %v4734_v9 = vadd.f32 %v5721_v42, %v4637_v19  ;;  %v4963_v62 = vmul.f32 %v8567_v40, %v8567_v40  ;;  %v5785_v1 = vadd.f32 %v5784_v51, %v5783_v12 }
 0x41c   :  { %v4974_v32 = vadd.f32 %v4973_v46, %v4959_v43  ;;  %v4937_v63 = vadd.f32 %v4936_v27, %v8538_v24  ;;  %v4961_v0 = vmul.f32 %v8553_v45, %v8553_v45  ;;  %v8578_v28 = vadd.f32 %v5861_v25, %v4815_v44 }
 0x41d   :  { %v4903_v50 = vpop.f32.mrf.mxu1  ;;  %v4828_v16 = vadd.f32 %v5782_v41, %v4731_v54  ;;  %v4823_v39 = vadd.f32 %v5779_v20, %v4726_v8  ;;  %v4831_v15 = vadd.f32 %v5785_v1, %v4734_v9 }
 0x41e   :  { %v4938_v10 = vadd.f32 %v4937_v63, %v8553_v45  ;;  %v4975_v34 = vadd.f32 %v4974_v32, %v4960_v5  ;;  %v8572_v30 = vadd.f32 %v4903_v50, %v4807_v13  ;;  %v4964_v27 = vmul.f32 %v8578_v28, %v8578_v28 }
 0x41f   :  { %v5864_v56 = vpop.f32.mrf.mxu1 }
 0x420   :  { %v4976_v14 = vadd.f32 %v4975_v34, %v4961_v0  ;;  %v4939_v60 = vadd.f32 %v4938_v10, %v8572_v30  ;;  %v4962_v59 = vmul.f32 %v8572_v30, %v8572_v30  ;;  %v8594_v18 = vadd.f32 %v5864_v56, %v4828_v16 }
 0x421   :  { %v4916_v6 = vpop.f32.mrf.mxu1 }
 0x422   :  { %v4940_v33 = vadd.f32 %v4939_v60, %v8567_v40  ;;  %v4977_v31 = vadd.f32 %v4976_v14, %v4962_v59  ;;  %v8589_v55 = vadd.f32 %v4916_v6, %v4820_v2  ;;  %v4967_v25 = vmul.f32 %v8594_v18, %v8594_v18 }
 0x423   :  { %v5865_v43 = vpop.f32.mrf.mxu1 }
 0x424   :  { %v4978_v46 = vadd.f32 %v4977_v31, %v4963_v62  ;;  %v4941_v23 = vadd.f32 %v4940_v33, %v8578_v28  ;;  %v4965_v26 = vmul.f32 %v8589_v55, %v8589_v55  ;;  %v8601_v36 = vadd.f32 %v5865_v43, %v4831_v15 }
 0x425   :  { %v4919_v35 = vpop.f32.mrf.mxu1 }
 0x426   :  { %v4942_v48 = vadd.f32 %v4941_v23, %v8589_v55  ;;  %v4979_v29 = vadd.f32 %v4978_v46, %v4964_v27  ;;  %v8599_v52 = vadd.f32 %v4919_v35, %v4823_v39  ;;  %v4968_v32 = vmul.f32 %v8601_v36, %v8601_v36 }
 0x428   :  { %v4980_v58 = vadd.f32 %v4979_v29, %v4965_v26  ;;  %v4943_v3 = vadd.f32 %v4942_v48, %v8599_v52  ;;  %v4966_v21 = vmul.f32 %v8599_v52, %v8599_v52 }
 0x42a   :  { %v4944_v12 = vadd.f32 %v4943_v3, %v8594_v18  ;;  %v4981_v5 = vadd.f32 %v4980_v58, %v4966_v21 }
 0x42c   :  { %v4945_v63 = vadd.f32 %v4944_v12, %v8601_v36  ;;  %v4982_v13 = vadd.f32 %v4981_v5, %v4967_v25 }
 0x42e   :  { %v4946_v57 = vrot.slane %v4945_v63, 4  ;;  %v4983_v37 = vadd.f32 %v4982_v13, %v4968_v32  ;;  %v5257_v32 = vld [vmem:[%s8688_s6] ss:$0 sm:$0xff] }
 0x430   :  { %v4947_v42 = vadd.f32 %v4946_v57, %v4945_v63  ;;  %v4984_v44 = vrot.slane %v4983_v37, 4 }
 0x432   :  { %v4948_v50 = vrot.slane %v4947_v42, 2  ;;  %v4985_v10 = vadd.f32 %v4984_v44, %v4983_v37 }
 0x434   :  { %v4949_v0 = vadd.f32 %v4948_v50, %v4947_v42  ;;  %v4986_v34 = vrot.slane %v4985_v10, 2 }
 0x436   :  { %v4950_v47 = vrot.slane %v4949_v0, 1  ;;  %v4987_v19 = vadd.f32 %v4986_v34, %v4985_v10 }
 0x438   :  { %v4951_v38 = vadd.f32 %v4950_v47, %v4949_v0  ;;  %v4988_v8 = vrot.slane %v4987_v19, 1 }
 0x43a   :  { %v4952_v17 = vmul.f32 0.0078125, %v4951_v38  ;;  %v4989_v54 = vadd.f32 %v4988_v8, %v4987_v19 }
 0x43c   :  { %v4990_v56 = vmul.f32 0.0078125, %v4989_v54  ;;  %v4991_v2 = vmul.f32 %v4952_v17, %v4952_v17  ;;  %v4994_v51 = vsub.f32 %v8478_v22, %v4952_v17  ;;  %v4995_v14 = vsub.f32 %v8487_v61, %v4952_v17 }
 0x43d   :  { %v4996_v60 = vsub.f32 %v8485_v53, %v4952_v17  ;;  %v4997_v59 = vsub.f32 %v8495_v4, %v4952_v17  ;;  %v4998_v20 = vsub.f32 %v8511_v7, %v4952_v17  ;;  %v4999_v41 = vsub.f32 %v8532_v49, %v4952_v17 }
 0x43e   :  { %v4992_v9 = vsub.f32 %v4990_v56, %v4991_v2  ;;  %v5000_v6 = vsub.f32 %v8527_v11, %v4952_v17  ;;  %v5001_v62 = vsub.f32 %v8538_v24, %v4952_v17  ;;  %v5002_v33 = vsub.f32 %v8553_v45, %v4952_v17 }
 0x43f   :  { %v5003_v31 = vsub.f32 %v8572_v30, %v4952_v17  ;;  %v5004_v22 = vsub.f32 %v8567_v40, %v4952_v17  ;;  %v5005_v61 = vsub.f32 %v8578_v28, %v4952_v17  ;;  %v5006_v53 = vsub.f32 %v8589_v55, %v4952_v17  ;;  %v5256_v55 = vld [vmem:[%s8687_s5] ss:$0 sm:$0xff] }
 0x440   :  { %v4993_v4 = vmax.f32 %v4992_v9, 0.0  ;;  %v5007_v7 = vsub.f32 %v8599_v52, %v4952_v17  ;;  %v5008_v49 = vsub.f32 %v8594_v18, %v4952_v17  ;;  %v5009_v1 = vsub.f32 %v8601_v36, %v4952_v17 }
 0x442   :  { %v5010_v11 = vadd.f32 1e-05, %v4993_v4 }
 0x444   :  { %6014 = vrsqrt.f32 %v5010_v11 }
 0x451   :  { %v6015_v24 = vpop.eup %6014 }
 0x452   :  { %v5012_v16 = vmul.f32 %v6015_v24, %v4994_v51  ;;  %v5013_v45 = vmul.f32 %v6015_v24, %v4995_v14  ;;  %v5014_v43 = vmul.f32 %v6015_v24, %v4996_v60  ;;  %v5015_v30 = vmul.f32 %v6015_v24, %v4997_v59 }
 0x453   :  { %v5016_v27 = vmul.f32 %v6015_v24, %v4998_v20  ;;  %v5017_v40 = vmul.f32 %v6015_v24, %v4999_v41  ;;  %v5018_v46 = vmul.f32 %v6015_v24, %v5000_v6  ;;  %v5019_v28 = vmul.f32 %v6015_v24, %v5001_v62 }
 0x454   :  { %v5020_v23 = vmul.f32 %v6015_v24, %v5002_v33  ;;  %v5021_v39 = vmul.f32 %v6015_v24, %v5003_v31  ;;  %v5022_v18 = vmul.f32 %v6015_v24, %v5004_v22  ;;  %v5023_v15 = vmul.f32 %v6015_v24, %v5005_v61 }
 0x455   :  { %v5024_v35 = vmul.f32 %v6015_v24, %v5006_v53  ;;  %v5025_v48 = vmul.f32 %v6015_v24, %v5007_v7  ;;  %v5026_v26 = vmul.f32 %v6015_v24, %v5008_v49  ;;  %v5027_v29 = vmul.f32 %v6015_v24, %v5009_v1 }
 0x456   :  { %v5035_v52 = vmul.f32 %v5256_v55, %v5012_v16  ;;  %v5036_v58 = vmul.f32 %v5256_v55, %v5013_v45  ;;  %v5037_v36 = vmul.f32 %v5256_v55, %v5014_v43  ;;  %v5038_v3 = vmul.f32 %v5256_v55, %v5015_v30 }
 0x457   :  { %v5039_v21 = vmul.f32 %v5256_v55, %v5016_v27  ;;  %v5040_v25 = vmul.f32 %v5256_v55, %v5017_v40  ;;  %v5041_v12 = vmul.f32 %v5256_v55, %v5018_v46  ;;  %v5042_v5 = vmul.f32 %v5256_v55, %v5019_v28 }
 0x458   :  { %v5043_v63 = vmul.f32 %v5256_v55, %v5020_v23  ;;  %v5044_v13 = vmul.f32 %v5256_v55, %v5021_v39  ;;  %v5045_v57 = vmul.f32 %v5256_v55, %v5022_v18  ;;  %v5046_v37 = vmul.f32 %v5256_v55, %v5023_v15 }
 0x459   :  { %v5047_v42 = vmul.f32 %v5256_v55, %v5024_v35  ;;  %v5048_v44 = vmul.f32 %v5256_v55, %v5025_v48  ;;  %v5049_v50 = vmul.f32 %v5256_v55, %v5026_v26  ;;  %v5050_v10 = vmul.f32 %v5256_v55, %v5027_v29 }
 0x45a   :  { %v5058_v0 = vadd.f32 %v5257_v32, %v5035_v52  ;;  %v5059_v34 = vadd.f32 %v5257_v32, %v5036_v58  ;;  %v5060_v47 = vadd.f32 %v5257_v32, %v5037_v36  ;;  %v5061_v19 = vadd.f32 %v5257_v32, %v5038_v3 }
 0x45b   :  { %v5062_v38 = vadd.f32 %v5257_v32, %v5039_v21  ;;  %v5063_v8 = vadd.f32 %v5257_v32, %v5040_v25  ;;  %v5064_v17 = vadd.f32 %v5257_v32, %v5041_v12  ;;  %v5065_v54 = vadd.f32 %v5257_v32, %v5042_v5 }
 0x45c   :  { %v5066_v56 = vadd.f32 %v5257_v32, %v5043_v63  ;;  %v5067_v2 = vadd.f32 %v5257_v32, %v5044_v13  ;;  %v5068_v51 = vadd.f32 %v5257_v32, %v5045_v57  ;;  %v5069_v14 = vadd.f32 %v5257_v32, %v5046_v37 }
 0x45d   :  { %v5070_v60 = vadd.f32 %v5257_v32, %v5047_v42  ;;  %v5071_v59 = vadd.f32 %v5257_v32, %v5048_v44  ;;  %v5072_v20 = vadd.f32 %v5257_v32, %v5049_v50  ;;  %v5073_v41 = vadd.f32 %v5257_v32, %v5050_v10 }
 0x45e   :  { %v5074_v9 = vmax.f32 %v5058_v0, 0.0  ;;  %v5075_v6 = vmax.f32 %v5059_v34, 0.0  ;;  %v5076_v62 = vmax.f32 %v5060_v47, 0.0  ;;  %v5077_v33 = vmax.f32 %v5061_v19, 0.0 }
 0x45f   :  { %v5078_v31 = vmax.f32 %v5062_v38, 0.0  ;;  %v5079_v22 = vmax.f32 %v5063_v8, 0.0  ;;  %v5080_v61 = vmax.f32 %v5064_v17, 0.0  ;;  %v5081_v53 = vmax.f32 %v5065_v54, 0.0 }
 0x460   :  { %v5082_v4 = vmax.f32 %v5066_v56, 0.0  ;;  %v5083_v7 = vmax.f32 %v5067_v2, 0.0  ;;  %v5084_v49 = vmax.f32 %v5068_v51, 0.0  ;;  %v5085_v1 = vmax.f32 %v5069_v14, 0.0  ;;  %5090 = vst [vmem:[%s8689_s7] sm:$0xff] %v5074_v9  ;;  %5091 = vst [vmem:[%s8689_s7 + $0x8] sm:$0xff] %v5075_v6 }
 0x461   :  { %5092 = vst [vmem:[%s8689_s7 + $0x10] sm:$0xff] %v5076_v62  ;;  %5093 = vst [vmem:[%s8689_s7 + $0x18] sm:$0xff] %v5077_v33  ;;  %v5086_v11 = vmax.f32 %v5070_v60, 0.0  ;;  %v5087_v24 = vmax.f32 %v5071_v59, 0.0  ;;  %v5088_v16 = vmax.f32 %v5072_v20, 0.0  ;;  %v5089_v45 = vmax.f32 %v5073_v41, 0.0 }
 0x462   :  { %5094 = vst [vmem:[%s8689_s7 + $0x20] sm:$0xff] %v5078_v31  ;;  %5095 = vst [vmem:[%s8689_s7 + $0x28] sm:$0xff] %v5079_v22 }
 0x463   :  { %5096 = vst [vmem:[%s8689_s7 + $0x30] sm:$0xff] %v5080_v61  ;;  %5097 = vst [vmem:[%s8689_s7 + $0x38] sm:$0xff] %v5081_v53 }
 0x464   :  { %5098 = vst [vmem:[%s8689_s7 + $0x40] sm:$0xff] %v5082_v4  ;;  %5099 = vst [vmem:[%s8689_s7 + $0x48] sm:$0xff] %v5083_v7 }
 0x465   :  { %5100 = vst [vmem:[%s8689_s7 + $0x50] sm:$0xff] %v5084_v49  ;;  %5101 = vst [vmem:[%s8689_s7 + $0x58] sm:$0xff] %v5085_v1 }
 0x466   :  { %5102 = vst [vmem:[%s8689_s7 + $0x60] sm:$0xff] %v5086_v11  ;;  %5103 = vst [vmem:[%s8689_s7 + $0x68] sm:$0xff] %v5087_v24 }
 0x467   :  { %5104 = vst [vmem:[%s8689_s7 + $0x70] sm:$0xff] %v5088_v16  ;;  %5105 = vst [vmem:[%s8689_s7 + $0x78] sm:$0xff] %v5089_v45 }

</bundles_post_ra>
